<compile_context>
chip_gen: v6e
topology: v6e:2x2x1
jax: 0.10.0
libtpu: 0.0.40
codegen_flags: <defaults>
</compile_context>

<pallas_src>
import functools

import jax
import jax.numpy as jnp
from jax import lax
from jax.experimental import pallas as pl
from jax.experimental.pallas import tpu as pltpu

IN_FEATURES = 196608   # fixed by the module definition
OUT_FEATURES = 10

N_SPLITS = 2  # leading "parallel" grid axis -> 2 TensorCores on v7x


def _linear_kernel(x_ref, w_ref, o_ref, acc_ref):
    """One K-tile of a partial y = x @ W.T, accumulated across grid axis 1."""
    k = pl.program_id(1)

    @pl.when(k == 0)
    def _():
        acc_ref[...] = jnp.zeros_like(acc_ref)

    # x_ref: (B, tk), w_ref: (N, tk)  (PyTorch-native, lane-dense layout).
    # Contract the K (lane) axis of both -> (B, N), f32 accumulation.
    acc_ref[...] += lax.dot_general(
        x_ref[...],
        w_ref[...],
        dimension_numbers=(((1,), (1,)), ((), ())),
        preferred_element_type=jnp.float32,
    )

    @pl.when(k == pl.num_programs(1) - 1)
    def _():
        o_ref[...] = acc_ref[...].astype(o_ref.dtype)


@functools.partial(jax.jit, static_argnames=("tk",))
def tudui_forward(x, w, b, *, tk=49152):
    """x: (B, K) f32, w: (N, K) f32 (PyTorch layout), b: (N,) f32 -> (B, N)."""
    B, K = x.shape
    N, K_w = w.shape
    assert K == K_w, "weight in_features must match input"
    assert K % (N_SPLITS * tk) == 0, "tk must divide K / N_SPLITS"
    steps = K // (N_SPLITS * tk)  # reduction steps per core-split

    partials = pl.pallas_call(
        _linear_kernel,
        out_shape=jax.ShapeDtypeStruct((N_SPLITS, B, N), jnp.float32),
        grid_spec=pltpu.PrefetchScalarGridSpec(
            num_scalar_prefetch=0,
            grid=(N_SPLITS, steps),
            in_specs=[
                # x tile: (B, tk) marching along K, offset by the core split.
                pl.BlockSpec((B, tk), lambda c, k: (0, c * steps + k)),
                # weight tile: lane-dense (N, tk) marching along K.
                pl.BlockSpec((N, tk), lambda c, k: (0, c * steps + k)),
            ],
            # one (B, N) partial per core-split; resident across the K axis.
            out_specs=pl.BlockSpec((None, B, N), lambda c, k: (c, 0, 0)),
            scratch_shapes=[pltpu.VMEM((B, N), jnp.float32)],
        ),
        compiler_params=pltpu.CompilerParams(
            dimension_semantics=("parallel", "arbitrary"),
        ),
    )(x, w)

    # Cheap epilogue in plain XLA: combine the K-split partials + bias.
    return (partials.sum(axis=0) + b[None, :]).astype(x.dtype)


if __name__ == "__main__":
    key = jax.random.PRNGKey(0)
    k_x, k_w, k_b = jax.random.split(key, 3)

    # Small batch; in_features is fixed at 196608 by the module itself.
    B = 2
    x = jax.random.normal(k_x, (B, IN_FEATURES), dtype=jnp.float32)

    # Deterministic init mimicking nn.Linear: U(-1/sqrt(in), 1/sqrt(in)).
    bound = 1.0 / (IN_FEATURES ** 0.5)
    # PyTorch weight layout is (out_features, in_features) = (10, 196608).
    w = jax.random.uniform(
        k_w, (OUT_FEATURES, IN_FEATURES), dtype=jnp.float32,
        minval=-bound, maxval=bound,
    )
    b = jax.random.uniform(
        k_b, (OUT_FEATURES,), dtype=jnp.float32, minval=-bound, maxval=bound
    )

    out = tudui_forward(x, w, b)
    jax.block_until_ready(out)

    # Correctness check against plain JAX reference.
    ref = x @ w.T + b
    assert out.shape == (B, OUT_FEATURES)
    assert jnp.allclose(out, ref, atol=1e-2, rtol=1e-3), "mismatch vs reference"

    print("KERNEL_OK")
</pallas_src>

<mosaic_0001>
module attributes {stable_mosaic.version = 11 : i64} {
  func.func @_linear_kernel(%arg0: i32, %arg1: i32, %arg2: memref<2x49152xf32, #tpu.memory_space<vmem>>, %arg3: memref<10x49152xf32, #tpu.memory_space<vmem>>, %arg4: memref<1x2x10xf32, #tpu.memory_space<vmem>>, %arg5: memref<2x10xf32, #tpu.memory_space<vmem>>) attributes {dimension_semantics = [#tpu.dimension_semantics<parallel>, #tpu.dimension_semantics<arbitrary>], iteration_bounds = array<i64: 2, 2>, scalar_prefetch = 0 : i64, scratch_operands = 1 : i64, tpu.core_type = #tpu.core_type<tc>, window_params = [{transform_indices = @transform_0, window_bounds = array<i64: 2, 49152>}, {transform_indices = @transform_1, window_bounds = array<i64: 10, 49152>}, {transform_indices = @transform_2, window_bounds = array<i64: 1, 2, 10>}]} {
    %c0_i32 = arith.constant 0 : i32
    %0 = arith.cmpi eq, %arg1, %c0_i32 : i32
    %1 = arith.extui %0 : i1 to i32
    %c0_i32_0 = arith.constant 0 : i32
    %2 = arith.cmpi ne, %1, %c0_i32_0 : i32
    scf.if %2 {
      %cst_9 = arith.constant 0.000000e+00 : f32
      %12 = vector.broadcast %cst_9 : f32 to vector<2x10xf32>
      %c0_10 = arith.constant 0 : index
      %c0_11 = arith.constant 0 : index
      %13 = vector.load %arg5[%c0_10, %c0_11] : memref<2x10xf32, #tpu.memory_space<vmem>>, vector<2x10xf32>
      tpu.vector_store %arg5[%c0_10, %c0_11], %12 {strides = array<i32>} : memref<2x10xf32, #tpu.memory_space<vmem>>, vector<2x10xf32>,
    } else {
    }
    %c0 = arith.constant 0 : index
    %c0_1 = arith.constant 0 : index
    %3 = vector.load %arg5[%c0, %c0_1] : memref<2x10xf32, #tpu.memory_space<vmem>>, vector<2x10xf32>
    %c0_2 = arith.constant 0 : index
    %c0_3 = arith.constant 0 : index
    %4 = vector.load %arg2[%c0_2, %c0_3] : memref<2x49152xf32, #tpu.memory_space<vmem>>, vector<2x49152xf32>
    %c0_4 = arith.constant 0 : index
    %c0_5 = arith.constant 0 : index
    %5 = vector.load %arg3[%c0_4, %c0_5] : memref<10x49152xf32, #tpu.memory_space<vmem>>, vector<10x49152xf32>
    %cst = arith.constant dense<0.000000e+00> : vector<2x10xf32>
    %6 = tpu.matmul %4, %5, %cst {dimension_numbers = #tpu.dot_dimension_numbers<[1], [1], [0], [0], [0, 0, 1, 0], [], []>} : vector<2x49152xf32>, vector<10x49152xf32>, vector<2x10xf32> -> vector<2x10xf32>
    %7 = arith.addf %3, %6 : vector<2x10xf32>
    %c0_6 = arith.constant 0 : index
    %c0_7 = arith.constant 0 : index
    %8 = vector.load %arg5[%c0_6, %c0_7] : memref<2x10xf32, #tpu.memory_space<vmem>>, vector<2x10xf32>
    tpu.vector_store %arg5[%c0_6, %c0_7], %7 {strides = array<i32>} : memref<2x10xf32, #tpu.memory_space<vmem>>, vector<2x10xf32>,
    %c1_i32 = arith.constant 1 : i32
    %9 = arith.cmpi eq, %arg1, %c1_i32 : i32
    %10 = arith.extui %9 : i1 to i32
    %c0_i32_8 = arith.constant 0 : i32
    %11 = arith.cmpi ne, %10, %c0_i32_8 : i32
    scf.if %11 {
      %c0_9 = arith.constant 0 : index
      %c0_10 = arith.constant 0 : index
      %12 = vector.load %arg5[%c0_9, %c0_10] : memref<2x10xf32, #tpu.memory_space<vmem>>, vector<2x10xf32>
      %c0_11 = arith.constant 0 : index
      %c0_12 = arith.constant 0 : index
      %c0_13 = arith.constant 0 : index
      %13 = vector.load %arg4[%c0_11, %c0_12, %c0_13] : memref<1x2x10xf32, #tpu.memory_space<vmem>>, vector<1x2x10xf32>
      %14 = vector.shape_cast %13 : vector<1x2x10xf32> to vector<2x10xf32>
      %15 = vector.shape_cast %12 : vector<2x10xf32> to vector<1x2x10xf32>
      tpu.vector_store %arg4[%c0_11, %c0_12, %c0_13], %15 {strides = array<i32>} : memref<1x2x10xf32, #tpu.memory_space<vmem>>, vector<1x2x10xf32>,
    } else {
    }
    return
  }
  func.func @transform_0(%arg0: i32, %arg1: i32) -> (i32, i32) {
    %c2_i32 = arith.constant 2 : i32
    %0 = arith.muli %arg0, %c2_i32 : i32
    %1 = arith.addi %0, %arg1 : i32
    %c0_i32 = arith.constant 0 : i32
    %c0_i32_0 = arith.constant 0 : i32
    return %c0_i32, %1 : i32, i32
  }
  func.func @transform_1(%arg0: i32, %arg1: i32) -> (i32, i32) {
    %c2_i32 = arith.constant 2 : i32
    %0 = arith.muli %arg0, %c2_i32 : i32
    %1 = arith.addi %0, %arg1 : i32
    %c0_i32 = arith.constant 0 : i32
    %c0_i32_0 = arith.constant 0 : i32
    return %c0_i32, %1 : i32, i32
  }
  func.func @transform_2(%arg0: i32, %arg1: i32) -> (i32, i32, i32) {
    %c0_i32 = arith.constant 0 : i32
    %c0_i32_0 = arith.constant 0 : i32
    %c0_i32_1 = arith.constant 0 : i32
    return %arg0, %c0_i32, %c0_i32_0 : i32, i32, i32
  }
}

</mosaic_0001>

<bundles_post_ra>
// kernel: tudui_forward.1
= control target key start
LH: loop header
LB: loop body
LE: loop exit
PB: predicated region body
PF: predicated region fallthrough
CT: control target
= control target key end

     0   :  { %7 = vsyncpa [#allocation4], 0  ;;  %s18326_s0 = inlined_call_operand.hbm [shape: f32[2,196608], index: 0, kind: input, shape index: {}]   ;;  %s18327_s1 = inlined_call_operand.hbm [shape: f32[10,196608], index: 1, kind: input, shape index: {}]   ;;  %s18328_s2 = inlined_call_operand.vmem [shape: f32[2,2,10], index: 2, kind: output, shape index: {}]  }
   0x1   :  { %9 = vsyncpa [#allocation4 + $0x1], 0 }
   0x2   :  { %10 = vsyncpa [#allocation6], 0 }
   0x3   :  { %12 = vsyncpa [#allocation6 + $0x1], 0  ;;  %s17116_s9 = smov 0   ;;  %s17118_s10 = smov 0  }
   0x4   :  { %s17120_s11 = smov 0   ;;  %s17122_s12 = smov 0  }
   0x5   :  { %s17124_s13 = smov 0   ;;  %s17126_s14 = smov 0  }
   0x6   :  { %s17128_s15 = smov 0   ;;  %s17130_s16 = smov 0  }
   0x7 LB: > { %s16765_s17 = sadd.s32 4294967295, %s17092_s16   ;;  %s27_s18 = sadd.s32 1, %s17084_s14  ;;  %s17092_s16 = sphi %s17130_s16, %s18_s16   ;;  %s17088_s15 = sphi %s17128_s15, %s18338_s15   ;;  %s17084_s14 = sphi %s17126_s14, %s18337_s14   ;;  %s17080_s13 = sphi %s17124_s13, %s18336_s13   ;;  %s17076_s12 = sphi %s17122_s12, %s18335_s12   ;;  %s17072_s11 = sphi %s17120_s11, %s18334_s11   ;;  %s17068_s10 = sphi %s17118_s10, %s18333_s10   ;;  %s17064_s9 = sphi %s17116_s9, %s18332_s9  }
   0x8   : > { %p28_p0 = scmp.ge.s32.totalorder %s27_s18, 2  ;;  %s30_s19 = sadd.s32 1, %s17088_s15 }
   0x9   : > { %s16767_s20 = sshll.u32 %s17088_s15, 1  ;;  %s41_s21 = sadd.s32 1, %s17072_s11 }
   0xa   : > { %s18340_s18 = smov (%p28_p0, %s27_s18), 0  ;;  %s18342_s19 = smov (!%p28_p0, %s30_s19), %s17088_s15 }
   0xb   : > { %s17163_s22 = sadd.s32 %s17084_s14, %s16767_s20  ;;  %p48_p1 = scmp.ne.s32.totalorder %s17072_s11, %s17068_s10 }
   0xc   : > { %p32_p2 = scmp.ge.s32.totalorder %s18342_s19, 2  ;;  %p49_p3 = scmp.eq.s32.totalorder %s17092_s16, 0 }
   0xd   : > { %p54_p4 = scmp.ne.s32.totalorder %s17068_s10, %s17064_s9  ;;  %p55_p5 = scmp.eq.s32.totalorder %s16765_s17, 0 }
   0xe   : > { %s18344_s19 = smov (%p32_p2, %s18342_s19), 0  ;;  %p50_p6 = por %p49_p3, %p48_p1 }
   0xf   : > { %p17171_p7 = por %p55_p5, %p54_p4  ;;  %s16768_s24 = sshll.u32 %s18344_s19, 1 }
  0x10   : > { %s37_s25 = sadd.s32 %s16768_s24, %s18340_s18  ;;  %p16800_p8 = scmp.lt.s32.totalorder %s17092_s16, 4 }
  0x11   : > { %s38_s26 = ssub.s32 %s17163_s22, %s37_s25  ;;  %s17180_s27 = sand.u32 1, %s17072_s11  }
  0x12   : > { %p39_p9 = scmp.eq.s32.totalorder %s38_s26, 0  ;;  %s16785_s28 = smul.u32 768, %s17180_s27 }
  0x13   : > { %p17183_p10 = pnand %p16800_p8, %p50_p6  ;;  %s16783_s3 = smul.u32 12288, %s17163_s22 }
  0x14   : > { %s17188_s30 = scalar_select %p39_p9, %s17072_s11, %s41_s21  }
  0x15   : > { %s138_s4 = scalar_lea.vmem [#allocation3], %s16785_s28  ;;  %s146_s8 = scalar_lea.hbm %s18326_s0, %s16783_s3 }
  0x16   : > { %s148_s5 = sshll.u32 %s138_s4, 4  ;;  %s135_s9 = scalar_lea.sflag [#allocation4], %s17180_s27  ;;  %s149_s5 = int_to_ptr.vmem [resolvable:$true] %s148_s5 }
  0x17   : > { %p16968_p11 = pneg %p17183_p10  ;;  %s16979_s17 = scalar_lea.vmem %s149_s5, 12288 }
  0x18   : > { %p16980_p12 = scmp.ne.s32.totalorder %s149_s5, %s16979_s17  ;;  %s17094_s20 = smov [#allocation3]  }
  0x19   : > { %s16984_s21 = sshll.u32 %s17094_s20, 4  ;;  %s16985_s21 = int_to_ptr.vmem [resolvable:$false] %s16984_s21 }
  0x1a   : > { %p16982_p13 = pnand %p16980_p12, %p16968_p11  ;;  %s16986_s24 = scalar_lea.vmem %s16985_s21, 24576 }
  0x1b   : > { %p16987_p1 = scmp.lt.s32.totalorder %s149_s5, %s16985_s21  ;;  %p16988_p2 = scmp.lt.s32.totalorder %s16986_s24, %s16979_s17 }
  0x1c   : > { %p16983_p0 = pneg %p16982_p13 }
  0x1d   : > { %p16989_p3 = por %p16988_p2, %p16987_p1 }
  0x1f   : > { %p16990_p4 = pnand %p16989_p3, %p16983_p0 }
  0x21   : > { %16993 = shalt.err (!%p16990_p4)
}
  0x22   : > { %16796 = dma.hbm_to_vmem [thread:$0]  (!%p17183_p10), %s146_s8, 12288, %s149_s5, %s135_s9  }
  0x23   : > { %s16786_s25 = smul.u32 6144, %s17180_s27  ;;  %p16777_p5 = scmp.ge.s32.totalorder %s17092_s16, 1 }
  0x24   : > { %s16784_s26 = smul.u32 49152, %s17163_s22  ;;  %p176_p6 = scmp.lt.s32.totalorder %s17092_s16, 5 }
  0x25   : > { %s159_s6 = scalar_lea.vmem [#allocation5], %s16786_s25  ;;  %s156_s20 = scalar_lea.sflag [#allocation6], %s17180_s27 }
  0x26   : > { %s167_s4 = scalar_lea.hbm %s18327_s1, %s16784_s26  ;;  %s168_s7 = sshll.u32 %s159_s6, 4  ;;  %s169_s7 = int_to_ptr.vmem [resolvable:$true] %s168_s7 }
  0x27   : > { %p17209_p8 = pnand %p16777_p5, %p176_p6  ;;  %s17007_s21 = scalar_lea.vmem %s169_s7, 98304 }
  0x28   : > { %p17008_p9 = scmp.ne.s32.totalorder %s169_s7, %s17007_s21  ;;  %s17095_s22 = smov [#allocation5]  }
  0x29   : > { %s17012_s5 = sshll.u32 %s17095_s22, 4  ;;  %s17013_s5 = int_to_ptr.vmem [resolvable:$false] %s17012_s5 }
  0x2a   : > { %p17010_p12 = pnand %p17008_p9, %p16968_p11  ;;  %s17014_s8 = scalar_lea.vmem %s17013_s5, 196608 }
  0x2b   : > { %p17015_p0 = scmp.lt.s32.totalorder %s169_s7, %s17013_s5  ;;  %p17016_p1 = scmp.lt.s32.totalorder %s17014_s8, %s17007_s21 }
  0x2c   : > { %p17011_p13 = pneg %p17010_p12 }
  0x2d   : > { %p17017_p2 = por %p17016_p1, %p17015_p0 }
  0x2f   : > { %p17018_p3 = pnand %p17017_p2, %p17011_p13 }
  0x31   : > { %17021 = shalt.err (!%p17018_p3)
}
  0x32   : > { %s17096_s9 = smov 196608   ;;  %s17097_s24 = smov 49152  }
  0x33   : > { %s17098_s25 = smov 3072   ;;  %180 = sbr.rel (%p17209_p8) target bundleno = 1052 (0x41c), region = 28 }
  0x34   : > { %16799 = dma.hbm_to_vmem [thread:$0]  (!%p17183_p10), %s167_s4, 98304, %s169_s7, %s156_s20, %s17096_s9, %s17097_s24, %s17098_s25  }
  0x35   : > { %s182_s27 = sand.u32 (!%p17209_p8), 1, %s17068_s10  }
  0x36   : > { %s16787_s26 = smul.u32 (!%p17209_p8), 768, %s182_s27  ;;  %s183_s28 = scalar_lea.sflag (!%p17209_p8), [#allocation4], %s182_s27 }
  0x38   : > { %s17222_s3 = scalar_lea.vmem [#allocation3], %s16787_s26 }
  0x39   : > { %17055 = dma.done.wait (%p17171_p7), %s183_s28, 12288  }
  0x3a   : > { %17057 = vsyncadd (%p17171_p7), %s183_s28, 4294955008  ;;  %s16788_s6 = smul.u32 6144, %s182_s27  ;;  %s192_s21 = scalar_lea.sflag [#allocation6], %s182_s27 }
  0x3c   : > { %s17228_s29 = scalar_lea.vmem [#allocation5], %s16788_s6 }
  0x3d   : > { %17059 = dma.done.wait (%p17171_p7), %s192_s21, 98304  }
  0x3e   : > { %17061 = vsyncadd (%p17171_p7), %s192_s21, 4294868992  ;;  %p226_p10 = scmp.lt.s32.totalorder %s17080_s13, 1  ;;  %p16779_p11 = scmp.ne.s32.totalorder %s17076_s12, 0 }
  0x40   : > { %s18346_s13 = smov (!%p226_p10, %s17080_s13), 1  ;;  %233 = sbr.rel (%p16779_p11) target bundleno = 71 (0x47), region = 40 }
  0x41   : > { %s16778_s4 = sshll.u32 %s18346_s13, 1 }
  0x42   : > { %s17239_s20 = scalar_lea.vmem %s18328_s2, %s16778_s4 }
  0x45   : > { %vm234_vm0 = vcmask 74752   ;;  %v17099_v0 = vmov 0.0  }
  0x46   : > { %235 = vst.msk [vmem:[#allocation2] sm:$0x3] %vm234_vm0, %v17099_v0 }
  0x47 PF: > { %v718_v1 = vld [vmem:[%s17228_s29 + $0xc08] sm:$0x3]  ;;  %v720_v2 = vld [vmem:[%s17228_s29 + $0xc18] sm:$0x3]  ;;  %v717_v3 = vld [vmem:[%s17228_s29 + $0xc00] sm:$0x3]  ;;  %v1201_v4 = vlaneseq }
  0x48   : > { %3241 = vmatprep.subr.mxu0 %v718_v1  ;;  %3311 = vmatprep.subr.mxu1 %v720_v2  ;;  %v719_v5 = vld [vmem:[%s17228_s29 + $0xc10] sm:$0x3]  ;;  %v334_v6 = vld [vmem:[%s17228_s29 + $0x8] sm:$0xff]  ;;  %v336_v7 = vld [vmem:[%s17228_s29 + $0x18] sm:$0xff]  ;;  %v17100_v9 = vmov 1983009808  }
  0x49   : > { %3242 = vmatpush1.xpose.msra.mxu0 %v717_v3  ;;  %3312 = vmatpush1.xpose.msra.mxu1 %v719_v5  ;;  %v237_v8 = vld [vmem:[%s17222_s3] sm:$0xff]  ;;  %v1199_v10 = vunpack.c.l.s4 %v17100_v9  ;;  %v1202_v11 = vshrl.u32 %v1201_v4, 7  ;;  %v335_v13 = vld [vmem:[%s17228_s29 + $0x10] sm:$0xff]  ;;  %v722_v16 = vld [vmem:[%s17228_s29 + $0xc28] sm:$0x3]  ;;  %vm16654_vm1 = vcmask 74752  }
  0x4a   : > { %3243 = vmatprep.subr.mxu0 %v334_v6  ;;  %3313 = vmatprep.subr.mxu1 %v336_v7  ;;  %v333_v12 = vld [vmem:[%s17228_s29] sm:$0xff]  ;;  %v1197_v15 = vcombine.high %v237_v8, %v237_v8  ;;  %v724_v17 = vld [vmem:[%s17228_s29 + $0xc38] sm:$0x3]  ;;  %v238_v18 = vld [vmem:[%s17222_s3 + $0x8] sm:$0xff]  ;;  %p16780_p7 = scmp.ne.s32.totalorder %s17076_s12, 1 }
  0x4b   : > { %v1200_v14 = vunpack.c.0.s8 %v1199_v10  ;;  %v1214_v20 = vcombine.high %v238_v18, %v238_v18  ;;  %v239_v25 = vld [vmem:[%s17222_s3 + $0x10] sm:$0xff]  ;;  %v721_v28 = vld [vmem:[%s17228_s29 + $0xc20] sm:$0x3]  ;;  %v338_v30 = vld [vmem:[%s17228_s29 + $0x28] sm:$0xff] }
  0x4c   : > { %v723_v29 = vld [vmem:[%s17228_s29 + $0xc30] sm:$0x3]  ;;  %v340_v31 = vld [vmem:[%s17228_s29 + $0x38] sm:$0xff]  ;;  %v1231_v34 = vcombine.high %v239_v25, %v239_v25  ;;  %v337_v35 = vld [vmem:[%s17228_s29 + $0x20] sm:$0xff] }
  0x4d   : > { %3244 = vmatpush1.xpose.msra.mxu0 %v333_v12  ;;  %3314 = vmatpush1.xpose.msra.mxu1 %v335_v13  ;;  %v17254_v19 = vsub.s32 %v1200_v14, %v1202_v11  ;;  %v339_v36 = vld [vmem:[%s17228_s29 + $0x30] sm:$0xff]  ;;  %v726_v37 = vld [vmem:[%s17228_s29 + $0xc48] sm:$0x3]  ;;  %v728_v38 = vld [vmem:[%s17228_s29 + $0xc58] sm:$0x3] }
  0x4e   : > { %3381 = vmatprep.subr.mxu0 %v722_v16  ;;  %3451 = vmatprep.subr.mxu1 %v724_v17  ;;  %v240_v41 = vld [vmem:[%s17222_s3 + $0x18] sm:$0xff]  ;;  %v725_v42 = vld [vmem:[%s17228_s29 + $0xc40] sm:$0x3]  ;;  %v727_v43 = vld [vmem:[%s17228_s29 + $0xc50] sm:$0x3] }
  0x4f   : > { %v1204_v21 = vrot.slane %v237_v8, %v17254_v19  ;;  %v1211_v22 = vrot.slane %v1197_v15, %v17254_v19  ;;  %v1221_v23 = vrot.slane %v238_v18, %v17254_v19  ;;  %v1228_v24 = vrot.slane %v1214_v20, %v17254_v19  ;;  %v342_v44 = vld [vmem:[%s17228_s29 + $0x48] sm:$0xff]  ;;  %v344_v45 = vld [vmem:[%s17228_s29 + $0x58] sm:$0xff]  ;;  %v341_v49 = vld [vmem:[%s17228_s29 + $0x40] sm:$0xff] }
  0x50   : > { %v1238_v39 = vrot.slane %v239_v25, %v17254_v19  ;;  %v1245_v40 = vrot.slane %v1231_v34, %v17254_v19  ;;  %v1248_v48 = vcombine.high %v240_v41, %v240_v41  ;;  %v343_v50 = vld [vmem:[%s17228_s29 + $0x50] sm:$0xff]  ;;  %v730_v51 = vld [vmem:[%s17228_s29 + $0xc68] sm:$0x3]  ;;  %v732_v52 = vld [vmem:[%s17228_s29 + $0xc78] sm:$0x3]  ;;  %v1255_v53 = vrot.slane %v240_v41, %v17254_v19 }
  0x51   : > { %v1212_v26 = vcombine.high %v1204_v21, %v1204_v21  ;;  %v1213_v27 = vcombine.high %v1211_v22, %v1211_v22  ;;  %v1229_v32 = vcombine.high %v1221_v23, %v1221_v23  ;;  %v1230_v33 = vcombine.high %v1228_v24, %v1228_v24  ;;  %v241_v55 = vld [vmem:[%s17222_s3 + $0x20] sm:$0xff]  ;;  %v731_v57 = vld [vmem:[%s17228_s29 + $0xc70] sm:$0x3]  ;;  %v346_v58 = vld [vmem:[%s17228_s29 + $0x68] sm:$0xff] }
  0x52   : > { %v1246_v46 = vcombine.high %v1238_v39, %v1238_v39  ;;  %v1247_v47 = vcombine.high %v1245_v40, %v1245_v40  ;;  %v1262_v54 = vrot.slane %v1248_v48, %v17254_v19  ;;  %v729_v56 = vld [vmem:[%s17228_s29 + $0xc60] sm:$0x3]  ;;  %v348_v59 = vld [vmem:[%s17228_s29 + $0x78] sm:$0xff]  ;;  %v1263_v60 = vcombine.high %v1255_v53, %v1255_v53  ;;  %v347_v0 = vld [vmem:[%s17228_s29 + $0x70] sm:$0xff] }
  0x53   : > { %3277 = vmatprep.mubr.f32.mxu0 %v1212_v26  ;;  %3347 = vmatprep.mubr.f32.mxu1 %v1213_v27  ;;  %v1265_v62 = vcombine.high %v241_v55, %v241_v55  ;;  %v345_v63 = vld [vmem:[%s17228_s29 + $0x60] sm:$0xff]  ;;  %v734_v1 = vld [vmem:[%s17228_s29 + $0xc88] sm:$0x3]  ;;  %v736_v2 = vld [vmem:[%s17228_s29 + $0xc98] sm:$0x3]  ;;  %v1272_v3 = vrot.slane %v241_v55, %v17254_v19 }
  0x54   : > { %3278 = vmatmul.mubr.f32.vlgmr.msra.gmra.mxu0 %v1204_v21  ;;  %3348 = vmatmul.mubr.f32.vlgmr.msra.gmra.mxu1 %v1211_v22  ;;  %v1264_v61 = vcombine.high %v1262_v54, %v1262_v54  ;;  %v242_v5 = vld [vmem:[%s17222_s3 + $0x28] sm:$0xff]  ;;  %v733_v6 = vld [vmem:[%s17228_s29 + $0xc80] sm:$0x3]  ;;  %v735_v7 = vld [vmem:[%s17228_s29 + $0xc90] sm:$0x3] }
  0x55   : > { %3382 = vmatpush1.xpose.msra.mxu0 %v721_v28  ;;  %3452 = vmatpush1.xpose.msra.mxu1 %v723_v29  ;;  %v1279_v4 = vrot.slane %v1265_v62, %v17254_v19  ;;  %v350_v8 = vld [vmem:[%s17228_s29 + $0x88] sm:$0xff]  ;;  %v352_v9 = vld [vmem:[%s17228_s29 + $0x98] sm:$0xff]  ;;  %v1280_v10 = vcombine.high %v1272_v3, %v1272_v3  ;;  %v1282_v12 = vcombine.high %v242_v5, %v242_v5  ;;  %v349_v13 = vld [vmem:[%s17228_s29 + $0x80] sm:$0xff] }
  0x56   : > { %3383 = vmatprep.subr.mxu0 %v338_v30  ;;  %3453 = vmatprep.subr.mxu1 %v340_v31  ;;  %v351_v14 = vld [vmem:[%s17228_s29 + $0x90] sm:$0xff]  ;;  %v738_v15 = vld [vmem:[%s17228_s29 + $0xca8] sm:$0x3]  ;;  %v740_v16 = vld [vmem:[%s17228_s29 + $0xcb8] sm:$0x3]  ;;  %v1289_v17 = vrot.slane %v242_v5, %v17254_v19 }
  0x57   : > { %3417 = vmatprep.mubr.f32.mxu0 %v1229_v32  ;;  %3487 = vmatprep.mubr.f32.mxu1 %v1230_v33  ;;  %v1281_v11 = vcombine.high %v1279_v4, %v1279_v4  ;;  %v1296_v18 = vrot.slane %v1282_v12, %v17254_v19  ;;  %v243_v20 = vld [vmem:[%s17222_s3 + $0x30] sm:$0xff]  ;;  %v737_v21 = vld [vmem:[%s17228_s29 + $0xca0] sm:$0x3]  ;;  %v742_v30 = vld [vmem:[%s17228_s29 + $0xcc8] sm:$0x3] }
  0x58   : > { %v739_v22 = vld [vmem:[%s17228_s29 + $0xcb0] sm:$0x3]  ;;  %v1297_v25 = vcombine.high %v1289_v17, %v1289_v17  ;;  %v1299_v27 = vcombine.high %v243_v20, %v243_v20  ;;  %v353_v28 = vld [vmem:[%s17228_s29 + $0xa0] sm:$0xff]  ;;  %v744_v31 = vld [vmem:[%s17228_s29 + $0xcd8] sm:$0x3]  ;;  %v1306_v32 = vrot.slane %v243_v20, %v17254_v19 }
  0x59   : > { %3384 = vmatpush1.xpose.msra.mxu0 %v337_v35  ;;  %3454 = vmatpush1.xpose.msra.mxu1 %v339_v36  ;;  %v1298_v26 = vcombine.high %v1296_v18, %v1296_v18  ;;  %v355_v29 = vld [vmem:[%s17228_s29 + $0xb0] sm:$0xff]  ;;  %v244_v34 = vld [vmem:[%s17222_s3 + $0x38] sm:$0xff]  ;;  %v741_v35 = vld [vmem:[%s17228_s29 + $0xcc0] sm:$0x3] }
  0x5a   : > { %3521 = vmatprep.subr.mxu0 %v726_v37  ;;  %3591 = vmatprep.subr.mxu1 %v728_v38  ;;  %v1313_v33 = vrot.slane %v1299_v27, %v17254_v19  ;;  %v743_v36 = vld [vmem:[%s17228_s29 + $0xcd0] sm:$0x3]  ;;  %v358_v37 = vld [vmem:[%s17228_s29 + $0xc8] sm:$0xff]  ;;  %v360_v38 = vld [vmem:[%s17228_s29 + $0xd8] sm:$0xff]  ;;  %v1316_v41 = vcombine.high %v244_v34, %v244_v34 }
  0x5b   : > { %v245_v48 = vld [vmem:[%s17222_s3 + $0x40] sm:$0xff]  ;;  %v246_v62 = vld [vmem:[%s17222_s3 + $0x48] sm:$0xff]  ;;  %v247_v12 = vld [vmem:[%s17222_s3 + $0x50] sm:$0xff] }
  0x5c   : > { %3418 = vmatmul.mubr.f32.vlgmr.msra.gmra.mxu0 %v1221_v23  ;;  %3488 = vmatmul.mubr.f32.vlgmr.msra.gmra.mxu1 %v1228_v24  ;;  %v354_v23 = vld [vmem:[%s17228_s29 + $0xa8] sm:$0xff]  ;;  %v356_v24 = vld [vmem:[%s17228_s29 + $0xb8] sm:$0xff]  ;;  %v1333_v55 = vcombine.high %v245_v48, %v245_v48  ;;  %v1350_v5 = vcombine.high %v246_v62, %v246_v62  ;;  %v1367_v20 = vcombine.high %v247_v12, %v247_v12 }
  0x5d   : > { %3522 = vmatpush1.xpose.msra.mxu0 %v725_v42  ;;  %3592 = vmatpush1.xpose.msra.mxu1 %v727_v43  ;;  %v357_v42 = vld [vmem:[%s17228_s29 + $0xc0] sm:$0xff]  ;;  %v359_v43 = vld [vmem:[%s17228_s29 + $0xd0] sm:$0xff]  ;;  %v248_v27 = vld [vmem:[%s17222_s3 + $0x58] sm:$0xff] }
  0x5e   : > { %3523 = vmatprep.subr.mxu0 %v342_v44  ;;  %3593 = vmatprep.subr.mxu1 %v344_v45  ;;  %v746_v44 = vld [vmem:[%s17228_s29 + $0xce8] sm:$0x3]  ;;  %v748_v45 = vld [vmem:[%s17228_s29 + $0xcf8] sm:$0x3] }
  0x5f   : > { %3557 = vmatprep.mubr.f32.mxu0 %v1246_v46  ;;  %3627 = vmatprep.mubr.f32.mxu1 %v1247_v47  ;;  %v1323_v46 = vrot.slane %v244_v34, %v17254_v19  ;;  %v1330_v47 = vrot.slane %v1316_v41, %v17254_v19  ;;  %v1384_v34 = vcombine.high %v248_v27, %v248_v27  ;;  %v249_v41 = vld [vmem:[%s17222_s3 + $0x60] sm:$0xff] }
  0x61   : > { %3524 = vmatpush1.xpose.msra.mxu0 %v341_v49  ;;  %3594 = vmatpush1.xpose.msra.mxu1 %v343_v50  ;;  %v745_v49 = vld [vmem:[%s17228_s29 + $0xce0] sm:$0x3]  ;;  %v747_v50 = vld [vmem:[%s17228_s29 + $0xcf0] sm:$0x3] }
  0x62   : > { %3661 = vmatprep.subr.mxu0 %v730_v51  ;;  %3731 = vmatprep.subr.mxu1 %v732_v52  ;;  %v362_v51 = vld [vmem:[%s17228_s29 + $0xe8] sm:$0xff]  ;;  %v364_v52 = vld [vmem:[%s17228_s29 + $0xf8] sm:$0xff] }
  0x64   : > { %3558 = vmatmul.mubr.f32.vlgmr.msra.gmra.mxu0 %v1238_v39  ;;  %3628 = vmatmul.mubr.f32.vlgmr.msra.gmra.mxu1 %v1245_v40  ;;  %v1314_v39 = vcombine.high %v1306_v32, %v1306_v32  ;;  %v1315_v40 = vcombine.high %v1313_v33, %v1313_v33 }
  0x65   : > { %3662 = vmatpush1.xpose.msra.mxu0 %v729_v56  ;;  %3732 = vmatpush1.xpose.msra.mxu1 %v731_v57  ;;  %v361_v56 = vld [vmem:[%s17228_s29 + $0xe0] sm:$0xff]  ;;  %v363_v57 = vld [vmem:[%s17228_s29 + $0xf0] sm:$0xff] }
  0x66   : > { %3663 = vmatprep.subr.mxu0 %v346_v58  ;;  %3733 = vmatprep.subr.mxu1 %v348_v59  ;;  %v750_v58 = vld [vmem:[%s17228_s29 + $0xd08] sm:$0x3]  ;;  %v752_v59 = vld [vmem:[%s17228_s29 + $0xd18] sm:$0x3] }
  0x67   : > { %3697 = vmatprep.mubr.f32.mxu0 %v1263_v60  ;;  %3767 = vmatprep.mubr.f32.mxu1 %v1264_v61  ;;  %v1340_v60 = vrot.slane %v245_v48, %v17254_v19  ;;  %v1347_v61 = vrot.slane %v1333_v55, %v17254_v19  ;;  %v1401_v48 = vcombine.high %v249_v41, %v249_v41  ;;  %v250_v55 = vld [vmem:[%s17222_s3 + $0x68] sm:$0xff] }
  0x69   : > { %3664 = vmatpush1.xpose.msra.mxu0 %v345_v63  ;;  %3734 = vmatpush1.xpose.msra.mxu1 %v347_v0  ;;  %v749_v63 = vld [vmem:[%s17228_s29 + $0xd00] sm:$0x3]  ;;  %v751_v0 = vld [vmem:[%s17228_s29 + $0xd10] sm:$0x3] }
  0x6a   : > { %3801 = vmatprep.subr.mxu0 %v734_v1  ;;  %3871 = vmatprep.subr.mxu1 %v736_v2  ;;  %v366_v1 = vld [vmem:[%s17228_s29 + $0x108] sm:$0xff]  ;;  %v368_v2 = vld [vmem:[%s17228_s29 + $0x118] sm:$0xff] }
  0x6c   : > { %3698 = vmatmul.mubr.f32.vlgmr.msra.gmra.mxu0 %v1255_v53  ;;  %3768 = vmatmul.mubr.f32.vlgmr.msra.gmra.mxu1 %v1262_v54  ;;  %v1331_v53 = vcombine.high %v1323_v46, %v1323_v46  ;;  %v1332_v54 = vcombine.high %v1330_v47, %v1330_v47 }
  0x6d   : > { %3802 = vmatpush1.xpose.msra.mxu0 %v733_v6  ;;  %3872 = vmatpush1.xpose.msra.mxu1 %v735_v7  ;;  %v365_v6 = vld [vmem:[%s17228_s29 + $0x100] sm:$0xff]  ;;  %v367_v7 = vld [vmem:[%s17228_s29 + $0x110] sm:$0xff] }
  0x6e   : > { %3803 = vmatprep.subr.mxu0 %v350_v8  ;;  %3873 = vmatprep.subr.mxu1 %v352_v9  ;;  %v754_v8 = vld [vmem:[%s17228_s29 + $0xd28] sm:$0x3]  ;;  %v756_v9 = vld [vmem:[%s17228_s29 + $0xd38] sm:$0x3] }
  0x6f   : > { %3837 = vmatprep.mubr.f32.mxu0 %v1280_v10  ;;  %3907 = vmatprep.mubr.f32.mxu1 %v1281_v11  ;;  %v1357_v10 = vrot.slane %v246_v62, %v17254_v19  ;;  %v1364_v11 = vrot.slane %v1350_v5, %v17254_v19  ;;  %v1418_v62 = vcombine.high %v250_v55, %v250_v55  ;;  %v251_v5 = vld [vmem:[%s17222_s3 + $0x70] sm:$0xff] }
  0x71   : > { %3804 = vmatpush1.xpose.msra.mxu0 %v349_v13  ;;  %3874 = vmatpush1.xpose.msra.mxu1 %v351_v14  ;;  %v753_v13 = vld [vmem:[%s17228_s29 + $0xd20] sm:$0x3]  ;;  %v755_v14 = vld [vmem:[%s17228_s29 + $0xd30] sm:$0x3] }
  0x72   : > { %3941 = vmatprep.subr.mxu0 %v738_v15  ;;  %4011 = vmatprep.subr.mxu1 %v740_v16  ;;  %v370_v15 = vld [vmem:[%s17228_s29 + $0x128] sm:$0xff]  ;;  %v372_v16 = vld [vmem:[%s17228_s29 + $0x138] sm:$0xff] }
  0x74   : > { %3838 = vmatmul.mubr.f32.vlgmr.msra.gmra.mxu0 %v1272_v3  ;;  %3908 = vmatmul.mubr.f32.vlgmr.msra.gmra.mxu1 %v1279_v4  ;;  %v1348_v3 = vcombine.high %v1340_v60, %v1340_v60  ;;  %v1349_v4 = vcombine.high %v1347_v61, %v1347_v61 }
  0x75   : > { %3942 = vmatpush1.xpose.msra.mxu0 %v737_v21  ;;  %4012 = vmatpush1.xpose.msra.mxu1 %v739_v22  ;;  %v369_v21 = vld [vmem:[%s17228_s29 + $0x120] sm:$0xff]  ;;  %v371_v22 = vld [vmem:[%s17228_s29 + $0x130] sm:$0xff] }
  0x76   : > { %3943 = vmatprep.subr.mxu0 %v354_v23  ;;  %4013 = vmatprep.subr.mxu1 %v356_v24  ;;  %v758_v23 = vld [vmem:[%s17228_s29 + $0xd48] sm:$0x3]  ;;  %v760_v24 = vld [vmem:[%s17228_s29 + $0xd58] sm:$0x3] }
  0x77   : > { %3977 = vmatprep.mubr.f32.mxu0 %v1297_v25  ;;  %4047 = vmatprep.mubr.f32.mxu1 %v1298_v26  ;;  %v1374_v25 = vrot.slane %v247_v12, %v17254_v19  ;;  %v1381_v26 = vrot.slane %v1367_v20, %v17254_v19  ;;  %v1435_v12 = vcombine.high %v251_v5, %v251_v5  ;;  %v252_v20 = vld [vmem:[%s17222_s3 + $0x78] sm:$0xff] }
  0x79   : > { %3944 = vmatpush1.xpose.msra.mxu0 %v353_v28  ;;  %4014 = vmatpush1.xpose.msra.mxu1 %v355_v29  ;;  %v757_v28 = vld [vmem:[%s17228_s29 + $0xd40] sm:$0x3]  ;;  %v759_v29 = vld [vmem:[%s17228_s29 + $0xd50] sm:$0x3] }
  0x7a   : > { %4081 = vmatprep.subr.mxu0 %v742_v30  ;;  %4151 = vmatprep.subr.mxu1 %v744_v31  ;;  %v374_v30 = vld [vmem:[%s17228_s29 + $0x148] sm:$0xff]  ;;  %v376_v31 = vld [vmem:[%s17228_s29 + $0x158] sm:$0xff] }
  0x7c   : > { %3978 = vmatmul.mubr.f32.vlgmr.msra.gmra.mxu0 %v1289_v17  ;;  %4048 = vmatmul.mubr.f32.vlgmr.msra.gmra.mxu1 %v1296_v18  ;;  %v1365_v17 = vcombine.high %v1357_v10, %v1357_v10  ;;  %v1366_v18 = vcombine.high %v1364_v11, %v1364_v11 }
  0x7d   : > { %4082 = vmatpush1.xpose.msra.mxu0 %v741_v35  ;;  %4152 = vmatpush1.xpose.msra.mxu1 %v743_v36  ;;  %v373_v35 = vld [vmem:[%s17228_s29 + $0x140] sm:$0xff]  ;;  %v375_v36 = vld [vmem:[%s17228_s29 + $0x150] sm:$0xff] }
  0x7e   : > { %4083 = vmatprep.subr.mxu0 %v358_v37  ;;  %4153 = vmatprep.subr.mxu1 %v360_v38  ;;  %v762_v37 = vld [vmem:[%s17228_s29 + $0xd68] sm:$0x3]  ;;  %v764_v38 = vld [vmem:[%s17228_s29 + $0xd78] sm:$0x3] }
  0x7f   : > { %4117 = vmatprep.mubr.f32.mxu0 %v1314_v39  ;;  %4187 = vmatprep.mubr.f32.mxu1 %v1315_v40  ;;  %v1391_v39 = vrot.slane %v248_v27, %v17254_v19  ;;  %v1398_v40 = vrot.slane %v1384_v34, %v17254_v19  ;;  %v1452_v27 = vcombine.high %v252_v20, %v252_v20  ;;  %v253_v34 = vld [vmem:[%s17222_s3 + $0x80] sm:$0xff] }
  0x81   : > { %4084 = vmatpush1.xpose.msra.mxu0 %v357_v42  ;;  %4154 = vmatpush1.xpose.msra.mxu1 %v359_v43  ;;  %v761_v42 = vld [vmem:[%s17228_s29 + $0xd60] sm:$0x3]  ;;  %v763_v43 = vld [vmem:[%s17228_s29 + $0xd70] sm:$0x3] }
  0x82   : > { %4221 = vmatprep.subr.mxu0 %v746_v44  ;;  %4291 = vmatprep.subr.mxu1 %v748_v45  ;;  %v378_v44 = vld [vmem:[%s17228_s29 + $0x168] sm:$0xff]  ;;  %v380_v45 = vld [vmem:[%s17228_s29 + $0x178] sm:$0xff] }
  0x84   : > { %4118 = vmatmul.mubr.f32.vlgmr.msra.gmra.mxu0 %v1306_v32  ;;  %4188 = vmatmul.mubr.f32.vlgmr.msra.gmra.mxu1 %v1313_v33  ;;  %v1382_v32 = vcombine.high %v1374_v25, %v1374_v25  ;;  %v1383_v33 = vcombine.high %v1381_v26, %v1381_v26 }
  0x85   : > { %4222 = vmatpush1.xpose.msra.mxu0 %v745_v49  ;;  %4292 = vmatpush1.xpose.msra.mxu1 %v747_v50  ;;  %v377_v49 = vld [vmem:[%s17228_s29 + $0x160] sm:$0xff]  ;;  %v379_v50 = vld [vmem:[%s17228_s29 + $0x170] sm:$0xff] }
  0x86   : > { %4223 = vmatprep.subr.mxu0 %v362_v51  ;;  %4293 = vmatprep.subr.mxu1 %v364_v52  ;;  %v766_v51 = vld [vmem:[%s17228_s29 + $0xd88] sm:$0x3]  ;;  %v768_v52 = vld [vmem:[%s17228_s29 + $0xd98] sm:$0x3] }
  0x87   : > { %4257 = vmatprep.mubr.f32.mxu0 %v1331_v53  ;;  %4327 = vmatprep.mubr.f32.mxu1 %v1332_v54  ;;  %v1408_v53 = vrot.slane %v249_v41, %v17254_v19  ;;  %v1415_v54 = vrot.slane %v1401_v48, %v17254_v19  ;;  %v1469_v41 = vcombine.high %v253_v34, %v253_v34  ;;  %v254_v48 = vld [vmem:[%s17222_s3 + $0x88] sm:$0xff] }
  0x89   : > { %4224 = vmatpush1.xpose.msra.mxu0 %v361_v56  ;;  %4294 = vmatpush1.xpose.msra.mxu1 %v363_v57  ;;  %v765_v56 = vld [vmem:[%s17228_s29 + $0xd80] sm:$0x3]  ;;  %v767_v57 = vld [vmem:[%s17228_s29 + $0xd90] sm:$0x3] }
  0x8a   : > { %4361 = vmatprep.subr.mxu0 %v750_v58  ;;  %4431 = vmatprep.subr.mxu1 %v752_v59  ;;  %v382_v58 = vld [vmem:[%s17228_s29 + $0x188] sm:$0xff]  ;;  %v384_v59 = vld [vmem:[%s17228_s29 + $0x198] sm:$0xff] }
  0x8c   : > { %4258 = vmatmul.mubr.f32.vlgmr.msra.gmra.mxu0 %v1323_v46  ;;  %4328 = vmatmul.mubr.f32.vlgmr.msra.gmra.mxu1 %v1330_v47  ;;  %v1399_v46 = vcombine.high %v1391_v39, %v1391_v39  ;;  %v1400_v47 = vcombine.high %v1398_v40, %v1398_v40 }
  0x8d   : > { %4362 = vmatpush1.xpose.msra.mxu0 %v749_v63  ;;  %4432 = vmatpush1.xpose.msra.mxu1 %v751_v0  ;;  %v381_v63 = vld [vmem:[%s17228_s29 + $0x180] sm:$0xff]  ;;  %v383_v0 = vld [vmem:[%s17228_s29 + $0x190] sm:$0xff] }
  0x8e   : > { %4363 = vmatprep.subr.mxu0 %v366_v1  ;;  %4433 = vmatprep.subr.mxu1 %v368_v2  ;;  %v770_v1 = vld [vmem:[%s17228_s29 + $0xda8] sm:$0x3]  ;;  %v772_v2 = vld [vmem:[%s17228_s29 + $0xdb8] sm:$0x3] }
  0x8f   : > { %4397 = vmatprep.mubr.f32.mxu0 %v1348_v3  ;;  %4467 = vmatprep.mubr.f32.mxu1 %v1349_v4  ;;  %v1425_v3 = vrot.slane %v250_v55, %v17254_v19  ;;  %v1432_v4 = vrot.slane %v1418_v62, %v17254_v19  ;;  %v1486_v55 = vcombine.high %v254_v48, %v254_v48  ;;  %v255_v62 = vld [vmem:[%s17222_s3 + $0x90] sm:$0xff] }
  0x91   : > { %4364 = vmatpush1.xpose.msra.mxu0 %v365_v6  ;;  %4434 = vmatpush1.xpose.msra.mxu1 %v367_v7  ;;  %v769_v6 = vld [vmem:[%s17228_s29 + $0xda0] sm:$0x3]  ;;  %v771_v7 = vld [vmem:[%s17228_s29 + $0xdb0] sm:$0x3] }
  0x92   : > { %4501 = vmatprep.subr.mxu0 %v754_v8  ;;  %4571 = vmatprep.subr.mxu1 %v756_v9  ;;  %v386_v8 = vld [vmem:[%s17228_s29 + $0x1a8] sm:$0xff]  ;;  %v388_v9 = vld [vmem:[%s17228_s29 + $0x1b8] sm:$0xff] }
  0x94   : > { %4398 = vmatmul.mubr.f32.vlgmr.msra.gmra.mxu0 %v1340_v60  ;;  %4468 = vmatmul.mubr.f32.vlgmr.msra.gmra.mxu1 %v1347_v61  ;;  %v1416_v60 = vcombine.high %v1408_v53, %v1408_v53  ;;  %v1417_v61 = vcombine.high %v1415_v54, %v1415_v54 }
  0x95   : > { %4502 = vmatpush1.xpose.msra.mxu0 %v753_v13  ;;  %4572 = vmatpush1.xpose.msra.mxu1 %v755_v14  ;;  %v385_v13 = vld [vmem:[%s17228_s29 + $0x1a0] sm:$0xff]  ;;  %v387_v14 = vld [vmem:[%s17228_s29 + $0x1b0] sm:$0xff] }
  0x96   : > { %4503 = vmatprep.subr.mxu0 %v370_v15  ;;  %4573 = vmatprep.subr.mxu1 %v372_v16  ;;  %v774_v15 = vld [vmem:[%s17228_s29 + $0xdc8] sm:$0x3]  ;;  %v776_v16 = vld [vmem:[%s17228_s29 + $0xdd8] sm:$0x3] }
  0x97   : > { %4537 = vmatprep.mubr.f32.mxu0 %v1365_v17  ;;  %4607 = vmatprep.mubr.f32.mxu1 %v1366_v18  ;;  %v1442_v17 = vrot.slane %v251_v5, %v17254_v19  ;;  %v1449_v18 = vrot.slane %v1435_v12, %v17254_v19  ;;  %v1503_v5 = vcombine.high %v255_v62, %v255_v62  ;;  %v256_v12 = vld [vmem:[%s17222_s3 + $0x98] sm:$0xff] }
  0x99   : > { %4504 = vmatpush1.xpose.msra.mxu0 %v369_v21  ;;  %4574 = vmatpush1.xpose.msra.mxu1 %v371_v22  ;;  %v773_v21 = vld [vmem:[%s17228_s29 + $0xdc0] sm:$0x3]  ;;  %v775_v22 = vld [vmem:[%s17228_s29 + $0xdd0] sm:$0x3] }
  0x9a   : > { %4641 = vmatprep.subr.mxu0 %v758_v23  ;;  %4711 = vmatprep.subr.mxu1 %v760_v24  ;;  %v390_v23 = vld [vmem:[%s17228_s29 + $0x1c8] sm:$0xff]  ;;  %v392_v24 = vld [vmem:[%s17228_s29 + $0x1d8] sm:$0xff] }
  0x9c   : > { %4538 = vmatmul.mubr.f32.vlgmr.msra.gmra.mxu0 %v1357_v10  ;;  %4608 = vmatmul.mubr.f32.vlgmr.msra.gmra.mxu1 %v1364_v11  ;;  %v1433_v10 = vcombine.high %v1425_v3, %v1425_v3  ;;  %v1434_v11 = vcombine.high %v1432_v4, %v1432_v4 }
  0x9d   : > { %4642 = vmatpush1.xpose.msra.mxu0 %v757_v28  ;;  %4712 = vmatpush1.xpose.msra.mxu1 %v759_v29  ;;  %v389_v28 = vld [vmem:[%s17228_s29 + $0x1c0] sm:$0xff]  ;;  %v391_v29 = vld [vmem:[%s17228_s29 + $0x1d0] sm:$0xff] }
  0x9e   : > { %4643 = vmatprep.subr.mxu0 %v374_v30  ;;  %4713 = vmatprep.subr.mxu1 %v376_v31  ;;  %v778_v30 = vld [vmem:[%s17228_s29 + $0xde8] sm:$0x3]  ;;  %v780_v31 = vld [vmem:[%s17228_s29 + $0xdf8] sm:$0x3] }
  0x9f   : > { %4677 = vmatprep.mubr.f32.mxu0 %v1382_v32  ;;  %4747 = vmatprep.mubr.f32.mxu1 %v1383_v33  ;;  %v1459_v32 = vrot.slane %v252_v20, %v17254_v19  ;;  %v1466_v33 = vrot.slane %v1452_v27, %v17254_v19  ;;  %v1520_v20 = vcombine.high %v256_v12, %v256_v12  ;;  %v257_v27 = vld [vmem:[%s17222_s3 + $0xa0] sm:$0xff] }
  0xa1   : > { %4644 = vmatpush1.xpose.msra.mxu0 %v373_v35  ;;  %4714 = vmatpush1.xpose.msra.mxu1 %v375_v36  ;;  %v777_v35 = vld [vmem:[%s17228_s29 + $0xde0] sm:$0x3]  ;;  %v779_v36 = vld [vmem:[%s17228_s29 + $0xdf0] sm:$0x3] }
  0xa2   : > { %4781 = vmatprep.subr.mxu0 %v762_v37  ;;  %4851 = vmatprep.subr.mxu1 %v764_v38  ;;  %v394_v37 = vld [vmem:[%s17228_s29 + $0x1e8] sm:$0xff]  ;;  %v396_v38 = vld [vmem:[%s17228_s29 + $0x1f8] sm:$0xff] }
  0xa4   : > { %4678 = vmatmul.mubr.f32.vlgmr.msra.gmra.mxu0 %v1374_v25  ;;  %4748 = vmatmul.mubr.f32.vlgmr.msra.gmra.mxu1 %v1381_v26  ;;  %v1450_v25 = vcombine.high %v1442_v17, %v1442_v17  ;;  %v1451_v26 = vcombine.high %v1449_v18, %v1449_v18 }
  0xa5   : > { %4782 = vmatpush1.xpose.msra.mxu0 %v761_v42  ;;  %4852 = vmatpush1.xpose.msra.mxu1 %v763_v43  ;;  %v393_v42 = vld [vmem:[%s17228_s29 + $0x1e0] sm:$0xff]  ;;  %v395_v43 = vld [vmem:[%s17228_s29 + $0x1f0] sm:$0xff] }
  0xa6   : > { %4783 = vmatprep.subr.mxu0 %v378_v44  ;;  %4853 = vmatprep.subr.mxu1 %v380_v45  ;;  %v782_v44 = vld [vmem:[%s17228_s29 + $0xe08] sm:$0x3]  ;;  %v784_v45 = vld [vmem:[%s17228_s29 + $0xe18] sm:$0x3] }
  0xa7   : > { %4817 = vmatprep.mubr.f32.mxu0 %v1399_v46  ;;  %4887 = vmatprep.mubr.f32.mxu1 %v1400_v47  ;;  %v1476_v46 = vrot.slane %v253_v34, %v17254_v19  ;;  %v1483_v47 = vrot.slane %v1469_v41, %v17254_v19  ;;  %v1537_v34 = vcombine.high %v257_v27, %v257_v27  ;;  %v258_v41 = vld [vmem:[%s17222_s3 + $0xa8] sm:$0xff] }
  0xa9   : > { %4784 = vmatpush1.xpose.msra.mxu0 %v377_v49  ;;  %4854 = vmatpush1.xpose.msra.mxu1 %v379_v50  ;;  %v781_v49 = vld [vmem:[%s17228_s29 + $0xe00] sm:$0x3]  ;;  %v783_v50 = vld [vmem:[%s17228_s29 + $0xe10] sm:$0x3] }
  0xaa   : > { %4921 = vmatprep.subr.mxu0 %v766_v51  ;;  %4991 = vmatprep.subr.mxu1 %v768_v52  ;;  %v398_v51 = vld [vmem:[%s17228_s29 + $0x208] sm:$0xff]  ;;  %v400_v52 = vld [vmem:[%s17228_s29 + $0x218] sm:$0xff] }
  0xac   : > { %4818 = vmatmul.mubr.f32.vlgmr.msra.gmra.mxu0 %v1391_v39  ;;  %4888 = vmatmul.mubr.f32.vlgmr.msra.gmra.mxu1 %v1398_v40  ;;  %v1467_v39 = vcombine.high %v1459_v32, %v1459_v32  ;;  %v1468_v40 = vcombine.high %v1466_v33, %v1466_v33 }
  0xad   : > { %4922 = vmatpush1.xpose.msra.mxu0 %v765_v56  ;;  %4992 = vmatpush1.xpose.msra.mxu1 %v767_v57  ;;  %v397_v56 = vld [vmem:[%s17228_s29 + $0x200] sm:$0xff]  ;;  %v399_v57 = vld [vmem:[%s17228_s29 + $0x210] sm:$0xff] }
  0xae   : > { %4923 = vmatprep.subr.mxu0 %v382_v58  ;;  %4993 = vmatprep.subr.mxu1 %v384_v59  ;;  %v786_v58 = vld [vmem:[%s17228_s29 + $0xe28] sm:$0x3]  ;;  %v788_v59 = vld [vmem:[%s17228_s29 + $0xe38] sm:$0x3] }
  0xaf   : > { %4957 = vmatprep.mubr.f32.mxu0 %v1416_v60  ;;  %5027 = vmatprep.mubr.f32.mxu1 %v1417_v61  ;;  %v1493_v60 = vrot.slane %v254_v48, %v17254_v19  ;;  %v1500_v61 = vrot.slane %v1486_v55, %v17254_v19  ;;  %v1554_v48 = vcombine.high %v258_v41, %v258_v41  ;;  %v259_v55 = vld [vmem:[%s17222_s3 + $0xb0] sm:$0xff] }
  0xb1   : > { %4924 = vmatpush1.xpose.msra.mxu0 %v381_v63  ;;  %4994 = vmatpush1.xpose.msra.mxu1 %v383_v0  ;;  %v785_v63 = vld [vmem:[%s17228_s29 + $0xe20] sm:$0x3]  ;;  %v787_v0 = vld [vmem:[%s17228_s29 + $0xe30] sm:$0x3] }
  0xb2   : > { %5061 = vmatprep.subr.mxu0 %v770_v1  ;;  %5131 = vmatprep.subr.mxu1 %v772_v2  ;;  %v402_v1 = vld [vmem:[%s17228_s29 + $0x228] sm:$0xff]  ;;  %v404_v2 = vld [vmem:[%s17228_s29 + $0x238] sm:$0xff] }
  0xb4   : > { %4958 = vmatmul.mubr.f32.vlgmr.msra.gmra.mxu0 %v1408_v53  ;;  %5028 = vmatmul.mubr.f32.vlgmr.msra.gmra.mxu1 %v1415_v54  ;;  %v1484_v53 = vcombine.high %v1476_v46, %v1476_v46  ;;  %v1485_v54 = vcombine.high %v1483_v47, %v1483_v47 }
  0xb5   : > { %5062 = vmatpush1.xpose.msra.mxu0 %v769_v6  ;;  %5132 = vmatpush1.xpose.msra.mxu1 %v771_v7  ;;  %v401_v6 = vld [vmem:[%s17228_s29 + $0x220] sm:$0xff]  ;;  %v403_v7 = vld [vmem:[%s17228_s29 + $0x230] sm:$0xff] }
  0xb6   : > { %5063 = vmatprep.subr.mxu0 %v386_v8  ;;  %5133 = vmatprep.subr.mxu1 %v388_v9  ;;  %v790_v8 = vld [vmem:[%s17228_s29 + $0xe48] sm:$0x3]  ;;  %v792_v9 = vld [vmem:[%s17228_s29 + $0xe58] sm:$0x3] }
  0xb7   : > { %5097 = vmatprep.mubr.f32.mxu0 %v1433_v10  ;;  %5167 = vmatprep.mubr.f32.mxu1 %v1434_v11  ;;  %v1510_v10 = vrot.slane %v255_v62, %v17254_v19  ;;  %v1517_v11 = vrot.slane %v1503_v5, %v17254_v19  ;;  %v1571_v62 = vcombine.high %v259_v55, %v259_v55  ;;  %v260_v5 = vld [vmem:[%s17222_s3 + $0xb8] sm:$0xff] }
  0xb9   : > { %5064 = vmatpush1.xpose.msra.mxu0 %v385_v13  ;;  %5134 = vmatpush1.xpose.msra.mxu1 %v387_v14  ;;  %v789_v13 = vld [vmem:[%s17228_s29 + $0xe40] sm:$0x3]  ;;  %v791_v14 = vld [vmem:[%s17228_s29 + $0xe50] sm:$0x3] }
  0xba   : > { %5201 = vmatprep.subr.mxu0 %v774_v15  ;;  %5271 = vmatprep.subr.mxu1 %v776_v16  ;;  %v406_v15 = vld [vmem:[%s17228_s29 + $0x248] sm:$0xff]  ;;  %v408_v16 = vld [vmem:[%s17228_s29 + $0x258] sm:$0xff] }
  0xbc   : > { %5098 = vmatmul.mubr.f32.vlgmr.msra.gmra.mxu0 %v1425_v3  ;;  %5168 = vmatmul.mubr.f32.vlgmr.msra.gmra.mxu1 %v1432_v4  ;;  %v1501_v3 = vcombine.high %v1493_v60, %v1493_v60  ;;  %v1502_v4 = vcombine.high %v1500_v61, %v1500_v61 }
  0xbd   : > { %5202 = vmatpush1.xpose.msra.mxu0 %v773_v21  ;;  %5272 = vmatpush1.xpose.msra.mxu1 %v775_v22  ;;  %v405_v21 = vld [vmem:[%s17228_s29 + $0x240] sm:$0xff]  ;;  %v407_v22 = vld [vmem:[%s17228_s29 + $0x250] sm:$0xff] }
  0xbe   : > { %5203 = vmatprep.subr.mxu0 %v390_v23  ;;  %5273 = vmatprep.subr.mxu1 %v392_v24  ;;  %v794_v23 = vld [vmem:[%s17228_s29 + $0xe68] sm:$0x3]  ;;  %v796_v24 = vld [vmem:[%s17228_s29 + $0xe78] sm:$0x3] }
  0xbf   : > { %5237 = vmatprep.mubr.f32.mxu0 %v1450_v25  ;;  %5307 = vmatprep.mubr.f32.mxu1 %v1451_v26  ;;  %v1527_v25 = vrot.slane %v256_v12, %v17254_v19  ;;  %v1534_v26 = vrot.slane %v1520_v20, %v17254_v19  ;;  %v1588_v12 = vcombine.high %v260_v5, %v260_v5  ;;  %v261_v20 = vld [vmem:[%s17222_s3 + $0xc0] sm:$0xff] }
  0xc1   : > { %5204 = vmatpush1.xpose.msra.mxu0 %v389_v28  ;;  %5274 = vmatpush1.xpose.msra.mxu1 %v391_v29  ;;  %v793_v28 = vld [vmem:[%s17228_s29 + $0xe60] sm:$0x3]  ;;  %v795_v29 = vld [vmem:[%s17228_s29 + $0xe70] sm:$0x3] }
  0xc2   : > { %5341 = vmatprep.subr.mxu0 %v778_v30  ;;  %5411 = vmatprep.subr.mxu1 %v780_v31  ;;  %v410_v30 = vld [vmem:[%s17228_s29 + $0x268] sm:$0xff]  ;;  %v412_v31 = vld [vmem:[%s17228_s29 + $0x278] sm:$0xff] }
  0xc4   : > { %5238 = vmatmul.mubr.f32.vlgmr.msra.gmra.mxu0 %v1442_v17  ;;  %5308 = vmatmul.mubr.f32.vlgmr.msra.gmra.mxu1 %v1449_v18  ;;  %v1518_v17 = vcombine.high %v1510_v10, %v1510_v10  ;;  %v1519_v18 = vcombine.high %v1517_v11, %v1517_v11 }
  0xc5   : > { %5342 = vmatpush1.xpose.msra.mxu0 %v777_v35  ;;  %5412 = vmatpush1.xpose.msra.mxu1 %v779_v36  ;;  %v409_v35 = vld [vmem:[%s17228_s29 + $0x260] sm:$0xff]  ;;  %v411_v36 = vld [vmem:[%s17228_s29 + $0x270] sm:$0xff] }
  0xc6   : > { %5343 = vmatprep.subr.mxu0 %v394_v37  ;;  %5413 = vmatprep.subr.mxu1 %v396_v38  ;;  %v798_v37 = vld [vmem:[%s17228_s29 + $0xe88] sm:$0x3]  ;;  %v800_v38 = vld [vmem:[%s17228_s29 + $0xe98] sm:$0x3] }
  0xc7   : > { %5377 = vmatprep.mubr.f32.mxu0 %v1467_v39  ;;  %5447 = vmatprep.mubr.f32.mxu1 %v1468_v40  ;;  %v1544_v39 = vrot.slane %v257_v27, %v17254_v19  ;;  %v1551_v40 = vrot.slane %v1537_v34, %v17254_v19  ;;  %v1605_v27 = vcombine.high %v261_v20, %v261_v20  ;;  %v262_v34 = vld [vmem:[%s17222_s3 + $0xc8] sm:$0xff] }
  0xc9   : > { %5344 = vmatpush1.xpose.msra.mxu0 %v393_v42  ;;  %5414 = vmatpush1.xpose.msra.mxu1 %v395_v43  ;;  %v797_v42 = vld [vmem:[%s17228_s29 + $0xe80] sm:$0x3]  ;;  %v799_v43 = vld [vmem:[%s17228_s29 + $0xe90] sm:$0x3] }
  0xca   : > { %5481 = vmatprep.subr.mxu0 %v782_v44  ;;  %5551 = vmatprep.subr.mxu1 %v784_v45  ;;  %v414_v44 = vld [vmem:[%s17228_s29 + $0x288] sm:$0xff]  ;;  %v416_v45 = vld [vmem:[%s17228_s29 + $0x298] sm:$0xff] }
  0xcc   : > { %5378 = vmatmul.mubr.f32.vlgmr.msra.gmra.mxu0 %v1459_v32  ;;  %5448 = vmatmul.mubr.f32.vlgmr.msra.gmra.mxu1 %v1466_v33  ;;  %v1535_v32 = vcombine.high %v1527_v25, %v1527_v25  ;;  %v1536_v33 = vcombine.high %v1534_v26, %v1534_v26 }
  0xcd   : > { %5482 = vmatpush1.xpose.msra.mxu0 %v781_v49  ;;  %5552 = vmatpush1.xpose.msra.mxu1 %v783_v50  ;;  %v413_v49 = vld [vmem:[%s17228_s29 + $0x280] sm:$0xff]  ;;  %v415_v50 = vld [vmem:[%s17228_s29 + $0x290] sm:$0xff] }
  0xce   : > { %5483 = vmatprep.subr.mxu0 %v398_v51  ;;  %5553 = vmatprep.subr.mxu1 %v400_v52  ;;  %v802_v51 = vld [vmem:[%s17228_s29 + $0xea8] sm:$0x3]  ;;  %v804_v52 = vld [vmem:[%s17228_s29 + $0xeb8] sm:$0x3] }
  0xcf   : > { %5517 = vmatprep.mubr.f32.mxu0 %v1484_v53  ;;  %5587 = vmatprep.mubr.f32.mxu1 %v1485_v54  ;;  %v1561_v53 = vrot.slane %v258_v41, %v17254_v19  ;;  %v1568_v54 = vrot.slane %v1554_v48, %v17254_v19  ;;  %v1622_v41 = vcombine.high %v262_v34, %v262_v34  ;;  %v263_v48 = vld [vmem:[%s17222_s3 + $0xd0] sm:$0xff] }
  0xd1   : > { %5484 = vmatpush1.xpose.msra.mxu0 %v397_v56  ;;  %5554 = vmatpush1.xpose.msra.mxu1 %v399_v57  ;;  %v801_v56 = vld [vmem:[%s17228_s29 + $0xea0] sm:$0x3]  ;;  %v803_v57 = vld [vmem:[%s17228_s29 + $0xeb0] sm:$0x3] }
  0xd2   : > { %5621 = vmatprep.subr.mxu0 %v786_v58  ;;  %5691 = vmatprep.subr.mxu1 %v788_v59  ;;  %v418_v58 = vld [vmem:[%s17228_s29 + $0x2a8] sm:$0xff]  ;;  %v420_v59 = vld [vmem:[%s17228_s29 + $0x2b8] sm:$0xff] }
  0xd4   : > { %5518 = vmatmul.mubr.f32.vlgmr.msra.gmra.mxu0 %v1476_v46  ;;  %5588 = vmatmul.mubr.f32.vlgmr.msra.gmra.mxu1 %v1483_v47  ;;  %v1552_v46 = vcombine.high %v1544_v39, %v1544_v39  ;;  %v1553_v47 = vcombine.high %v1551_v40, %v1551_v40 }
  0xd5   : > { %5622 = vmatpush1.xpose.msra.mxu0 %v785_v63  ;;  %5692 = vmatpush1.xpose.msra.mxu1 %v787_v0  ;;  %v417_v63 = vld [vmem:[%s17228_s29 + $0x2a0] sm:$0xff]  ;;  %v419_v0 = vld [vmem:[%s17228_s29 + $0x2b0] sm:$0xff] }
  0xd6   : > { %5623 = vmatprep.subr.mxu0 %v402_v1  ;;  %5693 = vmatprep.subr.mxu1 %v404_v2  ;;  %v806_v1 = vld [vmem:[%s17228_s29 + $0xec8] sm:$0x3]  ;;  %v808_v2 = vld [vmem:[%s17228_s29 + $0xed8] sm:$0x3] }
  0xd7   : > { %5657 = vmatprep.mubr.f32.mxu0 %v1501_v3  ;;  %5727 = vmatprep.mubr.f32.mxu1 %v1502_v4  ;;  %v1578_v3 = vrot.slane %v259_v55, %v17254_v19  ;;  %v1585_v4 = vrot.slane %v1571_v62, %v17254_v19  ;;  %v1639_v55 = vcombine.high %v263_v48, %v263_v48  ;;  %v435_v62 = vld [vmem:[%s17228_s29 + $0x330] sm:$0xff] }
  0xd9   : > { %5624 = vmatpush1.xpose.msra.mxu0 %v401_v6  ;;  %5694 = vmatpush1.xpose.msra.mxu1 %v403_v7  ;;  %v805_v6 = vld [vmem:[%s17228_s29 + $0xec0] sm:$0x3]  ;;  %v807_v7 = vld [vmem:[%s17228_s29 + $0xed0] sm:$0x3] }
  0xda   : > { %5761 = vmatprep.subr.mxu0 %v790_v8  ;;  %5831 = vmatprep.subr.mxu1 %v792_v9  ;;  %v422_v8 = vld [vmem:[%s17228_s29 + $0x2c8] sm:$0xff]  ;;  %v424_v9 = vld [vmem:[%s17228_s29 + $0x2d8] sm:$0xff] }
  0xdc   : > { %5658 = vmatmul.mubr.f32.vlgmr.msra.gmra.mxu0 %v1493_v60  ;;  %5728 = vmatmul.mubr.f32.vlgmr.msra.gmra.mxu1 %v1500_v61  ;;  %v1569_v60 = vcombine.high %v1561_v53, %v1561_v53  ;;  %v1570_v61 = vcombine.high %v1568_v54, %v1568_v54 }
  0xdd   : > { %5762 = vmatpush1.xpose.msra.mxu0 %v789_v13  ;;  %5832 = vmatpush1.xpose.msra.mxu1 %v791_v14  ;;  %v421_v13 = vld [vmem:[%s17228_s29 + $0x2c0] sm:$0xff]  ;;  %v423_v14 = vld [vmem:[%s17228_s29 + $0x2d0] sm:$0xff] }
  0xde   : > { %5763 = vmatprep.subr.mxu0 %v406_v15  ;;  %5833 = vmatprep.subr.mxu1 %v408_v16  ;;  %v810_v15 = vld [vmem:[%s17228_s29 + $0xee8] sm:$0x3]  ;;  %v812_v16 = vld [vmem:[%s17228_s29 + $0xef8] sm:$0x3] }
  0xdf   : > { %5797 = vmatprep.mubr.f32.mxu0 %v1518_v17  ;;  %5867 = vmatprep.mubr.f32.mxu1 %v1519_v18  ;;  %v1595_v17 = vrot.slane %v260_v5, %v17254_v19  ;;  %v1602_v18 = vrot.slane %v1588_v12, %v17254_v19  ;;  %v823_v5 = vld [vmem:[%s17228_s29 + $0xf50] sm:$0x3] }
  0xe1   : > { %5764 = vmatpush1.xpose.msra.mxu0 %v405_v21  ;;  %5834 = vmatpush1.xpose.msra.mxu1 %v407_v22  ;;  %v809_v21 = vld [vmem:[%s17228_s29 + $0xee0] sm:$0x3]  ;;  %v811_v22 = vld [vmem:[%s17228_s29 + $0xef0] sm:$0x3] }
  0xe2   : > { %5901 = vmatprep.subr.mxu0 %v794_v23  ;;  %5971 = vmatprep.subr.mxu1 %v796_v24  ;;  %v426_v23 = vld [vmem:[%s17228_s29 + $0x2e8] sm:$0xff]  ;;  %v428_v24 = vld [vmem:[%s17228_s29 + $0x2f8] sm:$0xff] }
  0xe4   : > { %5798 = vmatmul.mubr.f32.vlgmr.msra.gmra.mxu0 %v1510_v10  ;;  %5868 = vmatmul.mubr.f32.vlgmr.msra.gmra.mxu1 %v1517_v11  ;;  %v1586_v10 = vcombine.high %v1578_v3, %v1578_v3  ;;  %v1587_v11 = vcombine.high %v1585_v4, %v1585_v4 }
  0xe5   : > { %5902 = vmatpush1.xpose.msra.mxu0 %v793_v28  ;;  %5972 = vmatpush1.xpose.msra.mxu1 %v795_v29  ;;  %v425_v28 = vld [vmem:[%s17228_s29 + $0x2e0] sm:$0xff]  ;;  %v427_v29 = vld [vmem:[%s17228_s29 + $0x2f0] sm:$0xff] }
  0xe6   : > { %5903 = vmatprep.subr.mxu0 %v410_v30  ;;  %5973 = vmatprep.subr.mxu1 %v412_v31  ;;  %v814_v30 = vld [vmem:[%s17228_s29 + $0xf08] sm:$0x3]  ;;  %v816_v31 = vld [vmem:[%s17228_s29 + $0xf18] sm:$0x3] }
  0xe7   : > { %5937 = vmatprep.mubr.f32.mxu0 %v1535_v32  ;;  %6007 = vmatprep.mubr.f32.mxu1 %v1536_v33  ;;  %v1612_v32 = vrot.slane %v261_v20, %v17254_v19  ;;  %v1619_v33 = vrot.slane %v1605_v27, %v17254_v19  ;;  %v826_v20 = vld [vmem:[%s17228_s29 + $0xf68] sm:$0x3] }
  0xe8   : > { %v442_v27 = vld [vmem:[%s17228_s29 + $0x368] sm:$0xff] }
  0xe9   : > { %5904 = vmatpush1.xpose.msra.mxu0 %v409_v35  ;;  %5974 = vmatpush1.xpose.msra.mxu1 %v411_v36  ;;  %v813_v35 = vld [vmem:[%s17228_s29 + $0xf00] sm:$0x3]  ;;  %v815_v36 = vld [vmem:[%s17228_s29 + $0xf10] sm:$0x3] }
  0xea   : > { %6041 = vmatprep.subr.mxu0 %v798_v37  ;;  %6111 = vmatprep.subr.mxu1 %v800_v38  ;;  %v430_v37 = vld [vmem:[%s17228_s29 + $0x308] sm:$0xff]  ;;  %v432_v38 = vld [vmem:[%s17228_s29 + $0x318] sm:$0xff] }
  0xec   : > { %5938 = vmatmul.mubr.f32.vlgmr.msra.gmra.mxu0 %v1527_v25  ;;  %6008 = vmatmul.mubr.f32.vlgmr.msra.gmra.mxu1 %v1534_v26  ;;  %v1603_v25 = vcombine.high %v1595_v17, %v1595_v17  ;;  %v1604_v26 = vcombine.high %v1602_v18, %v1602_v18 }
  0xed   : > { %6042 = vmatpush1.xpose.msra.mxu0 %v797_v42  ;;  %6112 = vmatpush1.xpose.msra.mxu1 %v799_v43  ;;  %v429_v42 = vld [vmem:[%s17228_s29 + $0x300] sm:$0xff]  ;;  %v431_v43 = vld [vmem:[%s17228_s29 + $0x310] sm:$0xff] }
  0xee   : > { %6043 = vmatprep.subr.mxu0 %v414_v44  ;;  %6113 = vmatprep.subr.mxu1 %v416_v45  ;;  %v818_v44 = vld [vmem:[%s17228_s29 + $0xf28] sm:$0x3]  ;;  %v820_v45 = vld [vmem:[%s17228_s29 + $0xf38] sm:$0x3] }
  0xef   : > { %6077 = vmatprep.mubr.f32.mxu0 %v1552_v46  ;;  %6147 = vmatprep.mubr.f32.mxu1 %v1553_v47  ;;  %v1629_v46 = vrot.slane %v262_v34, %v17254_v19  ;;  %v1636_v47 = vrot.slane %v1622_v41, %v17254_v19  ;;  %v832_v41 = vld [vmem:[%s17228_s29 + $0xf98] sm:$0x3] }
  0xf1   : > { %6044 = vmatpush1.xpose.msra.mxu0 %v413_v49  ;;  %6114 = vmatpush1.xpose.msra.mxu1 %v415_v50  ;;  %v817_v49 = vld [vmem:[%s17228_s29 + $0xf20] sm:$0x3]  ;;  %v819_v50 = vld [vmem:[%s17228_s29 + $0xf30] sm:$0x3] }
  0xf2   : > { %6181 = vmatprep.subr.mxu0 %v802_v51  ;;  %6251 = vmatprep.subr.mxu1 %v804_v52  ;;  %v434_v51 = vld [vmem:[%s17228_s29 + $0x328] sm:$0xff]  ;;  %v436_v52 = vld [vmem:[%s17228_s29 + $0x338] sm:$0xff] }
  0xf4   : > { %6078 = vmatmul.mubr.f32.vlgmr.msra.gmra.mxu0 %v1544_v39  ;;  %6148 = vmatmul.mubr.f32.vlgmr.msra.gmra.mxu1 %v1551_v40  ;;  %v1620_v39 = vcombine.high %v1612_v32, %v1612_v32  ;;  %v1621_v40 = vcombine.high %v1619_v33, %v1619_v33 }
  0xf5   : > { %6182 = vmatpush1.xpose.msra.mxu0 %v801_v56  ;;  %6252 = vmatpush1.xpose.msra.mxu1 %v803_v57 }
  0xf6   : > { %6183 = vmatprep.subr.mxu0 %v418_v58  ;;  %6253 = vmatprep.subr.mxu1 %v420_v59 }
  0xf7   : > { %6217 = vmatprep.mubr.f32.mxu0 %v1569_v60  ;;  %6287 = vmatprep.mubr.f32.mxu1 %v1570_v61  ;;  %v433_v61 = vld [vmem:[%s17228_s29 + $0x320] sm:$0xff] }
  0xf9   : > { %6184 = vmatpush1.xpose.msra.mxu0 %v417_v63  ;;  %6254 = vmatpush1.xpose.msra.mxu1 %v419_v0  ;;  %v822_v63 = vld [vmem:[%s17228_s29 + $0xf48] sm:$0x3]  ;;  %v824_v0 = vld [vmem:[%s17228_s29 + $0xf58] sm:$0x3] }
  0xfa   : > { %6321 = vmatprep.subr.mxu0 %v806_v1  ;;  %6391 = vmatprep.subr.mxu1 %v808_v2  ;;  %v1646_v1 = vrot.slane %v263_v48, %v17254_v19  ;;  %v1653_v2 = vrot.slane %v1639_v55, %v17254_v19  ;;  %v448_v48 = vld [vmem:[%s17228_s29 + $0x398] sm:$0xff] }
  0xfc   : > { %6218 = vmatmul.mubr.f32.vlgmr.msra.gmra.mxu0 %v1561_v53  ;;  %6288 = vmatmul.mubr.f32.vlgmr.msra.gmra.mxu1 %v1568_v54  ;;  %v1637_v53 = vcombine.high %v1629_v46, %v1629_v46  ;;  %v1638_v54 = vcombine.high %v1636_v47, %v1636_v47 }
  0xfd   : > { %6322 = vmatpush1.xpose.msra.mxu0 %v805_v6  ;;  %6392 = vmatpush1.xpose.msra.mxu1 %v807_v7  ;;  %v438_v6 = vld [vmem:[%s17228_s29 + $0x348] sm:$0xff]  ;;  %v440_v7 = vld [vmem:[%s17228_s29 + $0x358] sm:$0xff] }
  0xfe   : > { %6323 = vmatprep.subr.mxu0 %v422_v8  ;;  %6393 = vmatprep.subr.mxu1 %v424_v9  ;;  %v1654_v8 = vcombine.high %v1646_v1, %v1646_v1  ;;  %v1655_v9 = vcombine.high %v1653_v2, %v1653_v2 }
  0xff   : > { %6357 = vmatprep.mubr.f32.mxu0 %v1586_v10  ;;  %6427 = vmatprep.mubr.f32.mxu1 %v1587_v11 }
 0x101   : > { %6324 = vmatpush1.xpose.msra.mxu0 %v421_v13  ;;  %6394 = vmatpush1.xpose.msra.mxu1 %v423_v14 }
 0x102   : > { %6461 = vmatprep.subr.mxu0 %v810_v15  ;;  %6531 = vmatprep.subr.mxu1 %v812_v16  ;;  %v437_v16 = vld [vmem:[%s17228_s29 + $0x340] sm:$0xff] }
 0x104   : > { %6358 = vmatmul.mubr.f32.vlgmr.msra.gmra.mxu0 %v1578_v3  ;;  %6428 = vmatmul.mubr.f32.vlgmr.msra.gmra.mxu1 %v1585_v4  ;;  %v264_v3 = vld [vmem:[%s17222_s3 + $0xd8] sm:$0xff]  ;;  %v821_v4 = vld [vmem:[%s17228_s29 + $0xf40] sm:$0x3] }
 0x105   : > { %6462 = vmatpush1.xpose.msra.mxu0 %v809_v21  ;;  %6532 = vmatpush1.xpose.msra.mxu1 %v811_v22  ;;  %v1656_v10 = vcombine.high %v264_v3, %v264_v3  ;;  %v828_v21 = vld [vmem:[%s17228_s29 + $0xf78] sm:$0x3]  ;;  %v1663_v22 = vrot.slane %v264_v3, %v17254_v19  ;;  %v450_v3 = vld [vmem:[%s17228_s29 + $0x3a8] sm:$0xff] }
 0x106   : > { %6463 = vmatprep.subr.mxu0 %v426_v23  ;;  %6533 = vmatprep.subr.mxu1 %v428_v24  ;;  %v265_v24 = vld [vmem:[%s17222_s3 + $0xe0] sm:$0xff] }
 0x107   : > { %6497 = vmatprep.mubr.f32.mxu0 %v1603_v25  ;;  %6567 = vmatprep.mubr.f32.mxu1 %v1604_v26  ;;  %v1670_v23 = vrot.slane %v1656_v10, %v17254_v19  ;;  %v825_v25 = vld [vmem:[%s17228_s29 + $0xf60] sm:$0x3]  ;;  %v827_v26 = vld [vmem:[%s17228_s29 + $0xf70] sm:$0x3] }
 0x109   : > { %6464 = vmatpush1.xpose.msra.mxu0 %v425_v28  ;;  %6534 = vmatpush1.xpose.msra.mxu1 %v427_v29  ;;  %v444_v28 = vld [vmem:[%s17228_s29 + $0x378] sm:$0xff]  ;;  %v1671_v29 = vcombine.high %v1663_v22, %v1663_v22 }
 0x10a   : > { %6601 = vmatprep.subr.mxu0 %v814_v30  ;;  %6671 = vmatprep.subr.mxu1 %v816_v31  ;;  %v1672_v30 = vcombine.high %v1670_v23, %v1670_v23  ;;  %v1673_v31 = vcombine.high %v265_v24, %v265_v24 }
 0x10c   : > { %6498 = vmatmul.mubr.f32.vlgmr.msra.gmra.mxu0 %v1595_v17  ;;  %6568 = vmatmul.mubr.f32.vlgmr.msra.gmra.mxu1 %v1602_v18  ;;  %v439_v17 = vld [vmem:[%s17228_s29 + $0x350] sm:$0xff] }
 0x10d   : > { %6602 = vmatpush1.xpose.msra.mxu0 %v813_v35  ;;  %6672 = vmatpush1.xpose.msra.mxu1 %v815_v36 }
 0x10e   : > { %6603 = vmatprep.subr.mxu0 %v430_v37  ;;  %6673 = vmatprep.subr.mxu1 %v432_v38  ;;  %v441_v37 = vld [vmem:[%s17228_s29 + $0x360] sm:$0xff]  ;;  %v443_v38 = vld [vmem:[%s17228_s29 + $0x370] sm:$0xff] }
 0x10f   : > { %6637 = vmatprep.mubr.f32.mxu0 %v1620_v39  ;;  %6707 = vmatprep.mubr.f32.mxu1 %v1621_v40  ;;  %v830_v40 = vld [vmem:[%s17228_s29 + $0xf88] sm:$0x3] }
 0x111   : > { %6604 = vmatpush1.xpose.msra.mxu0 %v429_v42  ;;  %6674 = vmatpush1.xpose.msra.mxu1 %v431_v43  ;;  %v1680_v42 = vrot.slane %v265_v24, %v17254_v19  ;;  %v1687_v43 = vrot.slane %v1673_v31, %v17254_v19  ;;  %v454_v24 = vld [vmem:[%s17228_s29 + $0x3c8] sm:$0xff] }
 0x112   : > { %6741 = vmatprep.subr.mxu0 %v818_v44  ;;  %6811 = vmatprep.subr.mxu1 %v820_v45  ;;  %v266_v44 = vld [vmem:[%s17222_s3 + $0xe8] sm:$0xff]  ;;  %v829_v45 = vld [vmem:[%s17228_s29 + $0xf80] sm:$0x3] }
 0x114   : > { %6638 = vmatmul.mubr.f32.vlgmr.msra.gmra.mxu0 %v1612_v32  ;;  %v3279_v56 = vpop.f32.mrf.mxu0  ;;  %v3349_v57 = vpop.f32.mrf.mxu1  ;;  %6708 = vmatmul.mubr.f32.vlgmr.msra.gmra.mxu1 %v1619_v33 }
 0x115   : > { %v3350_v58 = vadd.f32 %v3349_v57, %v3279_v56  ;;  %6742 = vmatpush1.xpose.msra.mxu0 %v817_v49  ;;  %6812 = vmatpush1.xpose.msra.mxu1 %v819_v50  ;;  %v1688_v49 = vcombine.high %v1680_v42, %v1680_v42  ;;  %v1689_v50 = vcombine.high %v1687_v43, %v1687_v43  ;;  %v445_v57 = vld [vmem:[%s17228_s29 + $0x380] sm:$0xff] }
 0x116   : > { %v3281_v59 = vpop.f32.mrf.mxu0  ;;  %v3351_v60 = vpop.f32.mrf.mxu1  ;;  %6743 = vmatprep.subr.mxu0 %v434_v51  ;;  %6813 = vmatprep.subr.mxu1 %v436_v52  ;;  %v1690_v51 = vcombine.high %v266_v44, %v266_v44 }
 0x117   : > { %6777 = vmatprep.mubr.f32.mxu0 %v1637_v53  ;;  %6847 = vmatprep.mubr.f32.mxu1 %v1638_v54  ;;  %v834_v60 = vld [vmem:[%s17228_s29 + $0xfa8] sm:$0x3] }
 0x119   : > { %6744 = vmatpush1.xpose.msra.mxu0 %v433_v61  ;;  %6814 = vmatpush1.xpose.msra.mxu1 %v435_v62  ;;  %v836_v61 = vld [vmem:[%s17228_s29 + $0xfb8] sm:$0x3]  ;;  %v1697_v62 = vrot.slane %v266_v44, %v17254_v19  ;;  %v458_v44 = vld [vmem:[%s17228_s29 + $0x3e8] sm:$0xff] }
 0x11a   : > { %6881 = vmatprep.subr.mxu0 %v822_v63  ;;  %6951 = vmatprep.subr.mxu1 %v824_v0  ;;  %v1704_v63 = vrot.slane %v1690_v51, %v17254_v19  ;;  %v267_v0 = vld [vmem:[%s17222_s3 + $0xf0] sm:$0xff] }
 0x11c   : > { %v3419_v11 = vpop.f32.mrf.mxu0  ;;  %6778 = vmatmul.mubr.f32.vlgmr.msra.gmra.mxu0 %v1629_v46  ;;  %v3489_v12 = vpop.f32.mrf.mxu1  ;;  %6848 = vmatmul.mubr.f32.vlgmr.msra.gmra.mxu1 %v1636_v47  ;;  %v831_v46 = vld [vmem:[%s17228_s29 + $0xf90] sm:$0x3]  ;;  %v446_v47 = vld [vmem:[%s17228_s29 + $0x388] sm:$0xff] }
 0x11d   : > { %v3420_v13 = vadd.f32 %v3419_v11, %v3350_v58  ;;  %6882 = vmatpush1.xpose.msra.mxu0 %v821_v4  ;;  %6952 = vmatpush1.xpose.msra.mxu1 %v823_v5  ;;  %v447_v58 = vld [vmem:[%s17228_s29 + $0x390] sm:$0xff]  ;;  %v452_v4 = vld [vmem:[%s17228_s29 + $0x3b8] sm:$0xff]  ;;  %v1705_v5 = vcombine.high %v1697_v62, %v1697_v62 }
 0x11e   : > { %v3421_v14 = vpop.f32.mrf.mxu0  ;;  %v3491_v15 = vpop.f32.mrf.mxu1  ;;  %6883 = vmatprep.subr.mxu0 %v438_v6  ;;  %6953 = vmatprep.subr.mxu1 %v440_v7  ;;  %v1706_v6 = vcombine.high %v1704_v63, %v1704_v63  ;;  %v1707_v7 = vcombine.high %v267_v0, %v267_v0 }
 0x11f   : > { %v3490_v18 = vadd.f32 %v3489_v12, %v3420_v13  ;;  %6917 = vmatprep.mubr.f32.mxu0 %v1654_v8  ;;  %6987 = vmatprep.mubr.f32.mxu1 %v1655_v9  ;;  %v449_v13 = vld [vmem:[%s17228_s29 + $0x3a0] sm:$0xff]  ;;  %v451_v14 = vld [vmem:[%s17228_s29 + $0x3b0] sm:$0xff] }
 0x121   : > { %6884 = vmatpush1.xpose.msra.mxu0 %v437_v16  ;;  %6954 = vmatpush1.xpose.msra.mxu1 %v439_v17  ;;  %v838_v16 = vld [vmem:[%s17228_s29 + $0xfc8] sm:$0x3]  ;;  %v840_v17 = vld [vmem:[%s17228_s29 + $0xfd8] sm:$0x3] }
 0x122   : > { %7021 = vmatprep.subr.mxu0 %v826_v20  ;;  %7091 = vmatprep.subr.mxu1 %v828_v21  ;;  %v1721_v20 = vrot.slane %v1707_v7, %v17254_v19  ;;  %v268_v21 = vld [vmem:[%s17222_s3 + $0xf8] sm:$0xff] }
 0x124   : > { %v3559_v32 = vpop.f32.mrf.mxu0  ;;  %6918 = vmatmul.mubr.f32.vlgmr.msra.gmra.mxu0 %v1646_v1  ;;  %v3629_v33 = vpop.f32.mrf.mxu1  ;;  %6988 = vmatmul.mubr.f32.vlgmr.msra.gmra.mxu1 %v1653_v2  ;;  %v833_v1 = vld [vmem:[%s17228_s29 + $0xfa0] sm:$0x3]  ;;  %v835_v2 = vld [vmem:[%s17228_s29 + $0xfb0] sm:$0x3] }
 0x125   : > { %v3560_v34 = vadd.f32 %v3559_v32, %v3490_v18  ;;  %7022 = vmatpush1.xpose.msra.mxu0 %v825_v25  ;;  %7092 = vmatpush1.xpose.msra.mxu1 %v827_v26  ;;  %v1714_v18 = vrot.slane %v267_v0, %v17254_v19  ;;  %v456_v25 = vld [vmem:[%s17228_s29 + $0x3d8] sm:$0xff]  ;;  %v462_v0 = vld [vmem:[%s17228_s29 + $0x408] sm:$0xff] }
 0x126   : > { %v3561_v35 = vpop.f32.mrf.mxu0  ;;  %v3631_v36 = vpop.f32.mrf.mxu1  ;;  %7023 = vmatprep.subr.mxu0 %v442_v27  ;;  %7093 = vmatprep.subr.mxu1 %v444_v28  ;;  %v1723_v27 = vcombine.high %v1721_v20, %v1721_v20  ;;  %v1724_v28 = vcombine.high %v268_v21, %v268_v21 }
 0x127   : > { %v3630_v39 = vadd.f32 %v3629_v33, %v3560_v34  ;;  %7057 = vmatprep.mubr.f32.mxu0 %v1671_v29  ;;  %7127 = vmatprep.mubr.f32.mxu1 %v1672_v30  ;;  %v1722_v26 = vcombine.high %v1714_v18, %v1714_v18  ;;  %v453_v34 = vld [vmem:[%s17228_s29 + $0x3c0] sm:$0xff]  ;;  %v455_v35 = vld [vmem:[%s17228_s29 + $0x3d0] sm:$0xff] }
 0x129   : > { %7024 = vmatpush1.xpose.msra.mxu0 %v441_v37  ;;  %7094 = vmatpush1.xpose.msra.mxu1 %v443_v38  ;;  %v842_v37 = vld [vmem:[%s17228_s29 + $0xfe8] sm:$0x3]  ;;  %v844_v38 = vld [vmem:[%s17228_s29 + $0xff8] sm:$0x3] }
 0x12a   : > { %7161 = vmatprep.subr.mxu0 %v830_v40  ;;  %7231 = vmatprep.subr.mxu1 %v832_v41  ;;  %v1738_v40 = vrot.slane %v1724_v28, %v17254_v19  ;;  %v269_v41 = vld [vmem:[%s17222_s3 + $0x100] sm:$0xff] }
 0x12c   : > { %v3699_v52 = vpop.f32.mrf.mxu0  ;;  %7058 = vmatmul.mubr.f32.vlgmr.msra.gmra.mxu0 %v1663_v22  ;;  %v3769_v53 = vpop.f32.mrf.mxu1  ;;  %7128 = vmatmul.mubr.f32.vlgmr.msra.gmra.mxu1 %v1670_v23  ;;  %v837_v22 = vld [vmem:[%s17228_s29 + $0xfc0] sm:$0x3]  ;;  %v839_v23 = vld [vmem:[%s17228_s29 + $0xfd0] sm:$0x3] }
 0x12d   : > { %v3700_v54 = vadd.f32 %v3699_v52, %v3630_v39  ;;  %7162 = vmatpush1.xpose.msra.mxu0 %v829_v45  ;;  %7232 = vmatpush1.xpose.msra.mxu1 %v831_v46  ;;  %v1731_v39 = vrot.slane %v268_v21, %v17254_v19  ;;  %v460_v45 = vld [vmem:[%s17228_s29 + $0x3f8] sm:$0xff]  ;;  %v466_v21 = vld [vmem:[%s17228_s29 + $0x428] sm:$0xff] }
 0x12e   : > { %v3701_v55 = vpop.f32.mrf.mxu0  ;;  %v3771_v56 = vpop.f32.mrf.mxu1  ;;  %7163 = vmatprep.subr.mxu0 %v446_v47  ;;  %7233 = vmatprep.subr.mxu1 %v448_v48  ;;  %v1740_v47 = vcombine.high %v1738_v40, %v1738_v40  ;;  %v1741_v48 = vcombine.high %v269_v41, %v269_v41 }
 0x12f   : > { %v3770_v59 = vadd.f32 %v3769_v53, %v3700_v54  ;;  %7197 = vmatprep.mubr.f32.mxu0 %v1688_v49  ;;  %7267 = vmatprep.mubr.f32.mxu1 %v1689_v50  ;;  %v1739_v46 = vcombine.high %v1731_v39, %v1731_v39  ;;  %v457_v54 = vld [vmem:[%s17228_s29 + $0x3e0] sm:$0xff]  ;;  %v459_v55 = vld [vmem:[%s17228_s29 + $0x3f0] sm:$0xff] }
 0x131   : > { %7164 = vmatpush1.xpose.msra.mxu0 %v445_v57  ;;  %7234 = vmatpush1.xpose.msra.mxu1 %v447_v58  ;;  %v846_v57 = vld [vmem:[%s17228_s29 + $0x1008] sm:$0x3]  ;;  %v848_v58 = vld [vmem:[%s17228_s29 + $0x1018] sm:$0x3] }
 0x132   : > { %7301 = vmatprep.subr.mxu0 %v834_v60  ;;  %7371 = vmatprep.subr.mxu1 %v836_v61  ;;  %v1755_v60 = vrot.slane %v1741_v48, %v17254_v19  ;;  %v270_v61 = vld [vmem:[%s17222_s3 + $0x108] sm:$0xff] }
 0x134   : > { %v3839_v8 = vpop.f32.mrf.mxu0  ;;  %7198 = vmatmul.mubr.f32.vlgmr.msra.gmra.mxu0 %v1680_v42  ;;  %v3909_v9 = vpop.f32.mrf.mxu1  ;;  %7268 = vmatmul.mubr.f32.vlgmr.msra.gmra.mxu1 %v1687_v43  ;;  %v841_v42 = vld [vmem:[%s17228_s29 + $0xfe0] sm:$0x3]  ;;  %v843_v43 = vld [vmem:[%s17228_s29 + $0xff0] sm:$0x3] }
 0x135   : > { %v3840_v10 = vadd.f32 %v3839_v8, %v3770_v59  ;;  %7302 = vmatpush1.xpose.msra.mxu0 %v833_v1  ;;  %7372 = vmatpush1.xpose.msra.mxu1 %v835_v2  ;;  %v1748_v59 = vrot.slane %v269_v41, %v17254_v19  ;;  %v464_v1 = vld [vmem:[%s17228_s29 + $0x418] sm:$0xff]  ;;  %v470_v41 = vld [vmem:[%s17228_s29 + $0x448] sm:$0xff] }
 0x136   : > { %v3841_v11 = vpop.f32.mrf.mxu0  ;;  %v3911_v12 = vpop.f32.mrf.mxu1  ;;  %7303 = vmatprep.subr.mxu0 %v450_v3  ;;  %7373 = vmatprep.subr.mxu1 %v452_v4  ;;  %v1757_v3 = vcombine.high %v1755_v60, %v1755_v60  ;;  %v1758_v4 = vcombine.high %v270_v61, %v270_v61 }
 0x137   : > { %v3910_v15 = vadd.f32 %v3909_v9, %v3840_v10  ;;  %7337 = vmatprep.mubr.f32.mxu0 %v1705_v5  ;;  %7407 = vmatprep.mubr.f32.mxu1 %v1706_v6  ;;  %v1756_v2 = vcombine.high %v1748_v59, %v1748_v59  ;;  %v461_v10 = vld [vmem:[%s17228_s29 + $0x400] sm:$0xff]  ;;  %v463_v11 = vld [vmem:[%s17228_s29 + $0x410] sm:$0xff] }
 0x139   : > { %7304 = vmatpush1.xpose.msra.mxu0 %v449_v13  ;;  %7374 = vmatpush1.xpose.msra.mxu1 %v451_v14  ;;  %v850_v13 = vld [vmem:[%s17228_s29 + $0x1028] sm:$0x3]  ;;  %v852_v14 = vld [vmem:[%s17228_s29 + $0x1038] sm:$0x3] }
 0x13a   : > { %7441 = vmatprep.subr.mxu0 %v838_v16  ;;  %7511 = vmatprep.subr.mxu1 %v840_v17  ;;  %v1772_v16 = vrot.slane %v1758_v4, %v17254_v19  ;;  %v271_v17 = vld [vmem:[%s17222_s3 + $0x110] sm:$0xff] }
 0x13c   : > { %v3979_v29 = vpop.f32.mrf.mxu0  ;;  %7338 = vmatmul.mubr.f32.vlgmr.msra.gmra.mxu0 %v1697_v62  ;;  %v4049_v30 = vpop.f32.mrf.mxu1  ;;  %7408 = vmatmul.mubr.f32.vlgmr.msra.gmra.mxu1 %v1704_v63  ;;  %v845_v62 = vld [vmem:[%s17228_s29 + $0x1000] sm:$0x3]  ;;  %v847_v63 = vld [vmem:[%s17228_s29 + $0x1010] sm:$0x3] }
 0x13d   : > { %v3980_v31 = vadd.f32 %v3979_v29, %v3910_v15  ;;  %7442 = vmatpush1.xpose.msra.mxu0 %v837_v22  ;;  %7512 = vmatpush1.xpose.msra.mxu1 %v839_v23  ;;  %v1765_v15 = vrot.slane %v270_v61, %v17254_v19  ;;  %v468_v22 = vld [vmem:[%s17228_s29 + $0x438] sm:$0xff]  ;;  %v474_v61 = vld [vmem:[%s17228_s29 + $0x468] sm:$0xff] }
 0x13e   : > { %v3981_v32 = vpop.f32.mrf.mxu0  ;;  %v4051_v33 = vpop.f32.mrf.mxu1  ;;  %7443 = vmatprep.subr.mxu0 %v454_v24  ;;  %7513 = vmatprep.subr.mxu1 %v456_v25  ;;  %v1774_v24 = vcombine.high %v1772_v16, %v1772_v16  ;;  %v1775_v25 = vcombine.high %v271_v17, %v271_v17 }
 0x13f   : > { %v4050_v36 = vadd.f32 %v4049_v30, %v3980_v31  ;;  %7477 = vmatprep.mubr.f32.mxu0 %v1722_v26  ;;  %7547 = vmatprep.mubr.f32.mxu1 %v1723_v27  ;;  %v1773_v23 = vcombine.high %v1765_v15, %v1765_v15  ;;  %v465_v31 = vld [vmem:[%s17228_s29 + $0x420] sm:$0xff]  ;;  %v467_v32 = vld [vmem:[%s17228_s29 + $0x430] sm:$0xff] }
 0x141   : > { %7444 = vmatpush1.xpose.msra.mxu0 %v453_v34  ;;  %7514 = vmatpush1.xpose.msra.mxu1 %v455_v35  ;;  %v854_v34 = vld [vmem:[%s17228_s29 + $0x1048] sm:$0x3]  ;;  %v856_v35 = vld [vmem:[%s17228_s29 + $0x1058] sm:$0x3] }
 0x142   : > { %7581 = vmatprep.subr.mxu0 %v842_v37  ;;  %7651 = vmatprep.subr.mxu1 %v844_v38  ;;  %v1789_v37 = vrot.slane %v1775_v25, %v17254_v19  ;;  %v272_v38 = vld [vmem:[%s17222_s3 + $0x118] sm:$0xff] }
 0x144   : > { %v4119_v49 = vpop.f32.mrf.mxu0  ;;  %7478 = vmatmul.mubr.f32.vlgmr.msra.gmra.mxu0 %v1714_v18  ;;  %v4189_v50 = vpop.f32.mrf.mxu1  ;;  %7548 = vmatmul.mubr.f32.vlgmr.msra.gmra.mxu1 %v1721_v20  ;;  %v849_v18 = vld [vmem:[%s17228_s29 + $0x1020] sm:$0x3]  ;;  %v851_v20 = vld [vmem:[%s17228_s29 + $0x1030] sm:$0x3] }
 0x145   : > { %v4120_v51 = vadd.f32 %v4119_v49, %v4050_v36  ;;  %7582 = vmatpush1.xpose.msra.mxu0 %v841_v42  ;;  %7652 = vmatpush1.xpose.msra.mxu1 %v843_v43  ;;  %v1782_v36 = vrot.slane %v271_v17, %v17254_v19  ;;  %v472_v42 = vld [vmem:[%s17228_s29 + $0x458] sm:$0xff]  ;;  %v478_v17 = vld [vmem:[%s17228_s29 + $0x488] sm:$0xff] }
 0x146   : > { %v4121_v52 = vpop.f32.mrf.mxu0  ;;  %v4191_v53 = vpop.f32.mrf.mxu1  ;;  %7583 = vmatprep.subr.mxu0 %v458_v44  ;;  %7653 = vmatprep.subr.mxu1 %v460_v45  ;;  %v1791_v44 = vcombine.high %v1789_v37, %v1789_v37  ;;  %v1792_v45 = vcombine.high %v272_v38, %v272_v38 }
 0x147   : > { %v4190_v56 = vadd.f32 %v4189_v50, %v4120_v51  ;;  %7617 = vmatprep.mubr.f32.mxu0 %v1739_v46  ;;  %7687 = vmatprep.mubr.f32.mxu1 %v1740_v47  ;;  %v1790_v43 = vcombine.high %v1782_v36, %v1782_v36  ;;  %v469_v51 = vld [vmem:[%s17228_s29 + $0x440] sm:$0xff]  ;;  %v471_v52 = vld [vmem:[%s17228_s29 + $0x450] sm:$0xff] }
 0x149   : > { %7584 = vmatpush1.xpose.msra.mxu0 %v457_v54  ;;  %7654 = vmatpush1.xpose.msra.mxu1 %v459_v55  ;;  %v858_v54 = vld [vmem:[%s17228_s29 + $0x1068] sm:$0x3]  ;;  %v860_v55 = vld [vmem:[%s17228_s29 + $0x1078] sm:$0x3] }
 0x14a   : > { %7721 = vmatprep.subr.mxu0 %v846_v57  ;;  %7791 = vmatprep.subr.mxu1 %v848_v58  ;;  %v1806_v57 = vrot.slane %v1792_v45, %v17254_v19  ;;  %v273_v58 = vld [vmem:[%s17222_s3 + $0x120] sm:$0xff] }
 0x14c   : > { %v4259_v5 = vpop.f32.mrf.mxu0  ;;  %7618 = vmatmul.mubr.f32.vlgmr.msra.gmra.mxu0 %v1731_v39  ;;  %v4329_v6 = vpop.f32.mrf.mxu1  ;;  %7688 = vmatmul.mubr.f32.vlgmr.msra.gmra.mxu1 %v1738_v40  ;;  %v853_v39 = vld [vmem:[%s17228_s29 + $0x1040] sm:$0x3]  ;;  %v855_v40 = vld [vmem:[%s17228_s29 + $0x1050] sm:$0x3] }
 0x14d   : > { %v4260_v7 = vadd.f32 %v4259_v5, %v4190_v56  ;;  %7722 = vmatpush1.xpose.msra.mxu0 %v845_v62  ;;  %7792 = vmatpush1.xpose.msra.mxu1 %v847_v63  ;;  %v1799_v56 = vrot.slane %v272_v38, %v17254_v19  ;;  %v476_v62 = vld [vmem:[%s17228_s29 + $0x478] sm:$0xff]  ;;  %v482_v38 = vld [vmem:[%s17228_s29 + $0x4a8] sm:$0xff] }
 0x14e   : > { %v4261_v8 = vpop.f32.mrf.mxu0  ;;  %v4331_v9 = vpop.f32.mrf.mxu1  ;;  %7723 = vmatprep.subr.mxu0 %v462_v0  ;;  %7793 = vmatprep.subr.mxu1 %v464_v1  ;;  %v1808_v0 = vcombine.high %v1806_v57, %v1806_v57  ;;  %v1809_v1 = vcombine.high %v273_v58, %v273_v58 }
 0x14f   : > { %v4330_v12 = vadd.f32 %v4329_v6, %v4260_v7  ;;  %7757 = vmatprep.mubr.f32.mxu0 %v1756_v2  ;;  %7827 = vmatprep.mubr.f32.mxu1 %v1757_v3  ;;  %v1807_v63 = vcombine.high %v1799_v56, %v1799_v56  ;;  %v473_v7 = vld [vmem:[%s17228_s29 + $0x460] sm:$0xff]  ;;  %v475_v8 = vld [vmem:[%s17228_s29 + $0x470] sm:$0xff] }
 0x151   : > { %7724 = vmatpush1.xpose.msra.mxu0 %v461_v10  ;;  %7794 = vmatpush1.xpose.msra.mxu1 %v463_v11  ;;  %v862_v10 = vld [vmem:[%s17228_s29 + $0x1088] sm:$0x3]  ;;  %v864_v11 = vld [vmem:[%s17228_s29 + $0x1098] sm:$0x3] }
 0x152   : > { %7861 = vmatprep.subr.mxu0 %v850_v13  ;;  %7931 = vmatprep.subr.mxu1 %v852_v14  ;;  %v1823_v13 = vrot.slane %v1809_v1, %v17254_v19  ;;  %v274_v14 = vld [vmem:[%s17222_s3 + $0x128] sm:$0xff] }
 0x154   : > { %v4399_v26 = vpop.f32.mrf.mxu0  ;;  %7758 = vmatmul.mubr.f32.vlgmr.msra.gmra.mxu0 %v1748_v59  ;;  %v4469_v27 = vpop.f32.mrf.mxu1  ;;  %7828 = vmatmul.mubr.f32.vlgmr.msra.gmra.mxu1 %v1755_v60  ;;  %v857_v59 = vld [vmem:[%s17228_s29 + $0x1060] sm:$0x3]  ;;  %v859_v60 = vld [vmem:[%s17228_s29 + $0x1070] sm:$0x3] }
 0x155   : > { %v4400_v28 = vadd.f32 %v4399_v26, %v4330_v12  ;;  %7862 = vmatpush1.xpose.msra.mxu0 %v849_v18  ;;  %7932 = vmatpush1.xpose.msra.mxu1 %v851_v20  ;;  %v1816_v12 = vrot.slane %v273_v58, %v17254_v19  ;;  %v480_v18 = vld [vmem:[%s17228_s29 + $0x498] sm:$0xff]  ;;  %v486_v58 = vld [vmem:[%s17228_s29 + $0x4c8] sm:$0xff] }
 0x156   : > { %v4401_v29 = vpop.f32.mrf.mxu0  ;;  %v4471_v30 = vpop.f32.mrf.mxu1  ;;  %7863 = vmatprep.subr.mxu0 %v466_v21  ;;  %7933 = vmatprep.subr.mxu1 %v468_v22  ;;  %v1825_v21 = vcombine.high %v1823_v13, %v1823_v13  ;;  %v1826_v22 = vcombine.high %v274_v14, %v274_v14 }
 0x157   : > { %v4470_v33 = vadd.f32 %v4469_v27, %v4400_v28  ;;  %7897 = vmatprep.mubr.f32.mxu0 %v1773_v23  ;;  %7967 = vmatprep.mubr.f32.mxu1 %v1774_v24  ;;  %v1824_v20 = vcombine.high %v1816_v12, %v1816_v12  ;;  %v477_v28 = vld [vmem:[%s17228_s29 + $0x480] sm:$0xff]  ;;  %v479_v29 = vld [vmem:[%s17228_s29 + $0x490] sm:$0xff] }
 0x159   : > { %7864 = vmatpush1.xpose.msra.mxu0 %v465_v31  ;;  %7934 = vmatpush1.xpose.msra.mxu1 %v467_v32  ;;  %v866_v31 = vld [vmem:[%s17228_s29 + $0x10a8] sm:$0x3]  ;;  %v868_v32 = vld [vmem:[%s17228_s29 + $0x10b8] sm:$0x3] }
 0x15a   : > { %8001 = vmatprep.subr.mxu0 %v854_v34  ;;  %8071 = vmatprep.subr.mxu1 %v856_v35  ;;  %v1840_v34 = vrot.slane %v1826_v22, %v17254_v19  ;;  %v275_v35 = vld [vmem:[%s17222_s3 + $0x130] sm:$0xff] }
 0x15c   : > { %v4539_v46 = vpop.f32.mrf.mxu0  ;;  %7898 = vmatmul.mubr.f32.vlgmr.msra.gmra.mxu0 %v1765_v15  ;;  %v4609_v47 = vpop.f32.mrf.mxu1  ;;  %7968 = vmatmul.mubr.f32.vlgmr.msra.gmra.mxu1 %v1772_v16  ;;  %v861_v15 = vld [vmem:[%s17228_s29 + $0x1080] sm:$0x3]  ;;  %v863_v16 = vld [vmem:[%s17228_s29 + $0x1090] sm:$0x3] }
 0x15d   : > { %v4540_v48 = vadd.f32 %v4539_v46, %v4470_v33  ;;  %8002 = vmatpush1.xpose.msra.mxu0 %v853_v39  ;;  %8072 = vmatpush1.xpose.msra.mxu1 %v855_v40  ;;  %v1833_v33 = vrot.slane %v274_v14, %v17254_v19  ;;  %v484_v39 = vld [vmem:[%s17228_s29 + $0x4b8] sm:$0xff]  ;;  %v490_v14 = vld [vmem:[%s17228_s29 + $0x4e8] sm:$0xff] }
 0x15e   : > { %v4541_v49 = vpop.f32.mrf.mxu0  ;;  %v4611_v50 = vpop.f32.mrf.mxu1  ;;  %8003 = vmatprep.subr.mxu0 %v470_v41  ;;  %8073 = vmatprep.subr.mxu1 %v472_v42  ;;  %v1842_v41 = vcombine.high %v1840_v34, %v1840_v34  ;;  %v1843_v42 = vcombine.high %v275_v35, %v275_v35 }
 0x15f   : > { %v4610_v53 = vadd.f32 %v4609_v47, %v4540_v48  ;;  %8037 = vmatprep.mubr.f32.mxu0 %v1790_v43  ;;  %8107 = vmatprep.mubr.f32.mxu1 %v1791_v44  ;;  %v1841_v40 = vcombine.high %v1833_v33, %v1833_v33  ;;  %v481_v48 = vld [vmem:[%s17228_s29 + $0x4a0] sm:$0xff]  ;;  %v483_v49 = vld [vmem:[%s17228_s29 + $0x4b0] sm:$0xff] }
 0x161   : > { %8004 = vmatpush1.xpose.msra.mxu0 %v469_v51  ;;  %8074 = vmatpush1.xpose.msra.mxu1 %v471_v52  ;;  %v870_v51 = vld [vmem:[%s17228_s29 + $0x10c8] sm:$0x3]  ;;  %v872_v52 = vld [vmem:[%s17228_s29 + $0x10d8] sm:$0x3] }
 0x162   : > { %8141 = vmatprep.subr.mxu0 %v858_v54  ;;  %8211 = vmatprep.subr.mxu1 %v860_v55  ;;  %v1857_v54 = vrot.slane %v1843_v42, %v17254_v19  ;;  %v276_v55 = vld [vmem:[%s17222_s3 + $0x138] sm:$0xff] }
 0x164   : > { %v4679_v2 = vpop.f32.mrf.mxu0  ;;  %8038 = vmatmul.mubr.f32.vlgmr.msra.gmra.mxu0 %v1782_v36  ;;  %v4749_v3 = vpop.f32.mrf.mxu1  ;;  %8108 = vmatmul.mubr.f32.vlgmr.msra.gmra.mxu1 %v1789_v37  ;;  %v865_v36 = vld [vmem:[%s17228_s29 + $0x10a0] sm:$0x3]  ;;  %v867_v37 = vld [vmem:[%s17228_s29 + $0x10b0] sm:$0x3] }
 0x165   : > { %v4680_v4 = vadd.f32 %v4679_v2, %v4610_v53  ;;  %8142 = vmatpush1.xpose.msra.mxu0 %v857_v59  ;;  %8212 = vmatpush1.xpose.msra.mxu1 %v859_v60  ;;  %v1850_v53 = vrot.slane %v275_v35, %v17254_v19  ;;  %v488_v59 = vld [vmem:[%s17228_s29 + $0x4d8] sm:$0xff]  ;;  %v494_v35 = vld [vmem:[%s17228_s29 + $0x508] sm:$0xff] }
 0x166   : > { %v4681_v5 = vpop.f32.mrf.mxu0  ;;  %v4751_v6 = vpop.f32.mrf.mxu1  ;;  %8143 = vmatprep.subr.mxu0 %v474_v61  ;;  %8213 = vmatprep.subr.mxu1 %v476_v62  ;;  %v1859_v61 = vcombine.high %v1857_v54, %v1857_v54  ;;  %v1860_v62 = vcombine.high %v276_v55, %v276_v55 }
 0x167   : > { %v4750_v9 = vadd.f32 %v4749_v3, %v4680_v4  ;;  %8177 = vmatprep.mubr.f32.mxu0 %v1807_v63  ;;  %8247 = vmatprep.mubr.f32.mxu1 %v1808_v0  ;;  %v1858_v60 = vcombine.high %v1850_v53, %v1850_v53  ;;  %v485_v4 = vld [vmem:[%s17228_s29 + $0x4c0] sm:$0xff]  ;;  %v487_v5 = vld [vmem:[%s17228_s29 + $0x4d0] sm:$0xff] }
 0x169   : > { %8144 = vmatpush1.xpose.msra.mxu0 %v473_v7  ;;  %8214 = vmatpush1.xpose.msra.mxu1 %v475_v8  ;;  %v874_v7 = vld [vmem:[%s17228_s29 + $0x10e8] sm:$0x3]  ;;  %v876_v8 = vld [vmem:[%s17228_s29 + $0x10f8] sm:$0x3] }
 0x16a   : > { %8281 = vmatprep.subr.mxu0 %v862_v10  ;;  %8351 = vmatprep.subr.mxu1 %v864_v11  ;;  %v1874_v10 = vrot.slane %v1860_v62, %v17254_v19  ;;  %v277_v11 = vld [vmem:[%s17222_s3 + $0x140] sm:$0xff] }
 0x16c   : > { %v4819_v23 = vpop.f32.mrf.mxu0  ;;  %8178 = vmatmul.mubr.f32.vlgmr.msra.gmra.mxu0 %v1799_v56  ;;  %v4889_v24 = vpop.f32.mrf.mxu1  ;;  %8248 = vmatmul.mubr.f32.vlgmr.msra.gmra.mxu1 %v1806_v57  ;;  %v869_v56 = vld [vmem:[%s17228_s29 + $0x10c0] sm:$0x3]  ;;  %v871_v57 = vld [vmem:[%s17228_s29 + $0x10d0] sm:$0x3] }
 0x16d   : > { %v4820_v25 = vadd.f32 %v4819_v23, %v4750_v9  ;;  %8282 = vmatpush1.xpose.msra.mxu0 %v861_v15  ;;  %8352 = vmatpush1.xpose.msra.mxu1 %v863_v16  ;;  %v1867_v9 = vrot.slane %v276_v55, %v17254_v19  ;;  %v492_v15 = vld [vmem:[%s17228_s29 + $0x4f8] sm:$0xff]  ;;  %v498_v55 = vld [vmem:[%s17228_s29 + $0x528] sm:$0xff] }
 0x16e   : > { %v4821_v26 = vpop.f32.mrf.mxu0  ;;  %v4891_v27 = vpop.f32.mrf.mxu1  ;;  %8283 = vmatprep.subr.mxu0 %v478_v17  ;;  %8353 = vmatprep.subr.mxu1 %v480_v18  ;;  %v1876_v17 = vcombine.high %v1874_v10, %v1874_v10  ;;  %v1877_v18 = vcombine.high %v277_v11, %v277_v11 }
 0x16f   : > { %v4890_v30 = vadd.f32 %v4889_v24, %v4820_v25  ;;  %8317 = vmatprep.mubr.f32.mxu0 %v1824_v20  ;;  %8387 = vmatprep.mubr.f32.mxu1 %v1825_v21  ;;  %v1875_v16 = vcombine.high %v1867_v9, %v1867_v9  ;;  %v489_v25 = vld [vmem:[%s17228_s29 + $0x4e0] sm:$0xff]  ;;  %v491_v26 = vld [vmem:[%s17228_s29 + $0x4f0] sm:$0xff] }
 0x171   : > { %8284 = vmatpush1.xpose.msra.mxu0 %v477_v28  ;;  %8354 = vmatpush1.xpose.msra.mxu1 %v479_v29  ;;  %v878_v28 = vld [vmem:[%s17228_s29 + $0x1108] sm:$0x3]  ;;  %v880_v29 = vld [vmem:[%s17228_s29 + $0x1118] sm:$0x3] }
 0x172   : > { %8421 = vmatprep.subr.mxu0 %v866_v31  ;;  %8491 = vmatprep.subr.mxu1 %v868_v32  ;;  %v1891_v31 = vrot.slane %v1877_v18, %v17254_v19  ;;  %v278_v32 = vld [vmem:[%s17222_s3 + $0x148] sm:$0xff] }
 0x174   : > { %v4959_v43 = vpop.f32.mrf.mxu0  ;;  %8318 = vmatmul.mubr.f32.vlgmr.msra.gmra.mxu0 %v1816_v12  ;;  %v5029_v44 = vpop.f32.mrf.mxu1  ;;  %8388 = vmatmul.mubr.f32.vlgmr.msra.gmra.mxu1 %v1823_v13  ;;  %v873_v12 = vld [vmem:[%s17228_s29 + $0x10e0] sm:$0x3]  ;;  %v875_v13 = vld [vmem:[%s17228_s29 + $0x10f0] sm:$0x3] }
 0x175   : > { %v4960_v45 = vadd.f32 %v4959_v43, %v4890_v30  ;;  %8422 = vmatpush1.xpose.msra.mxu0 %v865_v36  ;;  %8492 = vmatpush1.xpose.msra.mxu1 %v867_v37  ;;  %v1884_v30 = vrot.slane %v277_v11, %v17254_v19  ;;  %v496_v36 = vld [vmem:[%s17228_s29 + $0x518] sm:$0xff]  ;;  %v502_v11 = vld [vmem:[%s17228_s29 + $0x548] sm:$0xff] }
 0x176   : > { %v4961_v46 = vpop.f32.mrf.mxu0  ;;  %v5031_v47 = vpop.f32.mrf.mxu1  ;;  %8423 = vmatprep.subr.mxu0 %v482_v38  ;;  %8493 = vmatprep.subr.mxu1 %v484_v39  ;;  %v1893_v38 = vcombine.high %v1891_v31, %v1891_v31  ;;  %v1894_v39 = vcombine.high %v278_v32, %v278_v32 }
 0x177   : > { %v5030_v50 = vadd.f32 %v5029_v44, %v4960_v45  ;;  %8457 = vmatprep.mubr.f32.mxu0 %v1841_v40  ;;  %8527 = vmatprep.mubr.f32.mxu1 %v1842_v41  ;;  %v1892_v37 = vcombine.high %v1884_v30, %v1884_v30  ;;  %v493_v45 = vld [vmem:[%s17228_s29 + $0x500] sm:$0xff]  ;;  %v495_v46 = vld [vmem:[%s17228_s29 + $0x510] sm:$0xff] }
 0x179   : > { %8424 = vmatpush1.xpose.msra.mxu0 %v481_v48  ;;  %8494 = vmatpush1.xpose.msra.mxu1 %v483_v49  ;;  %v882_v48 = vld [vmem:[%s17228_s29 + $0x1128] sm:$0x3]  ;;  %v884_v49 = vld [vmem:[%s17228_s29 + $0x1138] sm:$0x3] }
 0x17a   : > { %8561 = vmatprep.subr.mxu0 %v870_v51  ;;  %8631 = vmatprep.subr.mxu1 %v872_v52  ;;  %v1908_v51 = vrot.slane %v1894_v39, %v17254_v19  ;;  %v279_v52 = vld [vmem:[%s17222_s3 + $0x150] sm:$0xff] }
 0x17c   : > { %v5099_v63 = vpop.f32.mrf.mxu0  ;;  %8458 = vmatmul.mubr.f32.vlgmr.msra.gmra.mxu0 %v1833_v33  ;;  %v5169_v0 = vpop.f32.mrf.mxu1  ;;  %8528 = vmatmul.mubr.f32.vlgmr.msra.gmra.mxu1 %v1840_v34  ;;  %v877_v33 = vld [vmem:[%s17228_s29 + $0x1100] sm:$0x3]  ;;  %v879_v34 = vld [vmem:[%s17228_s29 + $0x1110] sm:$0x3] }
 0x17d   : > { %v5100_v1 = vadd.f32 %v5099_v63, %v5030_v50  ;;  %8562 = vmatpush1.xpose.msra.mxu0 %v869_v56  ;;  %8632 = vmatpush1.xpose.msra.mxu1 %v871_v57  ;;  %v1901_v50 = vrot.slane %v278_v32, %v17254_v19  ;;  %v500_v56 = vld [vmem:[%s17228_s29 + $0x538] sm:$0xff]  ;;  %v506_v32 = vld [vmem:[%s17228_s29 + $0x568] sm:$0xff] }
 0x17e   : > { %v5101_v2 = vpop.f32.mrf.mxu0  ;;  %v5171_v3 = vpop.f32.mrf.mxu1  ;;  %8563 = vmatprep.subr.mxu0 %v486_v58  ;;  %8633 = vmatprep.subr.mxu1 %v488_v59  ;;  %v1910_v58 = vcombine.high %v1908_v51, %v1908_v51  ;;  %v1911_v59 = vcombine.high %v279_v52, %v279_v52 }
 0x17f   : > { %v5170_v6 = vadd.f32 %v5169_v0, %v5100_v1  ;;  %8597 = vmatprep.mubr.f32.mxu0 %v1858_v60  ;;  %8667 = vmatprep.mubr.f32.mxu1 %v1859_v61  ;;  %v1909_v57 = vcombine.high %v1901_v50, %v1901_v50  ;;  %v497_v1 = vld [vmem:[%s17228_s29 + $0x520] sm:$0xff]  ;;  %v499_v2 = vld [vmem:[%s17228_s29 + $0x530] sm:$0xff] }
 0x181   : > { %8564 = vmatpush1.xpose.msra.mxu0 %v485_v4  ;;  %8634 = vmatpush1.xpose.msra.mxu1 %v487_v5  ;;  %v886_v4 = vld [vmem:[%s17228_s29 + $0x1148] sm:$0x3]  ;;  %v888_v5 = vld [vmem:[%s17228_s29 + $0x1158] sm:$0x3] }
 0x182   : > { %8701 = vmatprep.subr.mxu0 %v874_v7  ;;  %8771 = vmatprep.subr.mxu1 %v876_v8  ;;  %v1925_v7 = vrot.slane %v1911_v59, %v17254_v19  ;;  %v280_v8 = vld [vmem:[%s17222_s3 + $0x158] sm:$0xff] }
 0x184   : > { %v5239_v20 = vpop.f32.mrf.mxu0  ;;  %8598 = vmatmul.mubr.f32.vlgmr.msra.gmra.mxu0 %v1850_v53  ;;  %v5309_v21 = vpop.f32.mrf.mxu1  ;;  %8668 = vmatmul.mubr.f32.vlgmr.msra.gmra.mxu1 %v1857_v54  ;;  %v881_v53 = vld [vmem:[%s17228_s29 + $0x1120] sm:$0x3]  ;;  %v883_v54 = vld [vmem:[%s17228_s29 + $0x1130] sm:$0x3] }
 0x185   : > { %v5240_v22 = vadd.f32 %v5239_v20, %v5170_v6  ;;  %8702 = vmatpush1.xpose.msra.mxu0 %v873_v12  ;;  %8772 = vmatpush1.xpose.msra.mxu1 %v875_v13  ;;  %v1918_v6 = vrot.slane %v279_v52, %v17254_v19  ;;  %v504_v12 = vld [vmem:[%s17228_s29 + $0x558] sm:$0xff]  ;;  %v510_v52 = vld [vmem:[%s17228_s29 + $0x588] sm:$0xff] }
 0x186   : > { %v5241_v23 = vpop.f32.mrf.mxu0  ;;  %v5311_v24 = vpop.f32.mrf.mxu1  ;;  %8703 = vmatprep.subr.mxu0 %v490_v14  ;;  %8773 = vmatprep.subr.mxu1 %v492_v15  ;;  %v1927_v14 = vcombine.high %v1925_v7, %v1925_v7  ;;  %v1928_v15 = vcombine.high %v280_v8, %v280_v8 }
 0x187   : > { %v5310_v27 = vadd.f32 %v5309_v21, %v5240_v22  ;;  %8737 = vmatprep.mubr.f32.mxu0 %v1875_v16  ;;  %8807 = vmatprep.mubr.f32.mxu1 %v1876_v17  ;;  %v1926_v13 = vcombine.high %v1918_v6, %v1918_v6  ;;  %v501_v22 = vld [vmem:[%s17228_s29 + $0x540] sm:$0xff]  ;;  %v503_v23 = vld [vmem:[%s17228_s29 + $0x550] sm:$0xff] }
 0x189   : > { %8704 = vmatpush1.xpose.msra.mxu0 %v489_v25  ;;  %8774 = vmatpush1.xpose.msra.mxu1 %v491_v26  ;;  %v890_v25 = vld [vmem:[%s17228_s29 + $0x1168] sm:$0x3]  ;;  %v892_v26 = vld [vmem:[%s17228_s29 + $0x1178] sm:$0x3] }
 0x18a   : > { %8841 = vmatprep.subr.mxu0 %v878_v28  ;;  %8911 = vmatprep.subr.mxu1 %v880_v29  ;;  %v1942_v28 = vrot.slane %v1928_v15, %v17254_v19  ;;  %v281_v29 = vld [vmem:[%s17222_s3 + $0x160] sm:$0xff] }
 0x18c   : > { %v5379_v40 = vpop.f32.mrf.mxu0  ;;  %8738 = vmatmul.mubr.f32.vlgmr.msra.gmra.mxu0 %v1867_v9  ;;  %v5449_v41 = vpop.f32.mrf.mxu1  ;;  %8808 = vmatmul.mubr.f32.vlgmr.msra.gmra.mxu1 %v1874_v10  ;;  %v885_v9 = vld [vmem:[%s17228_s29 + $0x1140] sm:$0x3]  ;;  %v887_v10 = vld [vmem:[%s17228_s29 + $0x1150] sm:$0x3] }
 0x18d   : > { %v5380_v42 = vadd.f32 %v5379_v40, %v5310_v27  ;;  %8842 = vmatpush1.xpose.msra.mxu0 %v877_v33  ;;  %8912 = vmatpush1.xpose.msra.mxu1 %v879_v34  ;;  %v1935_v27 = vrot.slane %v280_v8, %v17254_v19  ;;  %v508_v33 = vld [vmem:[%s17228_s29 + $0x578] sm:$0xff]  ;;  %v514_v8 = vld [vmem:[%s17228_s29 + $0x5a8] sm:$0xff] }
 0x18e   : > { %v5381_v43 = vpop.f32.mrf.mxu0  ;;  %v5451_v44 = vpop.f32.mrf.mxu1  ;;  %8843 = vmatprep.subr.mxu0 %v494_v35  ;;  %8913 = vmatprep.subr.mxu1 %v496_v36  ;;  %v1944_v35 = vcombine.high %v1942_v28, %v1942_v28  ;;  %v1945_v36 = vcombine.high %v281_v29, %v281_v29 }
 0x18f   : > { %v5450_v47 = vadd.f32 %v5449_v41, %v5380_v42  ;;  %8877 = vmatprep.mubr.f32.mxu0 %v1892_v37  ;;  %8947 = vmatprep.mubr.f32.mxu1 %v1893_v38  ;;  %v1943_v34 = vcombine.high %v1935_v27, %v1935_v27  ;;  %v505_v42 = vld [vmem:[%s17228_s29 + $0x560] sm:$0xff]  ;;  %v507_v43 = vld [vmem:[%s17228_s29 + $0x570] sm:$0xff] }
 0x191   : > { %8844 = vmatpush1.xpose.msra.mxu0 %v493_v45  ;;  %8914 = vmatpush1.xpose.msra.mxu1 %v495_v46  ;;  %v894_v45 = vld [vmem:[%s17228_s29 + $0x1188] sm:$0x3]  ;;  %v896_v46 = vld [vmem:[%s17228_s29 + $0x1198] sm:$0x3] }
 0x192   : > { %8981 = vmatprep.subr.mxu0 %v882_v48  ;;  %9051 = vmatprep.subr.mxu1 %v884_v49  ;;  %v1959_v48 = vrot.slane %v1945_v36, %v17254_v19  ;;  %v282_v49 = vld [vmem:[%s17222_s3 + $0x168] sm:$0xff] }
 0x194   : > { %v5519_v60 = vpop.f32.mrf.mxu0  ;;  %8878 = vmatmul.mubr.f32.vlgmr.msra.gmra.mxu0 %v1884_v30  ;;  %v5589_v61 = vpop.f32.mrf.mxu1  ;;  %8948 = vmatmul.mubr.f32.vlgmr.msra.gmra.mxu1 %v1891_v31  ;;  %v889_v30 = vld [vmem:[%s17228_s29 + $0x1160] sm:$0x3]  ;;  %v891_v31 = vld [vmem:[%s17228_s29 + $0x1170] sm:$0x3] }
 0x195   : > { %v5520_v62 = vadd.f32 %v5519_v60, %v5450_v47  ;;  %8982 = vmatpush1.xpose.msra.mxu0 %v881_v53  ;;  %9052 = vmatpush1.xpose.msra.mxu1 %v883_v54  ;;  %v1952_v47 = vrot.slane %v281_v29, %v17254_v19  ;;  %v512_v53 = vld [vmem:[%s17228_s29 + $0x598] sm:$0xff]  ;;  %v518_v29 = vld [vmem:[%s17228_s29 + $0x5c8] sm:$0xff] }
 0x196   : > { %v5521_v63 = vpop.f32.mrf.mxu0  ;;  %v5591_v0 = vpop.f32.mrf.mxu1  ;;  %8983 = vmatprep.subr.mxu0 %v498_v55  ;;  %9053 = vmatprep.subr.mxu1 %v500_v56  ;;  %v1961_v55 = vcombine.high %v1959_v48, %v1959_v48  ;;  %v1962_v56 = vcombine.high %v282_v49, %v282_v49 }
 0x197   : > { %v5590_v3 = vadd.f32 %v5589_v61, %v5520_v62  ;;  %9017 = vmatprep.mubr.f32.mxu0 %v1909_v57  ;;  %9087 = vmatprep.mubr.f32.mxu1 %v1910_v58  ;;  %v1960_v54 = vcombine.high %v1952_v47, %v1952_v47  ;;  %v509_v62 = vld [vmem:[%s17228_s29 + $0x580] sm:$0xff]  ;;  %v511_v63 = vld [vmem:[%s17228_s29 + $0x590] sm:$0xff] }
 0x199   : > { %8984 = vmatpush1.xpose.msra.mxu0 %v497_v1  ;;  %9054 = vmatpush1.xpose.msra.mxu1 %v499_v2  ;;  %v898_v1 = vld [vmem:[%s17228_s29 + $0x11a8] sm:$0x3]  ;;  %v900_v2 = vld [vmem:[%s17228_s29 + $0x11b8] sm:$0x3] }
 0x19a   : > { %9121 = vmatprep.subr.mxu0 %v886_v4  ;;  %9191 = vmatprep.subr.mxu1 %v888_v5  ;;  %v1976_v4 = vrot.slane %v1962_v56, %v17254_v19  ;;  %v283_v5 = vld [vmem:[%s17222_s3 + $0x170] sm:$0xff] }
 0x19c   : > { %v5659_v16 = vpop.f32.mrf.mxu0  ;;  %9018 = vmatmul.mubr.f32.vlgmr.msra.gmra.mxu0 %v1901_v50  ;;  %v5729_v17 = vpop.f32.mrf.mxu1  ;;  %9088 = vmatmul.mubr.f32.vlgmr.msra.gmra.mxu1 %v1908_v51  ;;  %v893_v50 = vld [vmem:[%s17228_s29 + $0x1180] sm:$0x3]  ;;  %v895_v51 = vld [vmem:[%s17228_s29 + $0x1190] sm:$0x3] }
 0x19d   : > { %v5660_v18 = vadd.f32 %v5659_v16, %v5590_v3  ;;  %9122 = vmatpush1.xpose.msra.mxu0 %v885_v9  ;;  %9192 = vmatpush1.xpose.msra.mxu1 %v887_v10  ;;  %v1969_v3 = vrot.slane %v282_v49, %v17254_v19  ;;  %v516_v9 = vld [vmem:[%s17228_s29 + $0x5b8] sm:$0xff]  ;;  %v522_v49 = vld [vmem:[%s17228_s29 + $0x5e8] sm:$0xff] }
 0x19e   : > { %v5661_v20 = vpop.f32.mrf.mxu0  ;;  %v5731_v21 = vpop.f32.mrf.mxu1  ;;  %9123 = vmatprep.subr.mxu0 %v502_v11  ;;  %9193 = vmatprep.subr.mxu1 %v504_v12  ;;  %v1978_v11 = vcombine.high %v1976_v4, %v1976_v4  ;;  %v1979_v12 = vcombine.high %v283_v5, %v283_v5 }
 0x19f   : > { %v5730_v24 = vadd.f32 %v5729_v17, %v5660_v18  ;;  %9157 = vmatprep.mubr.f32.mxu0 %v1926_v13  ;;  %9227 = vmatprep.mubr.f32.mxu1 %v1927_v14  ;;  %v1977_v10 = vcombine.high %v1969_v3, %v1969_v3  ;;  %v513_v18 = vld [vmem:[%s17228_s29 + $0x5a0] sm:$0xff]  ;;  %v515_v20 = vld [vmem:[%s17228_s29 + $0x5b0] sm:$0xff] }
 0x1a1   : > { %9124 = vmatpush1.xpose.msra.mxu0 %v501_v22  ;;  %9194 = vmatpush1.xpose.msra.mxu1 %v503_v23  ;;  %v902_v22 = vld [vmem:[%s17228_s29 + $0x11c8] sm:$0x3]  ;;  %v904_v23 = vld [vmem:[%s17228_s29 + $0x11d8] sm:$0x3] }
 0x1a2   : > { %9261 = vmatprep.subr.mxu0 %v890_v25  ;;  %9331 = vmatprep.subr.mxu1 %v892_v26  ;;  %v1993_v25 = vrot.slane %v1979_v12, %v17254_v19  ;;  %v284_v26 = vld [vmem:[%s17222_s3 + $0x178] sm:$0xff] }
 0x1a4   : > { %v5799_v37 = vpop.f32.mrf.mxu0  ;;  %9158 = vmatmul.mubr.f32.vlgmr.msra.gmra.mxu0 %v1918_v6  ;;  %v5869_v38 = vpop.f32.mrf.mxu1  ;;  %9228 = vmatmul.mubr.f32.vlgmr.msra.gmra.mxu1 %v1925_v7  ;;  %v897_v6 = vld [vmem:[%s17228_s29 + $0x11a0] sm:$0x3]  ;;  %v899_v7 = vld [vmem:[%s17228_s29 + $0x11b0] sm:$0x3] }
 0x1a5   : > { %v5800_v39 = vadd.f32 %v5799_v37, %v5730_v24  ;;  %9262 = vmatpush1.xpose.msra.mxu0 %v889_v30  ;;  %9332 = vmatpush1.xpose.msra.mxu1 %v891_v31  ;;  %v1986_v24 = vrot.slane %v283_v5, %v17254_v19  ;;  %v520_v30 = vld [vmem:[%s17228_s29 + $0x5d8] sm:$0xff]  ;;  %v526_v5 = vld [vmem:[%s17228_s29 + $0x608] sm:$0xff] }
 0x1a6   : > { %v5801_v40 = vpop.f32.mrf.mxu0  ;;  %v5871_v41 = vpop.f32.mrf.mxu1  ;;  %9263 = vmatprep.subr.mxu0 %v506_v32  ;;  %9333 = vmatprep.subr.mxu1 %v508_v33  ;;  %v1995_v32 = vcombine.high %v1993_v25, %v1993_v25  ;;  %v1996_v33 = vcombine.high %v284_v26, %v284_v26 }
 0x1a7   : > { %v5870_v44 = vadd.f32 %v5869_v38, %v5800_v39  ;;  %9297 = vmatprep.mubr.f32.mxu0 %v1943_v34  ;;  %9367 = vmatprep.mubr.f32.mxu1 %v1944_v35  ;;  %v1994_v31 = vcombine.high %v1986_v24, %v1986_v24  ;;  %v517_v39 = vld [vmem:[%s17228_s29 + $0x5c0] sm:$0xff]  ;;  %v519_v40 = vld [vmem:[%s17228_s29 + $0x5d0] sm:$0xff] }
 0x1a9   : > { %9264 = vmatpush1.xpose.msra.mxu0 %v505_v42  ;;  %9334 = vmatpush1.xpose.msra.mxu1 %v507_v43  ;;  %v906_v42 = vld [vmem:[%s17228_s29 + $0x11e8] sm:$0x3]  ;;  %v908_v43 = vld [vmem:[%s17228_s29 + $0x11f8] sm:$0x3] }
 0x1aa   : > { %9401 = vmatprep.subr.mxu0 %v894_v45  ;;  %9471 = vmatprep.subr.mxu1 %v896_v46  ;;  %v2010_v45 = vrot.slane %v1996_v33, %v17254_v19  ;;  %v285_v46 = vld [vmem:[%s17222_s3 + $0x180] sm:$0xff] }
 0x1ac   : > { %v5939_v57 = vpop.f32.mrf.mxu0  ;;  %9298 = vmatmul.mubr.f32.vlgmr.msra.gmra.mxu0 %v1935_v27  ;;  %v6009_v58 = vpop.f32.mrf.mxu1  ;;  %9368 = vmatmul.mubr.f32.vlgmr.msra.gmra.mxu1 %v1942_v28  ;;  %v901_v27 = vld [vmem:[%s17228_s29 + $0x11c0] sm:$0x3]  ;;  %v903_v28 = vld [vmem:[%s17228_s29 + $0x11d0] sm:$0x3] }
 0x1ad   : > { %v5940_v59 = vadd.f32 %v5939_v57, %v5870_v44  ;;  %9402 = vmatpush1.xpose.msra.mxu0 %v893_v50  ;;  %9472 = vmatpush1.xpose.msra.mxu1 %v895_v51  ;;  %v2003_v44 = vrot.slane %v284_v26, %v17254_v19  ;;  %v524_v50 = vld [vmem:[%s17228_s29 + $0x5f8] sm:$0xff]  ;;  %v530_v26 = vld [vmem:[%s17228_s29 + $0x628] sm:$0xff] }
 0x1ae   : > { %v5941_v60 = vpop.f32.mrf.mxu0  ;;  %v6011_v61 = vpop.f32.mrf.mxu1  ;;  %9403 = vmatprep.subr.mxu0 %v510_v52  ;;  %9473 = vmatprep.subr.mxu1 %v512_v53  ;;  %v2012_v52 = vcombine.high %v2010_v45, %v2010_v45  ;;  %v2013_v53 = vcombine.high %v285_v46, %v285_v46 }
 0x1af   : > { %v6010_v0 = vadd.f32 %v6009_v58, %v5940_v59  ;;  %9437 = vmatprep.mubr.f32.mxu0 %v1960_v54  ;;  %9507 = vmatprep.mubr.f32.mxu1 %v1961_v55  ;;  %v2011_v51 = vcombine.high %v2003_v44, %v2003_v44  ;;  %v521_v59 = vld [vmem:[%s17228_s29 + $0x5e0] sm:$0xff]  ;;  %v523_v60 = vld [vmem:[%s17228_s29 + $0x5f0] sm:$0xff] }
 0x1b1   : > { %9404 = vmatpush1.xpose.msra.mxu0 %v509_v62  ;;  %9474 = vmatpush1.xpose.msra.mxu1 %v511_v63  ;;  %v910_v62 = vld [vmem:[%s17228_s29 + $0x1208] sm:$0x3]  ;;  %v912_v63 = vld [vmem:[%s17228_s29 + $0x1218] sm:$0x3] }
 0x1b2   : > { %9541 = vmatprep.subr.mxu0 %v898_v1  ;;  %9611 = vmatprep.subr.mxu1 %v900_v2  ;;  %v2027_v1 = vrot.slane %v2013_v53, %v17254_v19  ;;  %v286_v2 = vld [vmem:[%s17222_s3 + $0x188] sm:$0xff] }
 0x1b4   : > { %v6079_v13 = vpop.f32.mrf.mxu0  ;;  %9438 = vmatmul.mubr.f32.vlgmr.msra.gmra.mxu0 %v1952_v47  ;;  %v6149_v14 = vpop.f32.mrf.mxu1  ;;  %9508 = vmatmul.mubr.f32.vlgmr.msra.gmra.mxu1 %v1959_v48  ;;  %v905_v47 = vld [vmem:[%s17228_s29 + $0x11e0] sm:$0x3]  ;;  %v907_v48 = vld [vmem:[%s17228_s29 + $0x11f0] sm:$0x3] }
 0x1b5   : > { %v6080_v15 = vadd.f32 %v6079_v13, %v6010_v0  ;;  %9542 = vmatpush1.xpose.msra.mxu0 %v897_v6  ;;  %9612 = vmatpush1.xpose.msra.mxu1 %v899_v7  ;;  %v2020_v0 = vrot.slane %v285_v46, %v17254_v19  ;;  %v528_v6 = vld [vmem:[%s17228_s29 + $0x618] sm:$0xff]  ;;  %v534_v46 = vld [vmem:[%s17228_s29 + $0x648] sm:$0xff] }
 0x1b6   : > { %v6081_v16 = vpop.f32.mrf.mxu0  ;;  %v6151_v17 = vpop.f32.mrf.mxu1  ;;  %9543 = vmatprep.subr.mxu0 %v514_v8  ;;  %9613 = vmatprep.subr.mxu1 %v516_v9  ;;  %v2029_v8 = vcombine.high %v2027_v1, %v2027_v1  ;;  %v2030_v9 = vcombine.high %v286_v2, %v286_v2 }
 0x1b7   : > { %v6150_v21 = vadd.f32 %v6149_v14, %v6080_v15  ;;  %9577 = vmatprep.mubr.f32.mxu0 %v1977_v10  ;;  %9647 = vmatprep.mubr.f32.mxu1 %v1978_v11  ;;  %v2028_v7 = vcombine.high %v2020_v0, %v2020_v0  ;;  %v525_v15 = vld [vmem:[%s17228_s29 + $0x600] sm:$0xff]  ;;  %v527_v16 = vld [vmem:[%s17228_s29 + $0x610] sm:$0xff] }
 0x1b9   : > { %9544 = vmatpush1.xpose.msra.mxu0 %v513_v18  ;;  %9614 = vmatpush1.xpose.msra.mxu1 %v515_v20  ;;  %v914_v18 = vld [vmem:[%s17228_s29 + $0x1228] sm:$0x3]  ;;  %v916_v20 = vld [vmem:[%s17228_s29 + $0x1238] sm:$0x3] }
 0x1ba   : > { %9681 = vmatprep.subr.mxu0 %v902_v22  ;;  %9751 = vmatprep.subr.mxu1 %v904_v23  ;;  %v2044_v22 = vrot.slane %v2030_v9, %v17254_v19  ;;  %v287_v23 = vld [vmem:[%s17222_s3 + $0x190] sm:$0xff] }
 0x1bc   : > { %v6219_v34 = vpop.f32.mrf.mxu0  ;;  %9578 = vmatmul.mubr.f32.vlgmr.msra.gmra.mxu0 %v1969_v3  ;;  %v6289_v35 = vpop.f32.mrf.mxu1  ;;  %9648 = vmatmul.mubr.f32.vlgmr.msra.gmra.mxu1 %v1976_v4  ;;  %v909_v3 = vld [vmem:[%s17228_s29 + $0x1200] sm:$0x3]  ;;  %v911_v4 = vld [vmem:[%s17228_s29 + $0x1210] sm:$0x3] }
 0x1bd   : > { %v6220_v36 = vadd.f32 %v6219_v34, %v6150_v21  ;;  %9682 = vmatpush1.xpose.msra.mxu0 %v901_v27  ;;  %9752 = vmatpush1.xpose.msra.mxu1 %v903_v28  ;;  %v2037_v21 = vrot.slane %v286_v2, %v17254_v19  ;;  %v532_v27 = vld [vmem:[%s17228_s29 + $0x638] sm:$0xff]  ;;  %v538_v2 = vld [vmem:[%s17228_s29 + $0x668] sm:$0xff] }
 0x1be   : > { %v6221_v37 = vpop.f32.mrf.mxu0  ;;  %v6291_v38 = vpop.f32.mrf.mxu1  ;;  %9683 = vmatprep.subr.mxu0 %v518_v29  ;;  %9753 = vmatprep.subr.mxu1 %v520_v30  ;;  %v2046_v29 = vcombine.high %v2044_v22, %v2044_v22  ;;  %v2047_v30 = vcombine.high %v287_v23, %v287_v23 }
 0x1bf   : > { %v6290_v41 = vadd.f32 %v6289_v35, %v6220_v36  ;;  %9717 = vmatprep.mubr.f32.mxu0 %v1994_v31  ;;  %9787 = vmatprep.mubr.f32.mxu1 %v1995_v32  ;;  %v2045_v28 = vcombine.high %v2037_v21, %v2037_v21  ;;  %v529_v36 = vld [vmem:[%s17228_s29 + $0x620] sm:$0xff]  ;;  %v531_v37 = vld [vmem:[%s17228_s29 + $0x630] sm:$0xff] }
 0x1c1   : > { %9684 = vmatpush1.xpose.msra.mxu0 %v517_v39  ;;  %9754 = vmatpush1.xpose.msra.mxu1 %v519_v40  ;;  %v918_v39 = vld [vmem:[%s17228_s29 + $0x1248] sm:$0x3]  ;;  %v920_v40 = vld [vmem:[%s17228_s29 + $0x1258] sm:$0x3] }
 0x1c2   : > { %9821 = vmatprep.subr.mxu0 %v906_v42  ;;  %9891 = vmatprep.subr.mxu1 %v908_v43  ;;  %v2061_v42 = vrot.slane %v2047_v30, %v17254_v19  ;;  %v288_v43 = vld [vmem:[%s17222_s3 + $0x198] sm:$0xff] }
 0x1c4   : > { %v6359_v54 = vpop.f32.mrf.mxu0  ;;  %9718 = vmatmul.mubr.f32.vlgmr.msra.gmra.mxu0 %v1986_v24  ;;  %v6429_v55 = vpop.f32.mrf.mxu1  ;;  %9788 = vmatmul.mubr.f32.vlgmr.msra.gmra.mxu1 %v1993_v25  ;;  %v913_v24 = vld [vmem:[%s17228_s29 + $0x1220] sm:$0x3]  ;;  %v915_v25 = vld [vmem:[%s17228_s29 + $0x1230] sm:$0x3] }
 0x1c5   : > { %v6360_v56 = vadd.f32 %v6359_v54, %v6290_v41  ;;  %9822 = vmatpush1.xpose.msra.mxu0 %v905_v47  ;;  %9892 = vmatpush1.xpose.msra.mxu1 %v907_v48  ;;  %v2054_v41 = vrot.slane %v287_v23, %v17254_v19  ;;  %v536_v47 = vld [vmem:[%s17228_s29 + $0x658] sm:$0xff]  ;;  %v542_v23 = vld [vmem:[%s17228_s29 + $0x688] sm:$0xff] }
 0x1c6   : > { %v6361_v57 = vpop.f32.mrf.mxu0  ;;  %v6431_v58 = vpop.f32.mrf.mxu1  ;;  %9823 = vmatprep.subr.mxu0 %v522_v49  ;;  %9893 = vmatprep.subr.mxu1 %v524_v50  ;;  %v2063_v49 = vcombine.high %v2061_v42, %v2061_v42  ;;  %v2064_v50 = vcombine.high %v288_v43, %v288_v43 }
 0x1c7   : > { %v6430_v61 = vadd.f32 %v6429_v55, %v6360_v56  ;;  %9857 = vmatprep.mubr.f32.mxu0 %v2011_v51  ;;  %9927 = vmatprep.mubr.f32.mxu1 %v2012_v52  ;;  %v2062_v48 = vcombine.high %v2054_v41, %v2054_v41  ;;  %v533_v56 = vld [vmem:[%s17228_s29 + $0x640] sm:$0xff]  ;;  %v535_v57 = vld [vmem:[%s17228_s29 + $0x650] sm:$0xff] }
 0x1c9   : > { %9824 = vmatpush1.xpose.msra.mxu0 %v521_v59  ;;  %9894 = vmatpush1.xpose.msra.mxu1 %v523_v60  ;;  %v922_v59 = vld [vmem:[%s17228_s29 + $0x1268] sm:$0x3]  ;;  %v924_v60 = vld [vmem:[%s17228_s29 + $0x1278] sm:$0x3] }
 0x1ca   : > { %9961 = vmatprep.subr.mxu0 %v910_v62  ;;  %10031 = vmatprep.subr.mxu1 %v912_v63  ;;  %v2078_v62 = vrot.slane %v2064_v50, %v17254_v19  ;;  %v289_v63 = vld [vmem:[%s17222_s3 + $0x1a0] sm:$0xff] }
 0x1cc   : > { %v6499_v10 = vpop.f32.mrf.mxu0  ;;  %9858 = vmatmul.mubr.f32.vlgmr.msra.gmra.mxu0 %v2003_v44  ;;  %v6569_v11 = vpop.f32.mrf.mxu1  ;;  %9928 = vmatmul.mubr.f32.vlgmr.msra.gmra.mxu1 %v2010_v45  ;;  %v917_v44 = vld [vmem:[%s17228_s29 + $0x1240] sm:$0x3]  ;;  %v919_v45 = vld [vmem:[%s17228_s29 + $0x1250] sm:$0x3] }
 0x1cd   : > { %v6500_v12 = vadd.f32 %v6499_v10, %v6430_v61  ;;  %9962 = vmatpush1.xpose.msra.mxu0 %v909_v3  ;;  %10032 = vmatpush1.xpose.msra.mxu1 %v911_v4  ;;  %v2071_v61 = vrot.slane %v288_v43, %v17254_v19  ;;  %v540_v3 = vld [vmem:[%s17228_s29 + $0x678] sm:$0xff]  ;;  %v546_v43 = vld [vmem:[%s17228_s29 + $0x6a8] sm:$0xff] }
 0x1ce   : > { %v6501_v13 = vpop.f32.mrf.mxu0  ;;  %v6571_v14 = vpop.f32.mrf.mxu1  ;;  %9963 = vmatprep.subr.mxu0 %v526_v5  ;;  %10033 = vmatprep.subr.mxu1 %v528_v6  ;;  %v2080_v5 = vcombine.high %v2078_v62, %v2078_v62  ;;  %v2081_v6 = vcombine.high %v289_v63, %v289_v63 }
 0x1cf   : > { %v6570_v17 = vadd.f32 %v6569_v11, %v6500_v12  ;;  %9997 = vmatprep.mubr.f32.mxu0 %v2028_v7  ;;  %10067 = vmatprep.mubr.f32.mxu1 %v2029_v8  ;;  %v2079_v4 = vcombine.high %v2071_v61, %v2071_v61  ;;  %v537_v12 = vld [vmem:[%s17228_s29 + $0x660] sm:$0xff]  ;;  %v539_v13 = vld [vmem:[%s17228_s29 + $0x670] sm:$0xff] }
 0x1d1   : > { %9964 = vmatpush1.xpose.msra.mxu0 %v525_v15  ;;  %10034 = vmatpush1.xpose.msra.mxu1 %v527_v16  ;;  %v926_v15 = vld [vmem:[%s17228_s29 + $0x1288] sm:$0x3]  ;;  %v928_v16 = vld [vmem:[%s17228_s29 + $0x1298] sm:$0x3] }
 0x1d2   : > { %10101 = vmatprep.subr.mxu0 %v914_v18  ;;  %10171 = vmatprep.subr.mxu1 %v916_v20  ;;  %v2095_v18 = vrot.slane %v2081_v6, %v17254_v19  ;;  %v290_v20 = vld [vmem:[%s17222_s3 + $0x1a8] sm:$0xff] }
 0x1d4   : > { %v6639_v31 = vpop.f32.mrf.mxu0  ;;  %9998 = vmatmul.mubr.f32.vlgmr.msra.gmra.mxu0 %v2020_v0  ;;  %v6709_v32 = vpop.f32.mrf.mxu1  ;;  %10068 = vmatmul.mubr.f32.vlgmr.msra.gmra.mxu1 %v2027_v1  ;;  %v921_v0 = vld [vmem:[%s17228_s29 + $0x1260] sm:$0x3]  ;;  %v923_v1 = vld [vmem:[%s17228_s29 + $0x1270] sm:$0x3] }
 0x1d5   : > { %v6640_v33 = vadd.f32 %v6639_v31, %v6570_v17  ;;  %10102 = vmatpush1.xpose.msra.mxu0 %v913_v24  ;;  %10172 = vmatpush1.xpose.msra.mxu1 %v915_v25  ;;  %v2088_v17 = vrot.slane %v289_v63, %v17254_v19  ;;  %v544_v24 = vld [vmem:[%s17228_s29 + $0x698] sm:$0xff]  ;;  %v550_v63 = vld [vmem:[%s17228_s29 + $0x6c8] sm:$0xff] }
 0x1d6   : > { %v6641_v34 = vpop.f32.mrf.mxu0  ;;  %v6711_v35 = vpop.f32.mrf.mxu1  ;;  %10103 = vmatprep.subr.mxu0 %v530_v26  ;;  %10173 = vmatprep.subr.mxu1 %v532_v27  ;;  %v2097_v26 = vcombine.high %v2095_v18, %v2095_v18  ;;  %v2098_v27 = vcombine.high %v290_v20, %v290_v20 }
 0x1d7   : > { %v6710_v38 = vadd.f32 %v6709_v32, %v6640_v33  ;;  %10137 = vmatprep.mubr.f32.mxu0 %v2045_v28  ;;  %10207 = vmatprep.mubr.f32.mxu1 %v2046_v29  ;;  %v2096_v25 = vcombine.high %v2088_v17, %v2088_v17  ;;  %v541_v33 = vld [vmem:[%s17228_s29 + $0x680] sm:$0xff]  ;;  %v543_v34 = vld [vmem:[%s17228_s29 + $0x690] sm:$0xff] }
 0x1d9   : > { %10104 = vmatpush1.xpose.msra.mxu0 %v529_v36  ;;  %10174 = vmatpush1.xpose.msra.mxu1 %v531_v37  ;;  %v930_v36 = vld [vmem:[%s17228_s29 + $0x12a8] sm:$0x3]  ;;  %v932_v37 = vld [vmem:[%s17228_s29 + $0x12b8] sm:$0x3] }
 0x1da   : > { %10241 = vmatprep.subr.mxu0 %v918_v39  ;;  %10311 = vmatprep.subr.mxu1 %v920_v40  ;;  %v2112_v39 = vrot.slane %v2098_v27, %v17254_v19  ;;  %v291_v40 = vld [vmem:[%s17222_s3 + $0x1b0] sm:$0xff] }
 0x1dc   : > { %v6779_v51 = vpop.f32.mrf.mxu0  ;;  %10138 = vmatmul.mubr.f32.vlgmr.msra.gmra.mxu0 %v2037_v21  ;;  %v6849_v52 = vpop.f32.mrf.mxu1  ;;  %10208 = vmatmul.mubr.f32.vlgmr.msra.gmra.mxu1 %v2044_v22  ;;  %v925_v21 = vld [vmem:[%s17228_s29 + $0x1280] sm:$0x3]  ;;  %v927_v22 = vld [vmem:[%s17228_s29 + $0x1290] sm:$0x3] }
 0x1dd   : > { %v6780_v53 = vadd.f32 %v6779_v51, %v6710_v38  ;;  %10242 = vmatpush1.xpose.msra.mxu0 %v917_v44  ;;  %10312 = vmatpush1.xpose.msra.mxu1 %v919_v45  ;;  %v2105_v38 = vrot.slane %v290_v20, %v17254_v19  ;;  %v548_v44 = vld [vmem:[%s17228_s29 + $0x6b8] sm:$0xff]  ;;  %v554_v20 = vld [vmem:[%s17228_s29 + $0x6e8] sm:$0xff] }
 0x1de   : > { %v6781_v54 = vpop.f32.mrf.mxu0  ;;  %v6851_v55 = vpop.f32.mrf.mxu1  ;;  %10243 = vmatprep.subr.mxu0 %v534_v46  ;;  %10313 = vmatprep.subr.mxu1 %v536_v47  ;;  %v2114_v46 = vcombine.high %v2112_v39, %v2112_v39  ;;  %v2115_v47 = vcombine.high %v291_v40, %v291_v40 }
 0x1df   : > { %v6850_v58 = vadd.f32 %v6849_v52, %v6780_v53  ;;  %10277 = vmatprep.mubr.f32.mxu0 %v2062_v48  ;;  %10347 = vmatprep.mubr.f32.mxu1 %v2063_v49  ;;  %v2113_v45 = vcombine.high %v2105_v38, %v2105_v38  ;;  %v545_v53 = vld [vmem:[%s17228_s29 + $0x6a0] sm:$0xff]  ;;  %v547_v54 = vld [vmem:[%s17228_s29 + $0x6b0] sm:$0xff] }
 0x1e1   : > { %10244 = vmatpush1.xpose.msra.mxu0 %v533_v56  ;;  %10314 = vmatpush1.xpose.msra.mxu1 %v535_v57  ;;  %v934_v56 = vld [vmem:[%s17228_s29 + $0x12c8] sm:$0x3]  ;;  %v936_v57 = vld [vmem:[%s17228_s29 + $0x12d8] sm:$0x3] }
 0x1e2   : > { %10381 = vmatprep.subr.mxu0 %v922_v59  ;;  %10451 = vmatprep.subr.mxu1 %v924_v60  ;;  %v2129_v59 = vrot.slane %v2115_v47, %v17254_v19  ;;  %v292_v60 = vld [vmem:[%s17222_s3 + $0x1b8] sm:$0xff] }
 0x1e4   : > { %v6919_v7 = vpop.f32.mrf.mxu0  ;;  %10278 = vmatmul.mubr.f32.vlgmr.msra.gmra.mxu0 %v2054_v41  ;;  %v6989_v8 = vpop.f32.mrf.mxu1  ;;  %10348 = vmatmul.mubr.f32.vlgmr.msra.gmra.mxu1 %v2061_v42  ;;  %v929_v41 = vld [vmem:[%s17228_s29 + $0x12a0] sm:$0x3]  ;;  %v931_v42 = vld [vmem:[%s17228_s29 + $0x12b0] sm:$0x3] }
 0x1e5   : > { %v6920_v9 = vadd.f32 %v6919_v7, %v6850_v58  ;;  %10382 = vmatpush1.xpose.msra.mxu0 %v921_v0  ;;  %10452 = vmatpush1.xpose.msra.mxu1 %v923_v1  ;;  %v2122_v58 = vrot.slane %v291_v40, %v17254_v19  ;;  %v552_v0 = vld [vmem:[%s17228_s29 + $0x6d8] sm:$0xff]  ;;  %v558_v40 = vld [vmem:[%s17228_s29 + $0x708] sm:$0xff] }
 0x1e6   : > { %v6921_v10 = vpop.f32.mrf.mxu0  ;;  %v6991_v11 = vpop.f32.mrf.mxu1  ;;  %10383 = vmatprep.subr.mxu0 %v538_v2  ;;  %10453 = vmatprep.subr.mxu1 %v540_v3  ;;  %v2131_v2 = vcombine.high %v2129_v59, %v2129_v59  ;;  %v2132_v3 = vcombine.high %v292_v60, %v292_v60 }
 0x1e7   : > { %v6990_v14 = vadd.f32 %v6989_v8, %v6920_v9  ;;  %10417 = vmatprep.mubr.f32.mxu0 %v2079_v4  ;;  %10487 = vmatprep.mubr.f32.mxu1 %v2080_v5  ;;  %v2130_v1 = vcombine.high %v2122_v58, %v2122_v58  ;;  %v549_v9 = vld [vmem:[%s17228_s29 + $0x6c0] sm:$0xff]  ;;  %v551_v10 = vld [vmem:[%s17228_s29 + $0x6d0] sm:$0xff] }
 0x1e9   : > { %10384 = vmatpush1.xpose.msra.mxu0 %v537_v12  ;;  %10454 = vmatpush1.xpose.msra.mxu1 %v539_v13  ;;  %v938_v12 = vld [vmem:[%s17228_s29 + $0x12e8] sm:$0x3]  ;;  %v940_v13 = vld [vmem:[%s17228_s29 + $0x12f8] sm:$0x3] }
 0x1ea   : > { %10521 = vmatprep.subr.mxu0 %v926_v15  ;;  %10591 = vmatprep.subr.mxu1 %v928_v16  ;;  %v2146_v15 = vrot.slane %v2132_v3, %v17254_v19  ;;  %v293_v16 = vld [vmem:[%s17222_s3 + $0x1c0] sm:$0xff] }
 0x1ec   : > { %v7059_v28 = vpop.f32.mrf.mxu0  ;;  %10418 = vmatmul.mubr.f32.vlgmr.msra.gmra.mxu0 %v2071_v61  ;;  %v7129_v29 = vpop.f32.mrf.mxu1  ;;  %10488 = vmatmul.mubr.f32.vlgmr.msra.gmra.mxu1 %v2078_v62  ;;  %v933_v61 = vld [vmem:[%s17228_s29 + $0x12c0] sm:$0x3]  ;;  %v935_v62 = vld [vmem:[%s17228_s29 + $0x12d0] sm:$0x3] }
 0x1ed   : > { %v7060_v30 = vadd.f32 %v7059_v28, %v6990_v14  ;;  %10522 = vmatpush1.xpose.msra.mxu0 %v925_v21  ;;  %10592 = vmatpush1.xpose.msra.mxu1 %v927_v22  ;;  %v2139_v14 = vrot.slane %v292_v60, %v17254_v19  ;;  %v556_v21 = vld [vmem:[%s17228_s29 + $0x6f8] sm:$0xff]  ;;  %v562_v60 = vld [vmem:[%s17228_s29 + $0x728] sm:$0xff] }
 0x1ee   : > { %v7061_v31 = vpop.f32.mrf.mxu0  ;;  %v7131_v32 = vpop.f32.mrf.mxu1  ;;  %10523 = vmatprep.subr.mxu0 %v542_v23  ;;  %10593 = vmatprep.subr.mxu1 %v544_v24  ;;  %v2148_v23 = vcombine.high %v2146_v15, %v2146_v15  ;;  %v2149_v24 = vcombine.high %v293_v16, %v293_v16 }
 0x1ef   : > { %v7130_v35 = vadd.f32 %v7129_v29, %v7060_v30  ;;  %10557 = vmatprep.mubr.f32.mxu0 %v2096_v25  ;;  %10627 = vmatprep.mubr.f32.mxu1 %v2097_v26  ;;  %v2147_v22 = vcombine.high %v2139_v14, %v2139_v14  ;;  %v553_v30 = vld [vmem:[%s17228_s29 + $0x6e0] sm:$0xff]  ;;  %v555_v31 = vld [vmem:[%s17228_s29 + $0x6f0] sm:$0xff] }
 0x1f1   : > { %10524 = vmatpush1.xpose.msra.mxu0 %v541_v33  ;;  %10594 = vmatpush1.xpose.msra.mxu1 %v543_v34  ;;  %v942_v33 = vld [vmem:[%s17228_s29 + $0x1308] sm:$0x3]  ;;  %v944_v34 = vld [vmem:[%s17228_s29 + $0x1318] sm:$0x3] }
 0x1f2   : > { %10661 = vmatprep.subr.mxu0 %v930_v36  ;;  %10731 = vmatprep.subr.mxu1 %v932_v37  ;;  %v2163_v36 = vrot.slane %v2149_v24, %v17254_v19  ;;  %v294_v37 = vld [vmem:[%s17222_s3 + $0x1c8] sm:$0xff] }
 0x1f4   : > { %v7199_v48 = vpop.f32.mrf.mxu0  ;;  %10558 = vmatmul.mubr.f32.vlgmr.msra.gmra.mxu0 %v2088_v17  ;;  %v7269_v49 = vpop.f32.mrf.mxu1  ;;  %10628 = vmatmul.mubr.f32.vlgmr.msra.gmra.mxu1 %v2095_v18  ;;  %v937_v17 = vld [vmem:[%s17228_s29 + $0x12e0] sm:$0x3]  ;;  %v939_v18 = vld [vmem:[%s17228_s29 + $0x12f0] sm:$0x3] }
 0x1f5   : > { %v7200_v50 = vadd.f32 %v7199_v48, %v7130_v35  ;;  %10662 = vmatpush1.xpose.msra.mxu0 %v929_v41  ;;  %10732 = vmatpush1.xpose.msra.mxu1 %v931_v42  ;;  %v2156_v35 = vrot.slane %v293_v16, %v17254_v19  ;;  %v560_v41 = vld [vmem:[%s17228_s29 + $0x718] sm:$0xff]  ;;  %v566_v16 = vld [vmem:[%s17228_s29 + $0x748] sm:$0xff] }
 0x1f6   : > { %v7201_v51 = vpop.f32.mrf.mxu0  ;;  %v7271_v52 = vpop.f32.mrf.mxu1  ;;  %10663 = vmatprep.subr.mxu0 %v546_v43  ;;  %10733 = vmatprep.subr.mxu1 %v548_v44  ;;  %v2165_v43 = vcombine.high %v2163_v36, %v2163_v36  ;;  %v2166_v44 = vcombine.high %v294_v37, %v294_v37 }
 0x1f7   : > { %v7270_v55 = vadd.f32 %v7269_v49, %v7200_v50  ;;  %10697 = vmatprep.mubr.f32.mxu0 %v2113_v45  ;;  %10767 = vmatprep.mubr.f32.mxu1 %v2114_v46  ;;  %v2164_v42 = vcombine.high %v2156_v35, %v2156_v35  ;;  %v557_v50 = vld [vmem:[%s17228_s29 + $0x700] sm:$0xff]  ;;  %v559_v51 = vld [vmem:[%s17228_s29 + $0x710] sm:$0xff] }
 0x1f9   : > { %10664 = vmatpush1.xpose.msra.mxu0 %v545_v53  ;;  %10734 = vmatpush1.xpose.msra.mxu1 %v547_v54  ;;  %v946_v53 = vld [vmem:[%s17228_s29 + $0x1328] sm:$0x3]  ;;  %v948_v54 = vld [vmem:[%s17228_s29 + $0x1338] sm:$0x3] }
 0x1fa   : > { %10801 = vmatprep.subr.mxu0 %v934_v56  ;;  %10871 = vmatprep.subr.mxu1 %v936_v57  ;;  %v2180_v56 = vrot.slane %v2166_v44, %v17254_v19  ;;  %v295_v57 = vld [vmem:[%s17222_s3 + $0x1d0] sm:$0xff] }
 0x1fc   : > { %v7339_v4 = vpop.f32.mrf.mxu0  ;;  %10698 = vmatmul.mubr.f32.vlgmr.msra.gmra.mxu0 %v2105_v38  ;;  %v7409_v5 = vpop.f32.mrf.mxu1  ;;  %10768 = vmatmul.mubr.f32.vlgmr.msra.gmra.mxu1 %v2112_v39  ;;  %v941_v38 = vld [vmem:[%s17228_s29 + $0x1300] sm:$0x3]  ;;  %v943_v39 = vld [vmem:[%s17228_s29 + $0x1310] sm:$0x3] }
 0x1fd   : > { %v7340_v6 = vadd.f32 %v7339_v4, %v7270_v55  ;;  %10802 = vmatpush1.xpose.msra.mxu0 %v933_v61  ;;  %10872 = vmatpush1.xpose.msra.mxu1 %v935_v62  ;;  %v2173_v55 = vrot.slane %v294_v37, %v17254_v19  ;;  %v564_v61 = vld [vmem:[%s17228_s29 + $0x738] sm:$0xff]  ;;  %v570_v37 = vld [vmem:[%s17228_s29 + $0x768] sm:$0xff] }
 0x1fe   : > { %v7341_v7 = vpop.f32.mrf.mxu0  ;;  %v7411_v8 = vpop.f32.mrf.mxu1  ;;  %10803 = vmatprep.subr.mxu0 %v550_v63  ;;  %10873 = vmatprep.subr.mxu1 %v552_v0  ;;  %v2182_v63 = vcombine.high %v2180_v56, %v2180_v56  ;;  %v2183_v0 = vcombine.high %v295_v57, %v295_v57 }
 0x1ff   : > { %v7410_v11 = vadd.f32 %v7409_v5, %v7340_v6  ;;  %10837 = vmatprep.mubr.f32.mxu0 %v2130_v1  ;;  %10907 = vmatprep.mubr.f32.mxu1 %v2131_v2  ;;  %v2181_v62 = vcombine.high %v2173_v55, %v2173_v55  ;;  %v561_v6 = vld [vmem:[%s17228_s29 + $0x720] sm:$0xff]  ;;  %v563_v7 = vld [vmem:[%s17228_s29 + $0x730] sm:$0xff] }
 0x201   : > { %10804 = vmatpush1.xpose.msra.mxu0 %v549_v9  ;;  %10874 = vmatpush1.xpose.msra.mxu1 %v551_v10  ;;  %v950_v9 = vld [vmem:[%s17228_s29 + $0x1348] sm:$0x3]  ;;  %v952_v10 = vld [vmem:[%s17228_s29 + $0x1358] sm:$0x3] }
 0x202   : > { %10941 = vmatprep.subr.mxu0 %v938_v12  ;;  %11011 = vmatprep.subr.mxu1 %v940_v13  ;;  %v2197_v12 = vrot.slane %v2183_v0, %v17254_v19  ;;  %v296_v13 = vld [vmem:[%s17222_s3 + $0x1d8] sm:$0xff] }
 0x204   : > { %v7479_v25 = vpop.f32.mrf.mxu0  ;;  %10838 = vmatmul.mubr.f32.vlgmr.msra.gmra.mxu0 %v2122_v58  ;;  %v7549_v26 = vpop.f32.mrf.mxu1  ;;  %10908 = vmatmul.mubr.f32.vlgmr.msra.gmra.mxu1 %v2129_v59  ;;  %v945_v58 = vld [vmem:[%s17228_s29 + $0x1320] sm:$0x3]  ;;  %v947_v59 = vld [vmem:[%s17228_s29 + $0x1330] sm:$0x3] }
 0x205   : > { %v7480_v27 = vadd.f32 %v7479_v25, %v7410_v11  ;;  %10942 = vmatpush1.xpose.msra.mxu0 %v937_v17  ;;  %11012 = vmatpush1.xpose.msra.mxu1 %v939_v18  ;;  %v2190_v11 = vrot.slane %v295_v57, %v17254_v19  ;;  %v568_v17 = vld [vmem:[%s17228_s29 + $0x758] sm:$0xff]  ;;  %v574_v57 = vld [vmem:[%s17228_s29 + $0x788] sm:$0xff] }
 0x206   : > { %v7481_v28 = vpop.f32.mrf.mxu0  ;;  %v7551_v29 = vpop.f32.mrf.mxu1  ;;  %10943 = vmatprep.subr.mxu0 %v554_v20  ;;  %11013 = vmatprep.subr.mxu1 %v556_v21  ;;  %v2199_v20 = vcombine.high %v2197_v12, %v2197_v12  ;;  %v2200_v21 = vcombine.high %v296_v13, %v296_v13 }
 0x207   : > { %v7550_v32 = vadd.f32 %v7549_v26, %v7480_v27  ;;  %10977 = vmatprep.mubr.f32.mxu0 %v2147_v22  ;;  %11047 = vmatprep.mubr.f32.mxu1 %v2148_v23  ;;  %v2198_v18 = vcombine.high %v2190_v11, %v2190_v11  ;;  %v565_v27 = vld [vmem:[%s17228_s29 + $0x740] sm:$0xff]  ;;  %v567_v28 = vld [vmem:[%s17228_s29 + $0x750] sm:$0xff] }
 0x209   : > { %10944 = vmatpush1.xpose.msra.mxu0 %v553_v30  ;;  %11014 = vmatpush1.xpose.msra.mxu1 %v555_v31  ;;  %v954_v30 = vld [vmem:[%s17228_s29 + $0x1368] sm:$0x3]  ;;  %v956_v31 = vld [vmem:[%s17228_s29 + $0x1378] sm:$0x3] }
 0x20a   : > { %11081 = vmatprep.subr.mxu0 %v942_v33  ;;  %11151 = vmatprep.subr.mxu1 %v944_v34  ;;  %v2214_v33 = vrot.slane %v2200_v21, %v17254_v19  ;;  %v297_v34 = vld [vmem:[%s17222_s3 + $0x1e0] sm:$0xff] }
 0x20c   : > { %v7619_v45 = vpop.f32.mrf.mxu0  ;;  %10978 = vmatmul.mubr.f32.vlgmr.msra.gmra.mxu0 %v2139_v14  ;;  %v7689_v46 = vpop.f32.mrf.mxu1  ;;  %11048 = vmatmul.mubr.f32.vlgmr.msra.gmra.mxu1 %v2146_v15  ;;  %v949_v14 = vld [vmem:[%s17228_s29 + $0x1340] sm:$0x3]  ;;  %v951_v15 = vld [vmem:[%s17228_s29 + $0x1350] sm:$0x3] }
 0x20d   : > { %v7620_v47 = vadd.f32 %v7619_v45, %v7550_v32  ;;  %11082 = vmatpush1.xpose.msra.mxu0 %v941_v38  ;;  %11152 = vmatpush1.xpose.msra.mxu1 %v943_v39  ;;  %v2207_v32 = vrot.slane %v296_v13, %v17254_v19  ;;  %v572_v38 = vld [vmem:[%s17228_s29 + $0x778] sm:$0xff]  ;;  %v578_v13 = vld [vmem:[%s17228_s29 + $0x7a8] sm:$0xff] }
 0x20e   : > { %v7621_v48 = vpop.f32.mrf.mxu0  ;;  %v7691_v49 = vpop.f32.mrf.mxu1  ;;  %11083 = vmatprep.subr.mxu0 %v558_v40  ;;  %11153 = vmatprep.subr.mxu1 %v560_v41  ;;  %v2216_v40 = vcombine.high %v2214_v33, %v2214_v33  ;;  %v2217_v41 = vcombine.high %v297_v34, %v297_v34 }
 0x20f   : > { %v7690_v52 = vadd.f32 %v7689_v46, %v7620_v47  ;;  %11117 = vmatprep.mubr.f32.mxu0 %v2164_v42  ;;  %11187 = vmatprep.mubr.f32.mxu1 %v2165_v43  ;;  %v2215_v39 = vcombine.high %v2207_v32, %v2207_v32  ;;  %v569_v47 = vld [vmem:[%s17228_s29 + $0x760] sm:$0xff]  ;;  %v571_v48 = vld [vmem:[%s17228_s29 + $0x770] sm:$0xff] }
 0x211   : > { %11084 = vmatpush1.xpose.msra.mxu0 %v557_v50  ;;  %11154 = vmatpush1.xpose.msra.mxu1 %v559_v51  ;;  %v958_v50 = vld [vmem:[%s17228_s29 + $0x1388] sm:$0x3]  ;;  %v960_v51 = vld [vmem:[%s17228_s29 + $0x1398] sm:$0x3] }
 0x212   : > { %11221 = vmatprep.subr.mxu0 %v946_v53  ;;  %11291 = vmatprep.subr.mxu1 %v948_v54  ;;  %v2231_v53 = vrot.slane %v2217_v41, %v17254_v19  ;;  %v298_v54 = vld [vmem:[%s17222_s3 + $0x1e8] sm:$0xff] }
 0x214   : > { %v7759_v1 = vpop.f32.mrf.mxu0  ;;  %11118 = vmatmul.mubr.f32.vlgmr.msra.gmra.mxu0 %v2156_v35  ;;  %v7829_v2 = vpop.f32.mrf.mxu1  ;;  %11188 = vmatmul.mubr.f32.vlgmr.msra.gmra.mxu1 %v2163_v36  ;;  %v953_v35 = vld [vmem:[%s17228_s29 + $0x1360] sm:$0x3]  ;;  %v955_v36 = vld [vmem:[%s17228_s29 + $0x1370] sm:$0x3] }
 0x215   : > { %v7760_v3 = vadd.f32 %v7759_v1, %v7690_v52  ;;  %11222 = vmatpush1.xpose.msra.mxu0 %v945_v58  ;;  %11292 = vmatpush1.xpose.msra.mxu1 %v947_v59  ;;  %v2224_v52 = vrot.slane %v297_v34, %v17254_v19  ;;  %v576_v58 = vld [vmem:[%s17228_s29 + $0x798] sm:$0xff]  ;;  %v582_v34 = vld [vmem:[%s17228_s29 + $0x7c8] sm:$0xff] }
 0x216   : > { %v7761_v4 = vpop.f32.mrf.mxu0  ;;  %v7831_v5 = vpop.f32.mrf.mxu1  ;;  %11223 = vmatprep.subr.mxu0 %v562_v60  ;;  %11293 = vmatprep.subr.mxu1 %v564_v61  ;;  %v2233_v60 = vcombine.high %v2231_v53, %v2231_v53  ;;  %v2234_v61 = vcombine.high %v298_v54, %v298_v54 }
 0x217   : > { %v7830_v8 = vadd.f32 %v7829_v2, %v7760_v3  ;;  %11257 = vmatprep.mubr.f32.mxu0 %v2181_v62  ;;  %11327 = vmatprep.mubr.f32.mxu1 %v2182_v63  ;;  %v2232_v59 = vcombine.high %v2224_v52, %v2224_v52  ;;  %v573_v3 = vld [vmem:[%s17228_s29 + $0x780] sm:$0xff]  ;;  %v575_v4 = vld [vmem:[%s17228_s29 + $0x790] sm:$0xff] }
 0x219   : > { %11224 = vmatpush1.xpose.msra.mxu0 %v561_v6  ;;  %11294 = vmatpush1.xpose.msra.mxu1 %v563_v7  ;;  %v962_v6 = vld [vmem:[%s17228_s29 + $0x13a8] sm:$0x3]  ;;  %v964_v7 = vld [vmem:[%s17228_s29 + $0x13b8] sm:$0x3] }
 0x21a   : > { %11361 = vmatprep.subr.mxu0 %v950_v9  ;;  %11431 = vmatprep.subr.mxu1 %v952_v10  ;;  %v2248_v9 = vrot.slane %v2234_v61, %v17254_v19  ;;  %v299_v10 = vld [vmem:[%s17222_s3 + $0x1f0] sm:$0xff] }
 0x21c   : > { %v7899_v22 = vpop.f32.mrf.mxu0  ;;  %11258 = vmatmul.mubr.f32.vlgmr.msra.gmra.mxu0 %v2173_v55  ;;  %v7969_v23 = vpop.f32.mrf.mxu1  ;;  %11328 = vmatmul.mubr.f32.vlgmr.msra.gmra.mxu1 %v2180_v56  ;;  %v957_v55 = vld [vmem:[%s17228_s29 + $0x1380] sm:$0x3]  ;;  %v959_v56 = vld [vmem:[%s17228_s29 + $0x1390] sm:$0x3] }
 0x21d   : > { %v7900_v24 = vadd.f32 %v7899_v22, %v7830_v8  ;;  %11362 = vmatpush1.xpose.msra.mxu0 %v949_v14  ;;  %11432 = vmatpush1.xpose.msra.mxu1 %v951_v15  ;;  %v2241_v8 = vrot.slane %v298_v54, %v17254_v19  ;;  %v580_v14 = vld [vmem:[%s17228_s29 + $0x7b8] sm:$0xff]  ;;  %v586_v54 = vld [vmem:[%s17228_s29 + $0x7e8] sm:$0xff] }
 0x21e   : > { %v7901_v25 = vpop.f32.mrf.mxu0  ;;  %v7971_v26 = vpop.f32.mrf.mxu1  ;;  %11363 = vmatprep.subr.mxu0 %v566_v16  ;;  %11433 = vmatprep.subr.mxu1 %v568_v17  ;;  %v2250_v16 = vcombine.high %v2248_v9, %v2248_v9  ;;  %v2251_v17 = vcombine.high %v299_v10, %v299_v10 }
 0x21f   : > { %v7970_v29 = vadd.f32 %v7969_v23, %v7900_v24  ;;  %11397 = vmatprep.mubr.f32.mxu0 %v2198_v18  ;;  %11467 = vmatprep.mubr.f32.mxu1 %v2199_v20  ;;  %v2249_v15 = vcombine.high %v2241_v8, %v2241_v8  ;;  %v577_v24 = vld [vmem:[%s17228_s29 + $0x7a0] sm:$0xff]  ;;  %v579_v25 = vld [vmem:[%s17228_s29 + $0x7b0] sm:$0xff] }
 0x221   : > { %11364 = vmatpush1.xpose.msra.mxu0 %v565_v27  ;;  %11434 = vmatpush1.xpose.msra.mxu1 %v567_v28  ;;  %v966_v27 = vld [vmem:[%s17228_s29 + $0x13c8] sm:$0x3]  ;;  %v968_v28 = vld [vmem:[%s17228_s29 + $0x13d8] sm:$0x3] }
 0x222   : > { %11501 = vmatprep.subr.mxu0 %v954_v30  ;;  %11571 = vmatprep.subr.mxu1 %v956_v31  ;;  %v2265_v30 = vrot.slane %v2251_v17, %v17254_v19  ;;  %v300_v31 = vld [vmem:[%s17222_s3 + $0x1f8] sm:$0xff] }
 0x224   : > { %v8039_v42 = vpop.f32.mrf.mxu0  ;;  %11398 = vmatmul.mubr.f32.vlgmr.msra.gmra.mxu0 %v2190_v11  ;;  %v8109_v43 = vpop.f32.mrf.mxu1  ;;  %11468 = vmatmul.mubr.f32.vlgmr.msra.gmra.mxu1 %v2197_v12  ;;  %v961_v11 = vld [vmem:[%s17228_s29 + $0x13a0] sm:$0x3]  ;;  %v963_v12 = vld [vmem:[%s17228_s29 + $0x13b0] sm:$0x3] }
 0x225   : > { %v8040_v44 = vadd.f32 %v8039_v42, %v7970_v29  ;;  %11502 = vmatpush1.xpose.msra.mxu0 %v953_v35  ;;  %11572 = vmatpush1.xpose.msra.mxu1 %v955_v36  ;;  %v2258_v29 = vrot.slane %v299_v10, %v17254_v19  ;;  %v584_v35 = vld [vmem:[%s17228_s29 + $0x7d8] sm:$0xff]  ;;  %v590_v10 = vld [vmem:[%s17228_s29 + $0x808] sm:$0xff] }
 0x226   : > { %v8041_v45 = vpop.f32.mrf.mxu0  ;;  %v8111_v46 = vpop.f32.mrf.mxu1  ;;  %11503 = vmatprep.subr.mxu0 %v570_v37  ;;  %11573 = vmatprep.subr.mxu1 %v572_v38  ;;  %v2267_v37 = vcombine.high %v2265_v30, %v2265_v30  ;;  %v2268_v38 = vcombine.high %v300_v31, %v300_v31 }
 0x227   : > { %v8110_v49 = vadd.f32 %v8109_v43, %v8040_v44  ;;  %11537 = vmatprep.mubr.f32.mxu0 %v2215_v39  ;;  %11607 = vmatprep.mubr.f32.mxu1 %v2216_v40  ;;  %v2266_v36 = vcombine.high %v2258_v29, %v2258_v29  ;;  %v581_v44 = vld [vmem:[%s17228_s29 + $0x7c0] sm:$0xff]  ;;  %v583_v45 = vld [vmem:[%s17228_s29 + $0x7d0] sm:$0xff] }
 0x229   : > { %11504 = vmatpush1.xpose.msra.mxu0 %v569_v47  ;;  %11574 = vmatpush1.xpose.msra.mxu1 %v571_v48  ;;  %v970_v47 = vld [vmem:[%s17228_s29 + $0x13e8] sm:$0x3]  ;;  %v972_v48 = vld [vmem:[%s17228_s29 + $0x13f8] sm:$0x3] }
 0x22a   : > { %11641 = vmatprep.subr.mxu0 %v958_v50  ;;  %11711 = vmatprep.subr.mxu1 %v960_v51  ;;  %v2282_v50 = vrot.slane %v2268_v38, %v17254_v19  ;;  %v301_v51 = vld [vmem:[%s17222_s3 + $0x200] sm:$0xff] }
 0x22c   : > { %v8179_v62 = vpop.f32.mrf.mxu0  ;;  %11538 = vmatmul.mubr.f32.vlgmr.msra.gmra.mxu0 %v2207_v32  ;;  %v8249_v63 = vpop.f32.mrf.mxu1  ;;  %11608 = vmatmul.mubr.f32.vlgmr.msra.gmra.mxu1 %v2214_v33  ;;  %v965_v32 = vld [vmem:[%s17228_s29 + $0x13c0] sm:$0x3]  ;;  %v967_v33 = vld [vmem:[%s17228_s29 + $0x13d0] sm:$0x3] }
 0x22d   : > { %v8180_v0 = vadd.f32 %v8179_v62, %v8110_v49  ;;  %11642 = vmatpush1.xpose.msra.mxu0 %v957_v55  ;;  %11712 = vmatpush1.xpose.msra.mxu1 %v959_v56  ;;  %v2275_v49 = vrot.slane %v300_v31, %v17254_v19  ;;  %v588_v55 = vld [vmem:[%s17228_s29 + $0x7f8] sm:$0xff]  ;;  %v594_v31 = vld [vmem:[%s17228_s29 + $0x828] sm:$0xff] }
 0x22e   : > { %v8181_v1 = vpop.f32.mrf.mxu0  ;;  %v8251_v2 = vpop.f32.mrf.mxu1  ;;  %11643 = vmatprep.subr.mxu0 %v574_v57  ;;  %11713 = vmatprep.subr.mxu1 %v576_v58  ;;  %v2284_v57 = vcombine.high %v2282_v50, %v2282_v50  ;;  %v2285_v58 = vcombine.high %v301_v51, %v301_v51 }
 0x22f   : > { %v8250_v5 = vadd.f32 %v8249_v63, %v8180_v0  ;;  %11677 = vmatprep.mubr.f32.mxu0 %v2232_v59  ;;  %11747 = vmatprep.mubr.f32.mxu1 %v2233_v60  ;;  %v2283_v56 = vcombine.high %v2275_v49, %v2275_v49  ;;  %v585_v0 = vld [vmem:[%s17228_s29 + $0x7e0] sm:$0xff]  ;;  %v587_v1 = vld [vmem:[%s17228_s29 + $0x7f0] sm:$0xff] }
 0x231   : > { %11644 = vmatpush1.xpose.msra.mxu0 %v573_v3  ;;  %11714 = vmatpush1.xpose.msra.mxu1 %v575_v4  ;;  %v974_v3 = vld [vmem:[%s17228_s29 + $0x1408] sm:$0x3]  ;;  %v976_v4 = vld [vmem:[%s17228_s29 + $0x1418] sm:$0x3] }
 0x232   : > { %11781 = vmatprep.subr.mxu0 %v962_v6  ;;  %11851 = vmatprep.subr.mxu1 %v964_v7  ;;  %v2299_v6 = vrot.slane %v2285_v58, %v17254_v19  ;;  %v302_v7 = vld [vmem:[%s17222_s3 + $0x208] sm:$0xff] }
 0x234   : > { %v8319_v18 = vpop.f32.mrf.mxu0  ;;  %11678 = vmatmul.mubr.f32.vlgmr.msra.gmra.mxu0 %v2224_v52  ;;  %v8389_v20 = vpop.f32.mrf.mxu1  ;;  %11748 = vmatmul.mubr.f32.vlgmr.msra.gmra.mxu1 %v2231_v53  ;;  %v969_v52 = vld [vmem:[%s17228_s29 + $0x13e0] sm:$0x3]  ;;  %v971_v53 = vld [vmem:[%s17228_s29 + $0x13f0] sm:$0x3] }
 0x235   : > { %v8320_v21 = vadd.f32 %v8319_v18, %v8250_v5  ;;  %11782 = vmatpush1.xpose.msra.mxu0 %v961_v11  ;;  %11852 = vmatpush1.xpose.msra.mxu1 %v963_v12  ;;  %v2292_v5 = vrot.slane %v301_v51, %v17254_v19  ;;  %v592_v11 = vld [vmem:[%s17228_s29 + $0x818] sm:$0xff]  ;;  %v598_v51 = vld [vmem:[%s17228_s29 + $0x848] sm:$0xff] }
 0x236   : > { %v8321_v22 = vpop.f32.mrf.mxu0  ;;  %v8391_v23 = vpop.f32.mrf.mxu1  ;;  %11783 = vmatprep.subr.mxu0 %v578_v13  ;;  %11853 = vmatprep.subr.mxu1 %v580_v14  ;;  %v2301_v13 = vcombine.high %v2299_v6, %v2299_v6  ;;  %v2302_v14 = vcombine.high %v302_v7, %v302_v7 }
 0x237   : > { %v8390_v26 = vadd.f32 %v8389_v20, %v8320_v21  ;;  %11817 = vmatprep.mubr.f32.mxu0 %v2249_v15  ;;  %11887 = vmatprep.mubr.f32.mxu1 %v2250_v16  ;;  %v2300_v12 = vcombine.high %v2292_v5, %v2292_v5  ;;  %v589_v21 = vld [vmem:[%s17228_s29 + $0x800] sm:$0xff]  ;;  %v591_v22 = vld [vmem:[%s17228_s29 + $0x810] sm:$0xff] }
 0x239   : > { %11784 = vmatpush1.xpose.msra.mxu0 %v577_v24  ;;  %11854 = vmatpush1.xpose.msra.mxu1 %v579_v25  ;;  %v978_v24 = vld [vmem:[%s17228_s29 + $0x1428] sm:$0x3]  ;;  %v980_v25 = vld [vmem:[%s17228_s29 + $0x1438] sm:$0x3] }
 0x23a   : > { %11921 = vmatprep.subr.mxu0 %v966_v27  ;;  %11991 = vmatprep.subr.mxu1 %v968_v28  ;;  %v2316_v27 = vrot.slane %v2302_v14, %v17254_v19  ;;  %v303_v28 = vld [vmem:[%s17222_s3 + $0x210] sm:$0xff] }
 0x23c   : > { %v8459_v39 = vpop.f32.mrf.mxu0  ;;  %11818 = vmatmul.mubr.f32.vlgmr.msra.gmra.mxu0 %v2241_v8  ;;  %v8529_v40 = vpop.f32.mrf.mxu1  ;;  %11888 = vmatmul.mubr.f32.vlgmr.msra.gmra.mxu1 %v2248_v9  ;;  %v973_v8 = vld [vmem:[%s17228_s29 + $0x1400] sm:$0x3]  ;;  %v975_v9 = vld [vmem:[%s17228_s29 + $0x1410] sm:$0x3] }
 0x23d   : > { %v8460_v41 = vadd.f32 %v8459_v39, %v8390_v26  ;;  %11922 = vmatpush1.xpose.msra.mxu0 %v965_v32  ;;  %11992 = vmatpush1.xpose.msra.mxu1 %v967_v33  ;;  %v2309_v26 = vrot.slane %v302_v7, %v17254_v19  ;;  %v596_v32 = vld [vmem:[%s17228_s29 + $0x838] sm:$0xff]  ;;  %v602_v7 = vld [vmem:[%s17228_s29 + $0x868] sm:$0xff] }
 0x23e   : > { %v8461_v42 = vpop.f32.mrf.mxu0  ;;  %v8531_v43 = vpop.f32.mrf.mxu1  ;;  %11923 = vmatprep.subr.mxu0 %v582_v34  ;;  %11993 = vmatprep.subr.mxu1 %v584_v35  ;;  %v2318_v34 = vcombine.high %v2316_v27, %v2316_v27  ;;  %v2319_v35 = vcombine.high %v303_v28, %v303_v28 }
 0x23f   : > { %v8530_v46 = vadd.f32 %v8529_v40, %v8460_v41  ;;  %11957 = vmatprep.mubr.f32.mxu0 %v2266_v36  ;;  %12027 = vmatprep.mubr.f32.mxu1 %v2267_v37  ;;  %v2317_v33 = vcombine.high %v2309_v26, %v2309_v26  ;;  %v593_v41 = vld [vmem:[%s17228_s29 + $0x820] sm:$0xff]  ;;  %v595_v42 = vld [vmem:[%s17228_s29 + $0x830] sm:$0xff] }
 0x241   : > { %11924 = vmatpush1.xpose.msra.mxu0 %v581_v44  ;;  %11994 = vmatpush1.xpose.msra.mxu1 %v583_v45  ;;  %v982_v44 = vld [vmem:[%s17228_s29 + $0x1448] sm:$0x3]  ;;  %v984_v45 = vld [vmem:[%s17228_s29 + $0x1458] sm:$0x3] }
 0x242   : > { %12061 = vmatprep.subr.mxu0 %v970_v47  ;;  %12131 = vmatprep.subr.mxu1 %v972_v48  ;;  %v2333_v47 = vrot.slane %v2319_v35, %v17254_v19  ;;  %v304_v48 = vld [vmem:[%s17222_s3 + $0x218] sm:$0xff] }
 0x244   : > { %v8599_v59 = vpop.f32.mrf.mxu0  ;;  %11958 = vmatmul.mubr.f32.vlgmr.msra.gmra.mxu0 %v2258_v29  ;;  %v8669_v60 = vpop.f32.mrf.mxu1  ;;  %12028 = vmatmul.mubr.f32.vlgmr.msra.gmra.mxu1 %v2265_v30  ;;  %v977_v29 = vld [vmem:[%s17228_s29 + $0x1420] sm:$0x3]  ;;  %v979_v30 = vld [vmem:[%s17228_s29 + $0x1430] sm:$0x3] }
 0x245   : > { %v8600_v61 = vadd.f32 %v8599_v59, %v8530_v46  ;;  %12062 = vmatpush1.xpose.msra.mxu0 %v969_v52  ;;  %12132 = vmatpush1.xpose.msra.mxu1 %v971_v53  ;;  %v2326_v46 = vrot.slane %v303_v28, %v17254_v19  ;;  %v600_v52 = vld [vmem:[%s17228_s29 + $0x858] sm:$0xff]  ;;  %v606_v28 = vld [vmem:[%s17228_s29 + $0x888] sm:$0xff] }
 0x246   : > { %v8601_v62 = vpop.f32.mrf.mxu0  ;;  %v8671_v63 = vpop.f32.mrf.mxu1  ;;  %12063 = vmatprep.subr.mxu0 %v586_v54  ;;  %12133 = vmatprep.subr.mxu1 %v588_v55  ;;  %v2335_v54 = vcombine.high %v2333_v47, %v2333_v47  ;;  %v2336_v55 = vcombine.high %v304_v48, %v304_v48 }
 0x247   : > { %v8670_v2 = vadd.f32 %v8669_v60, %v8600_v61  ;;  %12097 = vmatprep.mubr.f32.mxu0 %v2283_v56  ;;  %12167 = vmatprep.mubr.f32.mxu1 %v2284_v57  ;;  %v2334_v53 = vcombine.high %v2326_v46, %v2326_v46  ;;  %v597_v61 = vld [vmem:[%s17228_s29 + $0x840] sm:$0xff]  ;;  %v599_v62 = vld [vmem:[%s17228_s29 + $0x850] sm:$0xff] }
 0x249   : > { %12064 = vmatpush1.xpose.msra.mxu0 %v585_v0  ;;  %12134 = vmatpush1.xpose.msra.mxu1 %v587_v1  ;;  %v986_v0 = vld [vmem:[%s17228_s29 + $0x1468] sm:$0x3]  ;;  %v988_v1 = vld [vmem:[%s17228_s29 + $0x1478] sm:$0x3] }
 0x24a   : > { %12201 = vmatprep.subr.mxu0 %v974_v3  ;;  %12271 = vmatprep.subr.mxu1 %v976_v4  ;;  %v2350_v3 = vrot.slane %v2336_v55, %v17254_v19  ;;  %v305_v4 = vld [vmem:[%s17222_s3 + $0x220] sm:$0xff] }
 0x24c   : > { %v8739_v15 = vpop.f32.mrf.mxu0  ;;  %12098 = vmatmul.mubr.f32.vlgmr.msra.gmra.mxu0 %v2275_v49  ;;  %v8809_v16 = vpop.f32.mrf.mxu1  ;;  %12168 = vmatmul.mubr.f32.vlgmr.msra.gmra.mxu1 %v2282_v50  ;;  %v981_v49 = vld [vmem:[%s17228_s29 + $0x1440] sm:$0x3]  ;;  %v983_v50 = vld [vmem:[%s17228_s29 + $0x1450] sm:$0x3] }
 0x24d   : > { %v8740_v17 = vadd.f32 %v8739_v15, %v8670_v2  ;;  %12202 = vmatpush1.xpose.msra.mxu0 %v973_v8  ;;  %12272 = vmatpush1.xpose.msra.mxu1 %v975_v9  ;;  %v2343_v2 = vrot.slane %v304_v48, %v17254_v19  ;;  %v604_v8 = vld [vmem:[%s17228_s29 + $0x878] sm:$0xff]  ;;  %v610_v48 = vld [vmem:[%s17228_s29 + $0x8a8] sm:$0xff] }
 0x24e   : > { %v8741_v18 = vpop.f32.mrf.mxu0  ;;  %v8811_v20 = vpop.f32.mrf.mxu1  ;;  %12203 = vmatprep.subr.mxu0 %v590_v10  ;;  %12273 = vmatprep.subr.mxu1 %v592_v11  ;;  %v2352_v10 = vcombine.high %v2350_v3, %v2350_v3  ;;  %v2353_v11 = vcombine.high %v305_v4, %v305_v4 }
 0x24f   : > { %v8810_v23 = vadd.f32 %v8809_v16, %v8740_v17  ;;  %12237 = vmatprep.mubr.f32.mxu0 %v2300_v12  ;;  %12307 = vmatprep.mubr.f32.mxu1 %v2301_v13  ;;  %v2351_v9 = vcombine.high %v2343_v2, %v2343_v2  ;;  %v601_v17 = vld [vmem:[%s17228_s29 + $0x860] sm:$0xff]  ;;  %v603_v18 = vld [vmem:[%s17228_s29 + $0x870] sm:$0xff] }
 0x251   : > { %12204 = vmatpush1.xpose.msra.mxu0 %v589_v21  ;;  %12274 = vmatpush1.xpose.msra.mxu1 %v591_v22  ;;  %v990_v21 = vld [vmem:[%s17228_s29 + $0x1488] sm:$0x3]  ;;  %v992_v22 = vld [vmem:[%s17228_s29 + $0x1498] sm:$0x3] }
 0x252   : > { %12341 = vmatprep.subr.mxu0 %v978_v24  ;;  %12411 = vmatprep.subr.mxu1 %v980_v25  ;;  %v2367_v24 = vrot.slane %v2353_v11, %v17254_v19  ;;  %v306_v25 = vld [vmem:[%s17222_s3 + $0x228] sm:$0xff] }
 0x254   : > { %v8879_v36 = vpop.f32.mrf.mxu0  ;;  %12238 = vmatmul.mubr.f32.vlgmr.msra.gmra.mxu0 %v2292_v5  ;;  %v8949_v37 = vpop.f32.mrf.mxu1  ;;  %12308 = vmatmul.mubr.f32.vlgmr.msra.gmra.mxu1 %v2299_v6  ;;  %v985_v5 = vld [vmem:[%s17228_s29 + $0x1460] sm:$0x3]  ;;  %v987_v6 = vld [vmem:[%s17228_s29 + $0x1470] sm:$0x3] }
 0x255   : > { %v8880_v38 = vadd.f32 %v8879_v36, %v8810_v23  ;;  %12342 = vmatpush1.xpose.msra.mxu0 %v977_v29  ;;  %12412 = vmatpush1.xpose.msra.mxu1 %v979_v30  ;;  %v2360_v23 = vrot.slane %v305_v4, %v17254_v19  ;;  %v608_v29 = vld [vmem:[%s17228_s29 + $0x898] sm:$0xff]  ;;  %v614_v4 = vld [vmem:[%s17228_s29 + $0x8c8] sm:$0xff] }
 0x256   : > { %v8881_v39 = vpop.f32.mrf.mxu0  ;;  %v8951_v40 = vpop.f32.mrf.mxu1  ;;  %12343 = vmatprep.subr.mxu0 %v594_v31  ;;  %12413 = vmatprep.subr.mxu1 %v596_v32  ;;  %v2369_v31 = vcombine.high %v2367_v24, %v2367_v24  ;;  %v2370_v32 = vcombine.high %v306_v25, %v306_v25 }
 0x257   : > { %v8950_v43 = vadd.f32 %v8949_v37, %v8880_v38  ;;  %12377 = vmatprep.mubr.f32.mxu0 %v2317_v33  ;;  %12447 = vmatprep.mubr.f32.mxu1 %v2318_v34  ;;  %v2368_v30 = vcombine.high %v2360_v23, %v2360_v23  ;;  %v605_v38 = vld [vmem:[%s17228_s29 + $0x880] sm:$0xff]  ;;  %v607_v39 = vld [vmem:[%s17228_s29 + $0x890] sm:$0xff] }
 0x259   : > { %12344 = vmatpush1.xpose.msra.mxu0 %v593_v41  ;;  %12414 = vmatpush1.xpose.msra.mxu1 %v595_v42  ;;  %v994_v41 = vld [vmem:[%s17228_s29 + $0x14a8] sm:$0x3]  ;;  %v996_v42 = vld [vmem:[%s17228_s29 + $0x14b8] sm:$0x3] }
 0x25a   : > { %12481 = vmatprep.subr.mxu0 %v982_v44  ;;  %12551 = vmatprep.subr.mxu1 %v984_v45  ;;  %v2384_v44 = vrot.slane %v2370_v32, %v17254_v19  ;;  %v307_v45 = vld [vmem:[%s17222_s3 + $0x230] sm:$0xff] }
 0x25c   : > { %v9019_v56 = vpop.f32.mrf.mxu0  ;;  %12378 = vmatmul.mubr.f32.vlgmr.msra.gmra.mxu0 %v2309_v26  ;;  %v9089_v57 = vpop.f32.mrf.mxu1  ;;  %12448 = vmatmul.mubr.f32.vlgmr.msra.gmra.mxu1 %v2316_v27  ;;  %v989_v26 = vld [vmem:[%s17228_s29 + $0x1480] sm:$0x3]  ;;  %v991_v27 = vld [vmem:[%s17228_s29 + $0x1490] sm:$0x3] }
 0x25d   : > { %v9020_v58 = vadd.f32 %v9019_v56, %v8950_v43  ;;  %12482 = vmatpush1.xpose.msra.mxu0 %v981_v49  ;;  %12552 = vmatpush1.xpose.msra.mxu1 %v983_v50  ;;  %v2377_v43 = vrot.slane %v306_v25, %v17254_v19  ;;  %v612_v49 = vld [vmem:[%s17228_s29 + $0x8b8] sm:$0xff]  ;;  %v618_v25 = vld [vmem:[%s17228_s29 + $0x8e8] sm:$0xff] }
 0x25e   : > { %v9021_v59 = vpop.f32.mrf.mxu0  ;;  %v9091_v60 = vpop.f32.mrf.mxu1  ;;  %12483 = vmatprep.subr.mxu0 %v598_v51  ;;  %12553 = vmatprep.subr.mxu1 %v600_v52  ;;  %v2386_v51 = vcombine.high %v2384_v44, %v2384_v44  ;;  %v2387_v52 = vcombine.high %v307_v45, %v307_v45 }
 0x25f   : > { %v9090_v63 = vadd.f32 %v9089_v57, %v9020_v58  ;;  %12517 = vmatprep.mubr.f32.mxu0 %v2334_v53  ;;  %12587 = vmatprep.mubr.f32.mxu1 %v2335_v54  ;;  %v2385_v50 = vcombine.high %v2377_v43, %v2377_v43  ;;  %v609_v58 = vld [vmem:[%s17228_s29 + $0x8a0] sm:$0xff]  ;;  %v611_v59 = vld [vmem:[%s17228_s29 + $0x8b0] sm:$0xff] }
 0x261   : > { %12484 = vmatpush1.xpose.msra.mxu0 %v597_v61  ;;  %12554 = vmatpush1.xpose.msra.mxu1 %v599_v62  ;;  %v998_v61 = vld [vmem:[%s17228_s29 + $0x14c8] sm:$0x3]  ;;  %v1000_v62 = vld [vmem:[%s17228_s29 + $0x14d8] sm:$0x3] }
 0x262   : > { %12621 = vmatprep.subr.mxu0 %v986_v0  ;;  %12691 = vmatprep.subr.mxu1 %v988_v1  ;;  %v2401_v0 = vrot.slane %v2387_v52, %v17254_v19  ;;  %v308_v1 = vld [vmem:[%s17222_s3 + $0x238] sm:$0xff] }
 0x264   : > { %v9159_v12 = vpop.f32.mrf.mxu0  ;;  %12518 = vmatmul.mubr.f32.vlgmr.msra.gmra.mxu0 %v2326_v46  ;;  %v9229_v13 = vpop.f32.mrf.mxu1  ;;  %12588 = vmatmul.mubr.f32.vlgmr.msra.gmra.mxu1 %v2333_v47  ;;  %v993_v46 = vld [vmem:[%s17228_s29 + $0x14a0] sm:$0x3]  ;;  %v995_v47 = vld [vmem:[%s17228_s29 + $0x14b0] sm:$0x3] }
 0x265   : > { %v9160_v14 = vadd.f32 %v9159_v12, %v9090_v63  ;;  %12622 = vmatpush1.xpose.msra.mxu0 %v985_v5  ;;  %12692 = vmatpush1.xpose.msra.mxu1 %v987_v6  ;;  %v2394_v63 = vrot.slane %v307_v45, %v17254_v19  ;;  %v616_v5 = vld [vmem:[%s17228_s29 + $0x8d8] sm:$0xff]  ;;  %v622_v45 = vld [vmem:[%s17228_s29 + $0x908] sm:$0xff] }
 0x266   : > { %v9161_v15 = vpop.f32.mrf.mxu0  ;;  %v9231_v16 = vpop.f32.mrf.mxu1  ;;  %12623 = vmatprep.subr.mxu0 %v602_v7  ;;  %12693 = vmatprep.subr.mxu1 %v604_v8  ;;  %v2403_v7 = vcombine.high %v2401_v0, %v2401_v0  ;;  %v2404_v8 = vcombine.high %v308_v1, %v308_v1 }
 0x267   : > { %v9230_v20 = vadd.f32 %v9229_v13, %v9160_v14  ;;  %12657 = vmatprep.mubr.f32.mxu0 %v2351_v9  ;;  %12727 = vmatprep.mubr.f32.mxu1 %v2352_v10  ;;  %v2402_v6 = vcombine.high %v2394_v63, %v2394_v63  ;;  %v613_v14 = vld [vmem:[%s17228_s29 + $0x8c0] sm:$0xff]  ;;  %v615_v15 = vld [vmem:[%s17228_s29 + $0x8d0] sm:$0xff] }
 0x269   : > { %12624 = vmatpush1.xpose.msra.mxu0 %v601_v17  ;;  %12694 = vmatpush1.xpose.msra.mxu1 %v603_v18  ;;  %v1002_v17 = vld [vmem:[%s17228_s29 + $0x14e8] sm:$0x3]  ;;  %v1004_v18 = vld [vmem:[%s17228_s29 + $0x14f8] sm:$0x3] }
 0x26a   : > { %12761 = vmatprep.subr.mxu0 %v990_v21  ;;  %12831 = vmatprep.subr.mxu1 %v992_v22  ;;  %v2418_v21 = vrot.slane %v2404_v8, %v17254_v19  ;;  %v309_v22 = vld [vmem:[%s17222_s3 + $0x240] sm:$0xff] }
 0x26c   : > { %v9299_v33 = vpop.f32.mrf.mxu0  ;;  %12658 = vmatmul.mubr.f32.vlgmr.msra.gmra.mxu0 %v2343_v2  ;;  %v9369_v34 = vpop.f32.mrf.mxu1  ;;  %12728 = vmatmul.mubr.f32.vlgmr.msra.gmra.mxu1 %v2350_v3  ;;  %v997_v2 = vld [vmem:[%s17228_s29 + $0x14c0] sm:$0x3]  ;;  %v999_v3 = vld [vmem:[%s17228_s29 + $0x14d0] sm:$0x3] }
 0x26d   : > { %v9300_v35 = vadd.f32 %v9299_v33, %v9230_v20  ;;  %12762 = vmatpush1.xpose.msra.mxu0 %v989_v26  ;;  %12832 = vmatpush1.xpose.msra.mxu1 %v991_v27  ;;  %v2411_v20 = vrot.slane %v308_v1, %v17254_v19  ;;  %v620_v26 = vld [vmem:[%s17228_s29 + $0x8f8] sm:$0xff]  ;;  %v626_v1 = vld [vmem:[%s17228_s29 + $0x928] sm:$0xff] }
 0x26e   : > { %v9301_v36 = vpop.f32.mrf.mxu0  ;;  %v9371_v37 = vpop.f32.mrf.mxu1  ;;  %12763 = vmatprep.subr.mxu0 %v606_v28  ;;  %12833 = vmatprep.subr.mxu1 %v608_v29  ;;  %v2420_v28 = vcombine.high %v2418_v21, %v2418_v21  ;;  %v2421_v29 = vcombine.high %v309_v22, %v309_v22 }
 0x26f   : > { %v9370_v40 = vadd.f32 %v9369_v34, %v9300_v35  ;;  %12797 = vmatprep.mubr.f32.mxu0 %v2368_v30  ;;  %12867 = vmatprep.mubr.f32.mxu1 %v2369_v31  ;;  %v2419_v27 = vcombine.high %v2411_v20, %v2411_v20  ;;  %v617_v35 = vld [vmem:[%s17228_s29 + $0x8e0] sm:$0xff]  ;;  %v619_v36 = vld [vmem:[%s17228_s29 + $0x8f0] sm:$0xff] }
 0x271   : > { %12764 = vmatpush1.xpose.msra.mxu0 %v605_v38  ;;  %12834 = vmatpush1.xpose.msra.mxu1 %v607_v39  ;;  %v1006_v38 = vld [vmem:[%s17228_s29 + $0x1508] sm:$0x3]  ;;  %v1008_v39 = vld [vmem:[%s17228_s29 + $0x1518] sm:$0x3] }
 0x272   : > { %12901 = vmatprep.subr.mxu0 %v994_v41  ;;  %12971 = vmatprep.subr.mxu1 %v996_v42  ;;  %v2435_v41 = vrot.slane %v2421_v29, %v17254_v19  ;;  %v310_v42 = vld [vmem:[%s17222_s3 + $0x248] sm:$0xff] }
 0x274   : > { %v9439_v53 = vpop.f32.mrf.mxu0  ;;  %12798 = vmatmul.mubr.f32.vlgmr.msra.gmra.mxu0 %v2360_v23  ;;  %v9509_v54 = vpop.f32.mrf.mxu1  ;;  %12868 = vmatmul.mubr.f32.vlgmr.msra.gmra.mxu1 %v2367_v24  ;;  %v1001_v23 = vld [vmem:[%s17228_s29 + $0x14e0] sm:$0x3]  ;;  %v1003_v24 = vld [vmem:[%s17228_s29 + $0x14f0] sm:$0x3] }
 0x275   : > { %v9440_v55 = vadd.f32 %v9439_v53, %v9370_v40  ;;  %12902 = vmatpush1.xpose.msra.mxu0 %v993_v46  ;;  %12972 = vmatpush1.xpose.msra.mxu1 %v995_v47  ;;  %v2428_v40 = vrot.slane %v309_v22, %v17254_v19  ;;  %v624_v46 = vld [vmem:[%s17228_s29 + $0x918] sm:$0xff]  ;;  %v630_v22 = vld [vmem:[%s17228_s29 + $0x948] sm:$0xff] }
 0x276   : > { %v9441_v56 = vpop.f32.mrf.mxu0  ;;  %v9511_v57 = vpop.f32.mrf.mxu1  ;;  %12903 = vmatprep.subr.mxu0 %v610_v48  ;;  %12973 = vmatprep.subr.mxu1 %v612_v49  ;;  %v2437_v48 = vcombine.high %v2435_v41, %v2435_v41  ;;  %v2438_v49 = vcombine.high %v310_v42, %v310_v42 }
 0x277   : > { %v9510_v60 = vadd.f32 %v9509_v54, %v9440_v55  ;;  %12937 = vmatprep.mubr.f32.mxu0 %v2385_v50  ;;  %13007 = vmatprep.mubr.f32.mxu1 %v2386_v51  ;;  %v2436_v47 = vcombine.high %v2428_v40, %v2428_v40  ;;  %v621_v55 = vld [vmem:[%s17228_s29 + $0x900] sm:$0xff]  ;;  %v623_v56 = vld [vmem:[%s17228_s29 + $0x910] sm:$0xff] }
 0x279   : > { %12904 = vmatpush1.xpose.msra.mxu0 %v609_v58  ;;  %12974 = vmatpush1.xpose.msra.mxu1 %v611_v59  ;;  %v1010_v58 = vld [vmem:[%s17228_s29 + $0x1528] sm:$0x3]  ;;  %v1012_v59 = vld [vmem:[%s17228_s29 + $0x1538] sm:$0x3] }
 0x27a   : > { %13041 = vmatprep.subr.mxu0 %v998_v61  ;;  %13111 = vmatprep.subr.mxu1 %v1000_v62  ;;  %v2452_v61 = vrot.slane %v2438_v49, %v17254_v19  ;;  %v311_v62 = vld [vmem:[%s17222_s3 + $0x250] sm:$0xff] }
 0x27c   : > { %v9579_v9 = vpop.f32.mrf.mxu0  ;;  %12938 = vmatmul.mubr.f32.vlgmr.msra.gmra.mxu0 %v2377_v43  ;;  %v9649_v10 = vpop.f32.mrf.mxu1  ;;  %13008 = vmatmul.mubr.f32.vlgmr.msra.gmra.mxu1 %v2384_v44  ;;  %v1005_v43 = vld [vmem:[%s17228_s29 + $0x1500] sm:$0x3]  ;;  %v1007_v44 = vld [vmem:[%s17228_s29 + $0x1510] sm:$0x3] }
 0x27d   : > { %v9580_v11 = vadd.f32 %v9579_v9, %v9510_v60  ;;  %13042 = vmatpush1.xpose.msra.mxu0 %v997_v2  ;;  %13112 = vmatpush1.xpose.msra.mxu1 %v999_v3  ;;  %v2445_v60 = vrot.slane %v310_v42, %v17254_v19  ;;  %v628_v2 = vld [vmem:[%s17228_s29 + $0x938] sm:$0xff]  ;;  %v634_v42 = vld [vmem:[%s17228_s29 + $0x968] sm:$0xff] }
 0x27e   : > { %v9581_v12 = vpop.f32.mrf.mxu0  ;;  %v9651_v13 = vpop.f32.mrf.mxu1  ;;  %13043 = vmatprep.subr.mxu0 %v614_v4  ;;  %13113 = vmatprep.subr.mxu1 %v616_v5  ;;  %v2454_v4 = vcombine.high %v2452_v61, %v2452_v61  ;;  %v2455_v5 = vcombine.high %v311_v62, %v311_v62 }
 0x27f   : > { %v9650_v16 = vadd.f32 %v9649_v10, %v9580_v11  ;;  %13077 = vmatprep.mubr.f32.mxu0 %v2402_v6  ;;  %13147 = vmatprep.mubr.f32.mxu1 %v2403_v7  ;;  %v2453_v3 = vcombine.high %v2445_v60, %v2445_v60  ;;  %v625_v11 = vld [vmem:[%s17228_s29 + $0x920] sm:$0xff]  ;;  %v627_v12 = vld [vmem:[%s17228_s29 + $0x930] sm:$0xff] }
 0x281   : > { %13044 = vmatpush1.xpose.msra.mxu0 %v613_v14  ;;  %13114 = vmatpush1.xpose.msra.mxu1 %v615_v15  ;;  %v1014_v14 = vld [vmem:[%s17228_s29 + $0x1548] sm:$0x3]  ;;  %v1016_v15 = vld [vmem:[%s17228_s29 + $0x1558] sm:$0x3] }
 0x282   : > { %13181 = vmatprep.subr.mxu0 %v1002_v17  ;;  %13251 = vmatprep.subr.mxu1 %v1004_v18  ;;  %v2469_v17 = vrot.slane %v2455_v5, %v17254_v19  ;;  %v312_v18 = vld [vmem:[%s17222_s3 + $0x258] sm:$0xff] }
 0x284   : > { %v9719_v30 = vpop.f32.mrf.mxu0  ;;  %13078 = vmatmul.mubr.f32.vlgmr.msra.gmra.mxu0 %v2394_v63  ;;  %v9789_v31 = vpop.f32.mrf.mxu1  ;;  %13148 = vmatmul.mubr.f32.vlgmr.msra.gmra.mxu1 %v2401_v0  ;;  %v1009_v63 = vld [vmem:[%s17228_s29 + $0x1520] sm:$0x3]  ;;  %v1011_v0 = vld [vmem:[%s17228_s29 + $0x1530] sm:$0x3] }
 0x285   : > { %v9720_v32 = vadd.f32 %v9719_v30, %v9650_v16  ;;  %13182 = vmatpush1.xpose.msra.mxu0 %v1001_v23  ;;  %13252 = vmatpush1.xpose.msra.mxu1 %v1003_v24  ;;  %v2462_v16 = vrot.slane %v311_v62, %v17254_v19  ;;  %v632_v23 = vld [vmem:[%s17228_s29 + $0x958] sm:$0xff]  ;;  %v638_v62 = vld [vmem:[%s17228_s29 + $0x988] sm:$0xff] }
 0x286   : > { %v9721_v33 = vpop.f32.mrf.mxu0  ;;  %v9791_v34 = vpop.f32.mrf.mxu1  ;;  %13183 = vmatprep.subr.mxu0 %v618_v25  ;;  %13253 = vmatprep.subr.mxu1 %v620_v26  ;;  %v2471_v25 = vcombine.high %v2469_v17, %v2469_v17  ;;  %v2472_v26 = vcombine.high %v312_v18, %v312_v18 }
 0x287   : > { %v9790_v37 = vadd.f32 %v9789_v31, %v9720_v32  ;;  %13217 = vmatprep.mubr.f32.mxu0 %v2419_v27  ;;  %13287 = vmatprep.mubr.f32.mxu1 %v2420_v28  ;;  %v2470_v24 = vcombine.high %v2462_v16, %v2462_v16  ;;  %v629_v32 = vld [vmem:[%s17228_s29 + $0x940] sm:$0xff]  ;;  %v631_v33 = vld [vmem:[%s17228_s29 + $0x950] sm:$0xff] }
 0x289   : > { %13184 = vmatpush1.xpose.msra.mxu0 %v617_v35  ;;  %13254 = vmatpush1.xpose.msra.mxu1 %v619_v36  ;;  %v1018_v35 = vld [vmem:[%s17228_s29 + $0x1568] sm:$0x3]  ;;  %v1020_v36 = vld [vmem:[%s17228_s29 + $0x1578] sm:$0x3] }
 0x28a   : > { %13321 = vmatprep.subr.mxu0 %v1006_v38  ;;  %13391 = vmatprep.subr.mxu1 %v1008_v39  ;;  %v2486_v38 = vrot.slane %v2472_v26, %v17254_v19  ;;  %v313_v39 = vld [vmem:[%s17222_s3 + $0x260] sm:$0xff] }
 0x28c   : > { %v9859_v50 = vpop.f32.mrf.mxu0  ;;  %13218 = vmatmul.mubr.f32.vlgmr.msra.gmra.mxu0 %v2411_v20  ;;  %v9929_v51 = vpop.f32.mrf.mxu1  ;;  %13288 = vmatmul.mubr.f32.vlgmr.msra.gmra.mxu1 %v2418_v21  ;;  %v1013_v20 = vld [vmem:[%s17228_s29 + $0x1540] sm:$0x3]  ;;  %v1015_v21 = vld [vmem:[%s17228_s29 + $0x1550] sm:$0x3] }
 0x28d   : > { %v9860_v52 = vadd.f32 %v9859_v50, %v9790_v37  ;;  %13322 = vmatpush1.xpose.msra.mxu0 %v1005_v43  ;;  %13392 = vmatpush1.xpose.msra.mxu1 %v1007_v44  ;;  %v2479_v37 = vrot.slane %v312_v18, %v17254_v19  ;;  %v636_v43 = vld [vmem:[%s17228_s29 + $0x978] sm:$0xff]  ;;  %v642_v18 = vld [vmem:[%s17228_s29 + $0x9a8] sm:$0xff] }
 0x28e   : > { %v9861_v53 = vpop.f32.mrf.mxu0  ;;  %v9931_v54 = vpop.f32.mrf.mxu1  ;;  %13323 = vmatprep.subr.mxu0 %v622_v45  ;;  %13393 = vmatprep.subr.mxu1 %v624_v46  ;;  %v2488_v45 = vcombine.high %v2486_v38, %v2486_v38  ;;  %v2489_v46 = vcombine.high %v313_v39, %v313_v39 }
 0x28f   : > { %v9930_v57 = vadd.f32 %v9929_v51, %v9860_v52  ;;  %13357 = vmatprep.mubr.f32.mxu0 %v2436_v47  ;;  %13427 = vmatprep.mubr.f32.mxu1 %v2437_v48  ;;  %v2487_v44 = vcombine.high %v2479_v37, %v2479_v37  ;;  %v633_v52 = vld [vmem:[%s17228_s29 + $0x960] sm:$0xff]  ;;  %v635_v53 = vld [vmem:[%s17228_s29 + $0x970] sm:$0xff] }
 0x291   : > { %13324 = vmatpush1.xpose.msra.mxu0 %v621_v55  ;;  %13394 = vmatpush1.xpose.msra.mxu1 %v623_v56  ;;  %v1022_v55 = vld [vmem:[%s17228_s29 + $0x1588] sm:$0x3]  ;;  %v1024_v56 = vld [vmem:[%s17228_s29 + $0x1598] sm:$0x3] }
 0x292   : > { %13461 = vmatprep.subr.mxu0 %v1010_v58  ;;  %13531 = vmatprep.subr.mxu1 %v1012_v59  ;;  %v2503_v58 = vrot.slane %v2489_v46, %v17254_v19  ;;  %v314_v59 = vld [vmem:[%s17222_s3 + $0x268] sm:$0xff] }
 0x294   : > { %v9999_v6 = vpop.f32.mrf.mxu0  ;;  %13358 = vmatmul.mubr.f32.vlgmr.msra.gmra.mxu0 %v2428_v40  ;;  %v10069_v7 = vpop.f32.mrf.mxu1  ;;  %13428 = vmatmul.mubr.f32.vlgmr.msra.gmra.mxu1 %v2435_v41  ;;  %v1017_v40 = vld [vmem:[%s17228_s29 + $0x1560] sm:$0x3]  ;;  %v1019_v41 = vld [vmem:[%s17228_s29 + $0x1570] sm:$0x3] }
 0x295   : > { %v10000_v8 = vadd.f32 %v9999_v6, %v9930_v57  ;;  %13462 = vmatpush1.xpose.msra.mxu0 %v1009_v63  ;;  %13532 = vmatpush1.xpose.msra.mxu1 %v1011_v0  ;;  %v2496_v57 = vrot.slane %v313_v39, %v17254_v19  ;;  %v640_v63 = vld [vmem:[%s17228_s29 + $0x998] sm:$0xff]  ;;  %v646_v39 = vld [vmem:[%s17228_s29 + $0x9c8] sm:$0xff] }
 0x296   : > { %v10001_v9 = vpop.f32.mrf.mxu0  ;;  %v10071_v10 = vpop.f32.mrf.mxu1  ;;  %13463 = vmatprep.subr.mxu0 %v626_v1  ;;  %13533 = vmatprep.subr.mxu1 %v628_v2  ;;  %v2505_v1 = vcombine.high %v2503_v58, %v2503_v58  ;;  %v2506_v2 = vcombine.high %v314_v59, %v314_v59 }
 0x297   : > { %v10070_v13 = vadd.f32 %v10069_v7, %v10000_v8  ;;  %13497 = vmatprep.mubr.f32.mxu0 %v2453_v3  ;;  %13567 = vmatprep.mubr.f32.mxu1 %v2454_v4  ;;  %v2504_v0 = vcombine.high %v2496_v57, %v2496_v57  ;;  %v637_v8 = vld [vmem:[%s17228_s29 + $0x980] sm:$0xff]  ;;  %v639_v9 = vld [vmem:[%s17228_s29 + $0x990] sm:$0xff] }
 0x299   : > { %13464 = vmatpush1.xpose.msra.mxu0 %v625_v11  ;;  %13534 = vmatpush1.xpose.msra.mxu1 %v627_v12  ;;  %v1026_v11 = vld [vmem:[%s17228_s29 + $0x15a8] sm:$0x3]  ;;  %v1028_v12 = vld [vmem:[%s17228_s29 + $0x15b8] sm:$0x3] }
 0x29a   : > { %13601 = vmatprep.subr.mxu0 %v1014_v14  ;;  %13671 = vmatprep.subr.mxu1 %v1016_v15  ;;  %v2520_v14 = vrot.slane %v2506_v2, %v17254_v19  ;;  %v315_v15 = vld [vmem:[%s17222_s3 + $0x270] sm:$0xff] }
 0x29c   : > { %v10139_v27 = vpop.f32.mrf.mxu0  ;;  %13498 = vmatmul.mubr.f32.vlgmr.msra.gmra.mxu0 %v2445_v60  ;;  %v10209_v28 = vpop.f32.mrf.mxu1  ;;  %13568 = vmatmul.mubr.f32.vlgmr.msra.gmra.mxu1 %v2452_v61  ;;  %v1021_v60 = vld [vmem:[%s17228_s29 + $0x1580] sm:$0x3]  ;;  %v1023_v61 = vld [vmem:[%s17228_s29 + $0x1590] sm:$0x3] }
 0x29d   : > { %v10140_v29 = vadd.f32 %v10139_v27, %v10070_v13  ;;  %13602 = vmatpush1.xpose.msra.mxu0 %v1013_v20  ;;  %13672 = vmatpush1.xpose.msra.mxu1 %v1015_v21  ;;  %v2513_v13 = vrot.slane %v314_v59, %v17254_v19  ;;  %v644_v20 = vld [vmem:[%s17228_s29 + $0x9b8] sm:$0xff]  ;;  %v650_v59 = vld [vmem:[%s17228_s29 + $0x9e8] sm:$0xff] }
 0x29e   : > { %v10141_v30 = vpop.f32.mrf.mxu0  ;;  %v10211_v31 = vpop.f32.mrf.mxu1  ;;  %13603 = vmatprep.subr.mxu0 %v630_v22  ;;  %13673 = vmatprep.subr.mxu1 %v632_v23  ;;  %v2522_v22 = vcombine.high %v2520_v14, %v2520_v14  ;;  %v2523_v23 = vcombine.high %v315_v15, %v315_v15 }
 0x29f   : > { %v10210_v34 = vadd.f32 %v10209_v28, %v10140_v29  ;;  %13637 = vmatprep.mubr.f32.mxu0 %v2470_v24  ;;  %13707 = vmatprep.mubr.f32.mxu1 %v2471_v25  ;;  %v2521_v21 = vcombine.high %v2513_v13, %v2513_v13  ;;  %v641_v29 = vld [vmem:[%s17228_s29 + $0x9a0] sm:$0xff]  ;;  %v643_v30 = vld [vmem:[%s17228_s29 + $0x9b0] sm:$0xff] }
 0x2a1   : > { %13604 = vmatpush1.xpose.msra.mxu0 %v629_v32  ;;  %13674 = vmatpush1.xpose.msra.mxu1 %v631_v33  ;;  %v1030_v32 = vld [vmem:[%s17228_s29 + $0x15c8] sm:$0x3]  ;;  %v1032_v33 = vld [vmem:[%s17228_s29 + $0x15d8] sm:$0x3] }
 0x2a2   : > { %13741 = vmatprep.subr.mxu0 %v1018_v35  ;;  %13811 = vmatprep.subr.mxu1 %v1020_v36  ;;  %v2537_v35 = vrot.slane %v2523_v23, %v17254_v19  ;;  %v316_v36 = vld [vmem:[%s17222_s3 + $0x278] sm:$0xff] }
 0x2a4   : > { %v10279_v47 = vpop.f32.mrf.mxu0  ;;  %13638 = vmatmul.mubr.f32.vlgmr.msra.gmra.mxu0 %v2462_v16  ;;  %v10349_v48 = vpop.f32.mrf.mxu1  ;;  %13708 = vmatmul.mubr.f32.vlgmr.msra.gmra.mxu1 %v2469_v17  ;;  %v1025_v16 = vld [vmem:[%s17228_s29 + $0x15a0] sm:$0x3]  ;;  %v1027_v17 = vld [vmem:[%s17228_s29 + $0x15b0] sm:$0x3] }
 0x2a5   : > { %v10280_v49 = vadd.f32 %v10279_v47, %v10210_v34  ;;  %13742 = vmatpush1.xpose.msra.mxu0 %v1017_v40  ;;  %13812 = vmatpush1.xpose.msra.mxu1 %v1019_v41  ;;  %v2530_v34 = vrot.slane %v315_v15, %v17254_v19  ;;  %v648_v40 = vld [vmem:[%s17228_s29 + $0x9d8] sm:$0xff]  ;;  %v654_v15 = vld [vmem:[%s17228_s29 + $0xa08] sm:$0xff] }
 0x2a6   : > { %v10281_v50 = vpop.f32.mrf.mxu0  ;;  %v10351_v51 = vpop.f32.mrf.mxu1  ;;  %13743 = vmatprep.subr.mxu0 %v634_v42  ;;  %13813 = vmatprep.subr.mxu1 %v636_v43  ;;  %v2539_v42 = vcombine.high %v2537_v35, %v2537_v35  ;;  %v2540_v43 = vcombine.high %v316_v36, %v316_v36 }
 0x2a7   : > { %v10350_v54 = vadd.f32 %v10349_v48, %v10280_v49  ;;  %13777 = vmatprep.mubr.f32.mxu0 %v2487_v44  ;;  %13847 = vmatprep.mubr.f32.mxu1 %v2488_v45  ;;  %v2538_v41 = vcombine.high %v2530_v34, %v2530_v34  ;;  %v645_v49 = vld [vmem:[%s17228_s29 + $0x9c0] sm:$0xff]  ;;  %v647_v50 = vld [vmem:[%s17228_s29 + $0x9d0] sm:$0xff] }
 0x2a9   : > { %13744 = vmatpush1.xpose.msra.mxu0 %v633_v52  ;;  %13814 = vmatpush1.xpose.msra.mxu1 %v635_v53  ;;  %v1034_v52 = vld [vmem:[%s17228_s29 + $0x15e8] sm:$0x3]  ;;  %v1036_v53 = vld [vmem:[%s17228_s29 + $0x15f8] sm:$0x3] }
 0x2aa   : > { %13881 = vmatprep.subr.mxu0 %v1022_v55  ;;  %13951 = vmatprep.subr.mxu1 %v1024_v56  ;;  %v2554_v55 = vrot.slane %v2540_v43, %v17254_v19  ;;  %v317_v56 = vld [vmem:[%s17222_s3 + $0x280] sm:$0xff] }
 0x2ac   : > { %v10419_v3 = vpop.f32.mrf.mxu0  ;;  %13778 = vmatmul.mubr.f32.vlgmr.msra.gmra.mxu0 %v2479_v37  ;;  %v10489_v4 = vpop.f32.mrf.mxu1  ;;  %13848 = vmatmul.mubr.f32.vlgmr.msra.gmra.mxu1 %v2486_v38  ;;  %v1029_v37 = vld [vmem:[%s17228_s29 + $0x15c0] sm:$0x3]  ;;  %v1031_v38 = vld [vmem:[%s17228_s29 + $0x15d0] sm:$0x3] }
 0x2ad   : > { %v10420_v5 = vadd.f32 %v10419_v3, %v10350_v54  ;;  %13882 = vmatpush1.xpose.msra.mxu0 %v1021_v60  ;;  %13952 = vmatpush1.xpose.msra.mxu1 %v1023_v61  ;;  %v2547_v54 = vrot.slane %v316_v36, %v17254_v19  ;;  %v652_v60 = vld [vmem:[%s17228_s29 + $0x9f8] sm:$0xff]  ;;  %v658_v36 = vld [vmem:[%s17228_s29 + $0xa28] sm:$0xff] }
 0x2ae   : > { %v10421_v6 = vpop.f32.mrf.mxu0  ;;  %v10491_v7 = vpop.f32.mrf.mxu1  ;;  %13883 = vmatprep.subr.mxu0 %v638_v62  ;;  %13953 = vmatprep.subr.mxu1 %v640_v63  ;;  %v2556_v62 = vcombine.high %v2554_v55, %v2554_v55  ;;  %v2557_v63 = vcombine.high %v317_v56, %v317_v56 }
 0x2af   : > { %v10490_v10 = vadd.f32 %v10489_v4, %v10420_v5  ;;  %13917 = vmatprep.mubr.f32.mxu0 %v2504_v0  ;;  %13987 = vmatprep.mubr.f32.mxu1 %v2505_v1  ;;  %v2555_v61 = vcombine.high %v2547_v54, %v2547_v54  ;;  %v649_v5 = vld [vmem:[%s17228_s29 + $0x9e0] sm:$0xff]  ;;  %v651_v6 = vld [vmem:[%s17228_s29 + $0x9f0] sm:$0xff] }
 0x2b1   : > { %13884 = vmatpush1.xpose.msra.mxu0 %v637_v8  ;;  %13954 = vmatpush1.xpose.msra.mxu1 %v639_v9  ;;  %v1038_v8 = vld [vmem:[%s17228_s29 + $0x1608] sm:$0x3]  ;;  %v1040_v9 = vld [vmem:[%s17228_s29 + $0x1618] sm:$0x3] }
 0x2b2   : > { %14021 = vmatprep.subr.mxu0 %v1026_v11  ;;  %14091 = vmatprep.subr.mxu1 %v1028_v12  ;;  %v2571_v11 = vrot.slane %v2557_v63, %v17254_v19  ;;  %v318_v12 = vld [vmem:[%s17222_s3 + $0x288] sm:$0xff] }
 0x2b4   : > { %v10559_v24 = vpop.f32.mrf.mxu0  ;;  %13918 = vmatmul.mubr.f32.vlgmr.msra.gmra.mxu0 %v2496_v57  ;;  %v10629_v25 = vpop.f32.mrf.mxu1  ;;  %13988 = vmatmul.mubr.f32.vlgmr.msra.gmra.mxu1 %v2503_v58  ;;  %v1033_v57 = vld [vmem:[%s17228_s29 + $0x15e0] sm:$0x3]  ;;  %v1035_v58 = vld [vmem:[%s17228_s29 + $0x15f0] sm:$0x3] }
 0x2b5   : > { %v10560_v26 = vadd.f32 %v10559_v24, %v10490_v10  ;;  %14022 = vmatpush1.xpose.msra.mxu0 %v1025_v16  ;;  %14092 = vmatpush1.xpose.msra.mxu1 %v1027_v17  ;;  %v2564_v10 = vrot.slane %v317_v56, %v17254_v19  ;;  %v656_v16 = vld [vmem:[%s17228_s29 + $0xa18] sm:$0xff]  ;;  %v662_v56 = vld [vmem:[%s17228_s29 + $0xa48] sm:$0xff] }
 0x2b6   : > { %v10561_v27 = vpop.f32.mrf.mxu0  ;;  %v10631_v28 = vpop.f32.mrf.mxu1  ;;  %14023 = vmatprep.subr.mxu0 %v642_v18  ;;  %14093 = vmatprep.subr.mxu1 %v644_v20  ;;  %v2573_v18 = vcombine.high %v2571_v11, %v2571_v11  ;;  %v2574_v20 = vcombine.high %v318_v12, %v318_v12 }
 0x2b7   : > { %v10630_v31 = vadd.f32 %v10629_v25, %v10560_v26  ;;  %14057 = vmatprep.mubr.f32.mxu0 %v2521_v21  ;;  %14127 = vmatprep.mubr.f32.mxu1 %v2522_v22  ;;  %v2572_v17 = vcombine.high %v2564_v10, %v2564_v10  ;;  %v653_v26 = vld [vmem:[%s17228_s29 + $0xa00] sm:$0xff]  ;;  %v655_v27 = vld [vmem:[%s17228_s29 + $0xa10] sm:$0xff] }
 0x2b9   : > { %14024 = vmatpush1.xpose.msra.mxu0 %v641_v29  ;;  %14094 = vmatpush1.xpose.msra.mxu1 %v643_v30  ;;  %v1042_v29 = vld [vmem:[%s17228_s29 + $0x1628] sm:$0x3]  ;;  %v1044_v30 = vld [vmem:[%s17228_s29 + $0x1638] sm:$0x3] }
 0x2ba   : > { %14161 = vmatprep.subr.mxu0 %v1030_v32  ;;  %14231 = vmatprep.subr.mxu1 %v1032_v33  ;;  %v2588_v32 = vrot.slane %v2574_v20, %v17254_v19  ;;  %v319_v33 = vld [vmem:[%s17222_s3 + $0x290] sm:$0xff] }
 0x2bc   : > { %v10699_v44 = vpop.f32.mrf.mxu0  ;;  %14058 = vmatmul.mubr.f32.vlgmr.msra.gmra.mxu0 %v2513_v13  ;;  %v10769_v45 = vpop.f32.mrf.mxu1  ;;  %14128 = vmatmul.mubr.f32.vlgmr.msra.gmra.mxu1 %v2520_v14  ;;  %v1037_v13 = vld [vmem:[%s17228_s29 + $0x1600] sm:$0x3]  ;;  %v1039_v14 = vld [vmem:[%s17228_s29 + $0x1610] sm:$0x3] }
 0x2bd   : > { %v10700_v46 = vadd.f32 %v10699_v44, %v10630_v31  ;;  %14162 = vmatpush1.xpose.msra.mxu0 %v1029_v37  ;;  %14232 = vmatpush1.xpose.msra.mxu1 %v1031_v38  ;;  %v2581_v31 = vrot.slane %v318_v12, %v17254_v19  ;;  %v660_v37 = vld [vmem:[%s17228_s29 + $0xa38] sm:$0xff]  ;;  %v666_v12 = vld [vmem:[%s17228_s29 + $0xa68] sm:$0xff] }
 0x2be   : > { %v10701_v47 = vpop.f32.mrf.mxu0  ;;  %v10771_v48 = vpop.f32.mrf.mxu1  ;;  %14163 = vmatprep.subr.mxu0 %v646_v39  ;;  %14233 = vmatprep.subr.mxu1 %v648_v40  ;;  %v2590_v39 = vcombine.high %v2588_v32, %v2588_v32  ;;  %v2591_v40 = vcombine.high %v319_v33, %v319_v33 }
 0x2bf   : > { %v10770_v51 = vadd.f32 %v10769_v45, %v10700_v46  ;;  %14197 = vmatprep.mubr.f32.mxu0 %v2538_v41  ;;  %14267 = vmatprep.mubr.f32.mxu1 %v2539_v42  ;;  %v2589_v38 = vcombine.high %v2581_v31, %v2581_v31  ;;  %v657_v46 = vld [vmem:[%s17228_s29 + $0xa20] sm:$0xff]  ;;  %v659_v47 = vld [vmem:[%s17228_s29 + $0xa30] sm:$0xff] }
 0x2c1   : > { %14164 = vmatpush1.xpose.msra.mxu0 %v645_v49  ;;  %14234 = vmatpush1.xpose.msra.mxu1 %v647_v50  ;;  %v1046_v49 = vld [vmem:[%s17228_s29 + $0x1648] sm:$0x3]  ;;  %v1048_v50 = vld [vmem:[%s17228_s29 + $0x1658] sm:$0x3] }
 0x2c2   : > { %14301 = vmatprep.subr.mxu0 %v1034_v52  ;;  %14371 = vmatprep.subr.mxu1 %v1036_v53  ;;  %v2605_v52 = vrot.slane %v2591_v40, %v17254_v19  ;;  %v320_v53 = vld [vmem:[%s17222_s3 + $0x298] sm:$0xff] }
 0x2c4   : > { %v10839_v0 = vpop.f32.mrf.mxu0  ;;  %14198 = vmatmul.mubr.f32.vlgmr.msra.gmra.mxu0 %v2530_v34  ;;  %v10909_v1 = vpop.f32.mrf.mxu1  ;;  %14268 = vmatmul.mubr.f32.vlgmr.msra.gmra.mxu1 %v2537_v35  ;;  %v1041_v34 = vld [vmem:[%s17228_s29 + $0x1620] sm:$0x3]  ;;  %v1043_v35 = vld [vmem:[%s17228_s29 + $0x1630] sm:$0x3] }
 0x2c5   : > { %v10840_v2 = vadd.f32 %v10839_v0, %v10770_v51  ;;  %14302 = vmatpush1.xpose.msra.mxu0 %v1033_v57  ;;  %14372 = vmatpush1.xpose.msra.mxu1 %v1035_v58  ;;  %v2598_v51 = vrot.slane %v319_v33, %v17254_v19  ;;  %v664_v57 = vld [vmem:[%s17228_s29 + $0xa58] sm:$0xff]  ;;  %v670_v33 = vld [vmem:[%s17228_s29 + $0xa88] sm:$0xff] }
 0x2c6   : > { %v10841_v3 = vpop.f32.mrf.mxu0  ;;  %v10911_v4 = vpop.f32.mrf.mxu1  ;;  %14303 = vmatprep.subr.mxu0 %v650_v59  ;;  %14373 = vmatprep.subr.mxu1 %v652_v60  ;;  %v2607_v59 = vcombine.high %v2605_v52, %v2605_v52  ;;  %v2608_v60 = vcombine.high %v320_v53, %v320_v53 }
 0x2c7   : > { %v10910_v7 = vadd.f32 %v10909_v1, %v10840_v2  ;;  %14337 = vmatprep.mubr.f32.mxu0 %v2555_v61  ;;  %14407 = vmatprep.mubr.f32.mxu1 %v2556_v62  ;;  %v2606_v58 = vcombine.high %v2598_v51, %v2598_v51  ;;  %v661_v2 = vld [vmem:[%s17228_s29 + $0xa40] sm:$0xff]  ;;  %v663_v3 = vld [vmem:[%s17228_s29 + $0xa50] sm:$0xff] }
 0x2c9   : > { %14304 = vmatpush1.xpose.msra.mxu0 %v649_v5  ;;  %14374 = vmatpush1.xpose.msra.mxu1 %v651_v6  ;;  %v1050_v5 = vld [vmem:[%s17228_s29 + $0x1668] sm:$0x3]  ;;  %v1052_v6 = vld [vmem:[%s17228_s29 + $0x1678] sm:$0x3] }
 0x2ca   : > { %14441 = vmatprep.subr.mxu0 %v1038_v8  ;;  %14511 = vmatprep.subr.mxu1 %v1040_v9  ;;  %v2622_v8 = vrot.slane %v2608_v60, %v17254_v19  ;;  %v321_v9 = vld [vmem:[%s17222_s3 + $0x2a0] sm:$0xff] }
 0x2cc   : > { %v10979_v21 = vpop.f32.mrf.mxu0  ;;  %14338 = vmatmul.mubr.f32.vlgmr.msra.gmra.mxu0 %v2547_v54  ;;  %v11049_v22 = vpop.f32.mrf.mxu1  ;;  %14408 = vmatmul.mubr.f32.vlgmr.msra.gmra.mxu1 %v2554_v55  ;;  %v1045_v54 = vld [vmem:[%s17228_s29 + $0x1640] sm:$0x3]  ;;  %v1047_v55 = vld [vmem:[%s17228_s29 + $0x1650] sm:$0x3] }
 0x2cd   : > { %v10980_v23 = vadd.f32 %v10979_v21, %v10910_v7  ;;  %14442 = vmatpush1.xpose.msra.mxu0 %v1037_v13  ;;  %14512 = vmatpush1.xpose.msra.mxu1 %v1039_v14  ;;  %v2615_v7 = vrot.slane %v320_v53, %v17254_v19  ;;  %v668_v13 = vld [vmem:[%s17228_s29 + $0xa78] sm:$0xff]  ;;  %v674_v53 = vld [vmem:[%s17228_s29 + $0xaa8] sm:$0xff] }
 0x2ce   : > { %v10981_v24 = vpop.f32.mrf.mxu0  ;;  %v11051_v25 = vpop.f32.mrf.mxu1  ;;  %14443 = vmatprep.subr.mxu0 %v654_v15  ;;  %14513 = vmatprep.subr.mxu1 %v656_v16  ;;  %v2624_v15 = vcombine.high %v2622_v8, %v2622_v8  ;;  %v2625_v16 = vcombine.high %v321_v9, %v321_v9 }
 0x2cf   : > { %v11050_v28 = vadd.f32 %v11049_v22, %v10980_v23  ;;  %14477 = vmatprep.mubr.f32.mxu0 %v2572_v17  ;;  %14547 = vmatprep.mubr.f32.mxu1 %v2573_v18  ;;  %v2623_v14 = vcombine.high %v2615_v7, %v2615_v7  ;;  %v665_v23 = vld [vmem:[%s17228_s29 + $0xa60] sm:$0xff]  ;;  %v667_v24 = vld [vmem:[%s17228_s29 + $0xa70] sm:$0xff] }
 0x2d1   : > { %14444 = vmatpush1.xpose.msra.mxu0 %v653_v26  ;;  %14514 = vmatpush1.xpose.msra.mxu1 %v655_v27  ;;  %v1054_v26 = vld [vmem:[%s17228_s29 + $0x1688] sm:$0x3]  ;;  %v1056_v27 = vld [vmem:[%s17228_s29 + $0x1698] sm:$0x3] }
 0x2d2   : > { %14581 = vmatprep.subr.mxu0 %v1042_v29  ;;  %14651 = vmatprep.subr.mxu1 %v1044_v30  ;;  %v2639_v29 = vrot.slane %v2625_v16, %v17254_v19  ;;  %v322_v30 = vld [vmem:[%s17222_s3 + $0x2a8] sm:$0xff] }
 0x2d4   : > { %v11119_v41 = vpop.f32.mrf.mxu0  ;;  %14478 = vmatmul.mubr.f32.vlgmr.msra.gmra.mxu0 %v2564_v10  ;;  %v11189_v42 = vpop.f32.mrf.mxu1  ;;  %14548 = vmatmul.mubr.f32.vlgmr.msra.gmra.mxu1 %v2571_v11  ;;  %v1049_v10 = vld [vmem:[%s17228_s29 + $0x1660] sm:$0x3]  ;;  %v1051_v11 = vld [vmem:[%s17228_s29 + $0x1670] sm:$0x3] }
 0x2d5   : > { %v11120_v43 = vadd.f32 %v11119_v41, %v11050_v28  ;;  %14582 = vmatpush1.xpose.msra.mxu0 %v1041_v34  ;;  %14652 = vmatpush1.xpose.msra.mxu1 %v1043_v35  ;;  %v2632_v28 = vrot.slane %v321_v9, %v17254_v19  ;;  %v672_v34 = vld [vmem:[%s17228_s29 + $0xa98] sm:$0xff]  ;;  %v678_v9 = vld [vmem:[%s17228_s29 + $0xac8] sm:$0xff] }
 0x2d6   : > { %v11121_v44 = vpop.f32.mrf.mxu0  ;;  %v11191_v45 = vpop.f32.mrf.mxu1  ;;  %14583 = vmatprep.subr.mxu0 %v658_v36  ;;  %14653 = vmatprep.subr.mxu1 %v660_v37  ;;  %v2641_v36 = vcombine.high %v2639_v29, %v2639_v29  ;;  %v2642_v37 = vcombine.high %v322_v30, %v322_v30 }
 0x2d7   : > { %v11190_v48 = vadd.f32 %v11189_v42, %v11120_v43  ;;  %14617 = vmatprep.mubr.f32.mxu0 %v2589_v38  ;;  %14687 = vmatprep.mubr.f32.mxu1 %v2590_v39  ;;  %v2640_v35 = vcombine.high %v2632_v28, %v2632_v28  ;;  %v669_v43 = vld [vmem:[%s17228_s29 + $0xa80] sm:$0xff]  ;;  %v671_v44 = vld [vmem:[%s17228_s29 + $0xa90] sm:$0xff] }
 0x2d9   : > { %14584 = vmatpush1.xpose.msra.mxu0 %v657_v46  ;;  %14654 = vmatpush1.xpose.msra.mxu1 %v659_v47  ;;  %v1058_v46 = vld [vmem:[%s17228_s29 + $0x16a8] sm:$0x3]  ;;  %v1060_v47 = vld [vmem:[%s17228_s29 + $0x16b8] sm:$0x3] }
 0x2da   : > { %14721 = vmatprep.subr.mxu0 %v1046_v49  ;;  %14791 = vmatprep.subr.mxu1 %v1048_v50  ;;  %v2656_v49 = vrot.slane %v2642_v37, %v17254_v19  ;;  %v323_v50 = vld [vmem:[%s17222_s3 + $0x2b0] sm:$0xff] }
 0x2dc   : > { %v11259_v61 = vpop.f32.mrf.mxu0  ;;  %14618 = vmatmul.mubr.f32.vlgmr.msra.gmra.mxu0 %v2581_v31  ;;  %v11329_v62 = vpop.f32.mrf.mxu1  ;;  %14688 = vmatmul.mubr.f32.vlgmr.msra.gmra.mxu1 %v2588_v32  ;;  %v1053_v31 = vld [vmem:[%s17228_s29 + $0x1680] sm:$0x3]  ;;  %v1055_v32 = vld [vmem:[%s17228_s29 + $0x1690] sm:$0x3] }
 0x2dd   : > { %v11260_v63 = vadd.f32 %v11259_v61, %v11190_v48  ;;  %14722 = vmatpush1.xpose.msra.mxu0 %v1045_v54  ;;  %14792 = vmatpush1.xpose.msra.mxu1 %v1047_v55  ;;  %v2649_v48 = vrot.slane %v322_v30, %v17254_v19  ;;  %v676_v54 = vld [vmem:[%s17228_s29 + $0xab8] sm:$0xff]  ;;  %v682_v30 = vld [vmem:[%s17228_s29 + $0xae8] sm:$0xff] }
 0x2de   : > { %v11261_v0 = vpop.f32.mrf.mxu0  ;;  %v11331_v1 = vpop.f32.mrf.mxu1  ;;  %14723 = vmatprep.subr.mxu0 %v662_v56  ;;  %14793 = vmatprep.subr.mxu1 %v664_v57  ;;  %v2658_v56 = vcombine.high %v2656_v49, %v2656_v49  ;;  %v2659_v57 = vcombine.high %v323_v50, %v323_v50 }
 0x2df   : > { %v11330_v4 = vadd.f32 %v11329_v62, %v11260_v63  ;;  %14757 = vmatprep.mubr.f32.mxu0 %v2606_v58  ;;  %14827 = vmatprep.mubr.f32.mxu1 %v2607_v59  ;;  %v2657_v55 = vcombine.high %v2649_v48, %v2649_v48  ;;  %v673_v63 = vld [vmem:[%s17228_s29 + $0xaa0] sm:$0xff]  ;;  %v675_v0 = vld [vmem:[%s17228_s29 + $0xab0] sm:$0xff] }
 0x2e1   : > { %14724 = vmatpush1.xpose.msra.mxu0 %v661_v2  ;;  %14794 = vmatpush1.xpose.msra.mxu1 %v663_v3  ;;  %v1062_v2 = vld [vmem:[%s17228_s29 + $0x16c8] sm:$0x3]  ;;  %v1064_v3 = vld [vmem:[%s17228_s29 + $0x16d8] sm:$0x3] }
 0x2e2   : > { %14861 = vmatprep.subr.mxu0 %v1050_v5  ;;  %14931 = vmatprep.subr.mxu1 %v1052_v6  ;;  %v2673_v5 = vrot.slane %v2659_v57, %v17254_v19  ;;  %v324_v6 = vld [vmem:[%s17222_s3 + $0x2b8] sm:$0xff] }
 0x2e4   : > { %v11399_v17 = vpop.f32.mrf.mxu0  ;;  %14758 = vmatmul.mubr.f32.vlgmr.msra.gmra.mxu0 %v2598_v51  ;;  %v11469_v18 = vpop.f32.mrf.mxu1  ;;  %14828 = vmatmul.mubr.f32.vlgmr.msra.gmra.mxu1 %v2605_v52  ;;  %v1057_v51 = vld [vmem:[%s17228_s29 + $0x16a0] sm:$0x3]  ;;  %v1059_v52 = vld [vmem:[%s17228_s29 + $0x16b0] sm:$0x3] }
 0x2e5   : > { %v11400_v20 = vadd.f32 %v11399_v17, %v11330_v4  ;;  %14862 = vmatpush1.xpose.msra.mxu0 %v1049_v10  ;;  %14932 = vmatpush1.xpose.msra.mxu1 %v1051_v11  ;;  %v2666_v4 = vrot.slane %v323_v50, %v17254_v19  ;;  %v680_v10 = vld [vmem:[%s17228_s29 + $0xad8] sm:$0xff]  ;;  %v686_v50 = vld [vmem:[%s17228_s29 + $0xb08] sm:$0xff] }
 0x2e6   : > { %v11401_v21 = vpop.f32.mrf.mxu0  ;;  %v11471_v22 = vpop.f32.mrf.mxu1  ;;  %14863 = vmatprep.subr.mxu0 %v666_v12  ;;  %14933 = vmatprep.subr.mxu1 %v668_v13  ;;  %v2675_v12 = vcombine.high %v2673_v5, %v2673_v5  ;;  %v2676_v13 = vcombine.high %v324_v6, %v324_v6 }
 0x2e7   : > { %v11470_v25 = vadd.f32 %v11469_v18, %v11400_v20  ;;  %14897 = vmatprep.mubr.f32.mxu0 %v2623_v14  ;;  %14967 = vmatprep.mubr.f32.mxu1 %v2624_v15  ;;  %v2674_v11 = vcombine.high %v2666_v4, %v2666_v4  ;;  %v677_v20 = vld [vmem:[%s17228_s29 + $0xac0] sm:$0xff]  ;;  %v679_v21 = vld [vmem:[%s17228_s29 + $0xad0] sm:$0xff] }
 0x2e9   : > { %14864 = vmatpush1.xpose.msra.mxu0 %v665_v23  ;;  %14934 = vmatpush1.xpose.msra.mxu1 %v667_v24  ;;  %v1066_v23 = vld [vmem:[%s17228_s29 + $0x16e8] sm:$0x3]  ;;  %v1068_v24 = vld [vmem:[%s17228_s29 + $0x16f8] sm:$0x3] }
 0x2ea   : > { %15001 = vmatprep.subr.mxu0 %v1054_v26  ;;  %15071 = vmatprep.subr.mxu1 %v1056_v27  ;;  %v2690_v26 = vrot.slane %v2676_v13, %v17254_v19  ;;  %v325_v27 = vld [vmem:[%s17222_s3 + $0x2c0] sm:$0xff] }
 0x2ec   : > { %v11539_v38 = vpop.f32.mrf.mxu0  ;;  %14898 = vmatmul.mubr.f32.vlgmr.msra.gmra.mxu0 %v2615_v7  ;;  %v11609_v39 = vpop.f32.mrf.mxu1  ;;  %14968 = vmatmul.mubr.f32.vlgmr.msra.gmra.mxu1 %v2622_v8  ;;  %v1061_v7 = vld [vmem:[%s17228_s29 + $0x16c0] sm:$0x3]  ;;  %v1063_v8 = vld [vmem:[%s17228_s29 + $0x16d0] sm:$0x3] }
 0x2ed   : > { %v11540_v40 = vadd.f32 %v11539_v38, %v11470_v25  ;;  %15002 = vmatpush1.xpose.msra.mxu0 %v1053_v31  ;;  %15072 = vmatpush1.xpose.msra.mxu1 %v1055_v32  ;;  %v2683_v25 = vrot.slane %v324_v6, %v17254_v19  ;;  %v684_v31 = vld [vmem:[%s17228_s29 + $0xaf8] sm:$0xff]  ;;  %v690_v6 = vld [vmem:[%s17228_s29 + $0xb28] sm:$0xff] }
 0x2ee   : > { %v11541_v41 = vpop.f32.mrf.mxu0  ;;  %v11611_v42 = vpop.f32.mrf.mxu1  ;;  %15003 = vmatprep.subr.mxu0 %v670_v33  ;;  %15073 = vmatprep.subr.mxu1 %v672_v34  ;;  %v2692_v33 = vcombine.high %v2690_v26, %v2690_v26  ;;  %v2693_v34 = vcombine.high %v325_v27, %v325_v27 }
 0x2ef   : > { %v11610_v45 = vadd.f32 %v11609_v39, %v11540_v40  ;;  %15037 = vmatprep.mubr.f32.mxu0 %v2640_v35  ;;  %15107 = vmatprep.mubr.f32.mxu1 %v2641_v36  ;;  %v2691_v32 = vcombine.high %v2683_v25, %v2683_v25  ;;  %v681_v40 = vld [vmem:[%s17228_s29 + $0xae0] sm:$0xff]  ;;  %v683_v41 = vld [vmem:[%s17228_s29 + $0xaf0] sm:$0xff] }
 0x2f1   : > { %15004 = vmatpush1.xpose.msra.mxu0 %v669_v43  ;;  %15074 = vmatpush1.xpose.msra.mxu1 %v671_v44  ;;  %v1070_v43 = vld [vmem:[%s17228_s29 + $0x1708] sm:$0x3]  ;;  %v1072_v44 = vld [vmem:[%s17228_s29 + $0x1718] sm:$0x3] }
 0x2f2   : > { %15141 = vmatprep.subr.mxu0 %v1058_v46  ;;  %15211 = vmatprep.subr.mxu1 %v1060_v47  ;;  %v2707_v46 = vrot.slane %v2693_v34, %v17254_v19  ;;  %v326_v47 = vld [vmem:[%s17222_s3 + $0x2c8] sm:$0xff] }
 0x2f4   : > { %v11679_v58 = vpop.f32.mrf.mxu0  ;;  %15038 = vmatmul.mubr.f32.vlgmr.msra.gmra.mxu0 %v2632_v28  ;;  %v11749_v59 = vpop.f32.mrf.mxu1  ;;  %15108 = vmatmul.mubr.f32.vlgmr.msra.gmra.mxu1 %v2639_v29  ;;  %v1065_v28 = vld [vmem:[%s17228_s29 + $0x16e0] sm:$0x3]  ;;  %v1067_v29 = vld [vmem:[%s17228_s29 + $0x16f0] sm:$0x3] }
 0x2f5   : > { %v11680_v60 = vadd.f32 %v11679_v58, %v11610_v45  ;;  %15142 = vmatpush1.xpose.msra.mxu0 %v1057_v51  ;;  %15212 = vmatpush1.xpose.msra.mxu1 %v1059_v52  ;;  %v2700_v45 = vrot.slane %v325_v27, %v17254_v19  ;;  %v688_v51 = vld [vmem:[%s17228_s29 + $0xb18] sm:$0xff]  ;;  %v694_v27 = vld [vmem:[%s17228_s29 + $0xb48] sm:$0xff] }
 0x2f6   : > { %v11681_v61 = vpop.f32.mrf.mxu0  ;;  %v11751_v62 = vpop.f32.mrf.mxu1  ;;  %15143 = vmatprep.subr.mxu0 %v674_v53  ;;  %15213 = vmatprep.subr.mxu1 %v676_v54  ;;  %v2709_v53 = vcombine.high %v2707_v46, %v2707_v46  ;;  %v2710_v54 = vcombine.high %v326_v47, %v326_v47 }
 0x2f7   : > { %v11750_v1 = vadd.f32 %v11749_v59, %v11680_v60  ;;  %15177 = vmatprep.mubr.f32.mxu0 %v2657_v55  ;;  %15247 = vmatprep.mubr.f32.mxu1 %v2658_v56  ;;  %v2708_v52 = vcombine.high %v2700_v45, %v2700_v45  ;;  %v685_v60 = vld [vmem:[%s17228_s29 + $0xb00] sm:$0xff]  ;;  %v687_v61 = vld [vmem:[%s17228_s29 + $0xb10] sm:$0xff] }
 0x2f9   : > { %15144 = vmatpush1.xpose.msra.mxu0 %v673_v63  ;;  %15214 = vmatpush1.xpose.msra.mxu1 %v675_v0  ;;  %v1074_v63 = vld [vmem:[%s17228_s29 + $0x1728] sm:$0x3]  ;;  %v1076_v0 = vld [vmem:[%s17228_s29 + $0x1738] sm:$0x3] }
 0x2fa   : > { %15281 = vmatprep.subr.mxu0 %v1062_v2  ;;  %15351 = vmatprep.subr.mxu1 %v1064_v3  ;;  %v2724_v2 = vrot.slane %v2710_v54, %v17254_v19  ;;  %v327_v3 = vld [vmem:[%s17222_s3 + $0x2d0] sm:$0xff] }
 0x2fc   : > { %v11819_v14 = vpop.f32.mrf.mxu0  ;;  %15178 = vmatmul.mubr.f32.vlgmr.msra.gmra.mxu0 %v2649_v48  ;;  %v11889_v15 = vpop.f32.mrf.mxu1  ;;  %15248 = vmatmul.mubr.f32.vlgmr.msra.gmra.mxu1 %v2656_v49  ;;  %v1069_v48 = vld [vmem:[%s17228_s29 + $0x1700] sm:$0x3]  ;;  %v1071_v49 = vld [vmem:[%s17228_s29 + $0x1710] sm:$0x3] }
 0x2fd   : > { %v11820_v16 = vadd.f32 %v11819_v14, %v11750_v1  ;;  %15282 = vmatpush1.xpose.msra.mxu0 %v1061_v7  ;;  %15352 = vmatpush1.xpose.msra.mxu1 %v1063_v8  ;;  %v2717_v1 = vrot.slane %v326_v47, %v17254_v19  ;;  %v692_v7 = vld [vmem:[%s17228_s29 + $0xb38] sm:$0xff]  ;;  %v698_v47 = vld [vmem:[%s17228_s29 + $0xb68] sm:$0xff] }
 0x2fe   : > { %v11821_v17 = vpop.f32.mrf.mxu0  ;;  %v11891_v18 = vpop.f32.mrf.mxu1  ;;  %15283 = vmatprep.subr.mxu0 %v678_v9  ;;  %15353 = vmatprep.subr.mxu1 %v680_v10  ;;  %v2726_v9 = vcombine.high %v2724_v2, %v2724_v2  ;;  %v2727_v10 = vcombine.high %v327_v3, %v327_v3 }
 0x2ff   : > { %v11890_v22 = vadd.f32 %v11889_v15, %v11820_v16  ;;  %15317 = vmatprep.mubr.f32.mxu0 %v2674_v11  ;;  %15387 = vmatprep.mubr.f32.mxu1 %v2675_v12  ;;  %v2725_v8 = vcombine.high %v2717_v1, %v2717_v1  ;;  %v689_v16 = vld [vmem:[%s17228_s29 + $0xb20] sm:$0xff]  ;;  %v691_v17 = vld [vmem:[%s17228_s29 + $0xb30] sm:$0xff] }
 0x301   : > { %15284 = vmatpush1.xpose.msra.mxu0 %v677_v20  ;;  %15354 = vmatpush1.xpose.msra.mxu1 %v679_v21  ;;  %v1078_v20 = vld [vmem:[%s17228_s29 + $0x1748] sm:$0x3]  ;;  %v1080_v21 = vld [vmem:[%s17228_s29 + $0x1758] sm:$0x3] }
 0x302   : > { %15421 = vmatprep.subr.mxu0 %v1066_v23  ;;  %15491 = vmatprep.subr.mxu1 %v1068_v24  ;;  %v2741_v23 = vrot.slane %v2727_v10, %v17254_v19  ;;  %v328_v24 = vld [vmem:[%s17222_s3 + $0x2d8] sm:$0xff] }
 0x304   : > { %v11959_v35 = vpop.f32.mrf.mxu0  ;;  %15318 = vmatmul.mubr.f32.vlgmr.msra.gmra.mxu0 %v2666_v4  ;;  %v12029_v36 = vpop.f32.mrf.mxu1  ;;  %15388 = vmatmul.mubr.f32.vlgmr.msra.gmra.mxu1 %v2673_v5  ;;  %v1073_v4 = vld [vmem:[%s17228_s29 + $0x1720] sm:$0x3]  ;;  %v1075_v5 = vld [vmem:[%s17228_s29 + $0x1730] sm:$0x3] }
 0x305   : > { %v11960_v37 = vadd.f32 %v11959_v35, %v11890_v22  ;;  %15422 = vmatpush1.xpose.msra.mxu0 %v1065_v28  ;;  %15492 = vmatpush1.xpose.msra.mxu1 %v1067_v29  ;;  %v2734_v22 = vrot.slane %v327_v3, %v17254_v19  ;;  %v696_v28 = vld [vmem:[%s17228_s29 + $0xb58] sm:$0xff]  ;;  %v702_v3 = vld [vmem:[%s17228_s29 + $0xb88] sm:$0xff] }
 0x306   : > { %v11961_v38 = vpop.f32.mrf.mxu0  ;;  %v12031_v39 = vpop.f32.mrf.mxu1  ;;  %15423 = vmatprep.subr.mxu0 %v682_v30  ;;  %15493 = vmatprep.subr.mxu1 %v684_v31  ;;  %v2743_v30 = vcombine.high %v2741_v23, %v2741_v23  ;;  %v2744_v31 = vcombine.high %v328_v24, %v328_v24 }
 0x307   : > { %v12030_v42 = vadd.f32 %v12029_v36, %v11960_v37  ;;  %15457 = vmatprep.mubr.f32.mxu0 %v2691_v32  ;;  %15527 = vmatprep.mubr.f32.mxu1 %v2692_v33  ;;  %v2742_v29 = vcombine.high %v2734_v22, %v2734_v22  ;;  %v693_v37 = vld [vmem:[%s17228_s29 + $0xb40] sm:$0xff]  ;;  %v695_v38 = vld [vmem:[%s17228_s29 + $0xb50] sm:$0xff] }
 0x309   : > { %15424 = vmatpush1.xpose.msra.mxu0 %v681_v40  ;;  %15494 = vmatpush1.xpose.msra.mxu1 %v683_v41  ;;  %v1082_v40 = vld [vmem:[%s17228_s29 + $0x1768] sm:$0x3]  ;;  %v1084_v41 = vld [vmem:[%s17228_s29 + $0x1778] sm:$0x3] }
 0x30a   : > { %15561 = vmatprep.subr.mxu0 %v1070_v43  ;;  %15631 = vmatprep.subr.mxu1 %v1072_v44  ;;  %v2758_v43 = vrot.slane %v2744_v31, %v17254_v19  ;;  %v329_v44 = vld [vmem:[%s17222_s3 + $0x2e0] sm:$0xff] }
 0x30c   : > { %v12099_v55 = vpop.f32.mrf.mxu0  ;;  %15458 = vmatmul.mubr.f32.vlgmr.msra.gmra.mxu0 %v2683_v25  ;;  %v12169_v56 = vpop.f32.mrf.mxu1  ;;  %15528 = vmatmul.mubr.f32.vlgmr.msra.gmra.mxu1 %v2690_v26  ;;  %v1077_v25 = vld [vmem:[%s17228_s29 + $0x1740] sm:$0x3]  ;;  %v1079_v26 = vld [vmem:[%s17228_s29 + $0x1750] sm:$0x3] }
 0x30d   : > { %v12100_v57 = vadd.f32 %v12099_v55, %v12030_v42  ;;  %15562 = vmatpush1.xpose.msra.mxu0 %v1069_v48  ;;  %15632 = vmatpush1.xpose.msra.mxu1 %v1071_v49  ;;  %v2751_v42 = vrot.slane %v328_v24, %v17254_v19  ;;  %v700_v48 = vld [vmem:[%s17228_s29 + $0xb78] sm:$0xff]  ;;  %v706_v24 = vld [vmem:[%s17228_s29 + $0xba8] sm:$0xff] }
 0x30e   : > { %v12101_v58 = vpop.f32.mrf.mxu0  ;;  %v12171_v59 = vpop.f32.mrf.mxu1  ;;  %15563 = vmatprep.subr.mxu0 %v686_v50  ;;  %15633 = vmatprep.subr.mxu1 %v688_v51  ;;  %v2760_v50 = vcombine.high %v2758_v43, %v2758_v43  ;;  %v2761_v51 = vcombine.high %v329_v44, %v329_v44 }
 0x30f   : > { %v12170_v62 = vadd.f32 %v12169_v56, %v12100_v57  ;;  %15597 = vmatprep.mubr.f32.mxu0 %v2708_v52  ;;  %15667 = vmatprep.mubr.f32.mxu1 %v2709_v53  ;;  %v2759_v49 = vcombine.high %v2751_v42, %v2751_v42  ;;  %v697_v57 = vld [vmem:[%s17228_s29 + $0xb60] sm:$0xff]  ;;  %v699_v58 = vld [vmem:[%s17228_s29 + $0xb70] sm:$0xff] }
 0x311   : > { %15564 = vmatpush1.xpose.msra.mxu0 %v685_v60  ;;  %15634 = vmatpush1.xpose.msra.mxu1 %v687_v61  ;;  %v1086_v60 = vld [vmem:[%s17228_s29 + $0x1788] sm:$0x3]  ;;  %v1088_v61 = vld [vmem:[%s17228_s29 + $0x1798] sm:$0x3] }
 0x312   : > { %15701 = vmatprep.subr.mxu0 %v1074_v63  ;;  %15771 = vmatprep.subr.mxu1 %v1076_v0  ;;  %v2775_v63 = vrot.slane %v2761_v51, %v17254_v19  ;;  %v330_v0 = vld [vmem:[%s17222_s3 + $0x2e8] sm:$0xff] }
 0x314   : > { %v12239_v11 = vpop.f32.mrf.mxu0  ;;  %15598 = vmatmul.mubr.f32.vlgmr.msra.gmra.mxu0 %v2700_v45  ;;  %v12309_v12 = vpop.f32.mrf.mxu1  ;;  %15668 = vmatmul.mubr.f32.vlgmr.msra.gmra.mxu1 %v2707_v46  ;;  %v1081_v45 = vld [vmem:[%s17228_s29 + $0x1760] sm:$0x3]  ;;  %v1083_v46 = vld [vmem:[%s17228_s29 + $0x1770] sm:$0x3] }
 0x315   : > { %v12240_v13 = vadd.f32 %v12239_v11, %v12170_v62  ;;  %15702 = vmatpush1.xpose.msra.mxu0 %v1073_v4  ;;  %15772 = vmatpush1.xpose.msra.mxu1 %v1075_v5  ;;  %v2768_v62 = vrot.slane %v329_v44, %v17254_v19  ;;  %v704_v4 = vld [vmem:[%s17228_s29 + $0xb98] sm:$0xff]  ;;  %v710_v44 = vld [vmem:[%s17228_s29 + $0xbc8] sm:$0xff] }
 0x316   : > { %v12241_v14 = vpop.f32.mrf.mxu0  ;;  %v12311_v15 = vpop.f32.mrf.mxu1  ;;  %15703 = vmatprep.subr.mxu0 %v690_v6  ;;  %15773 = vmatprep.subr.mxu1 %v692_v7  ;;  %v2777_v6 = vcombine.high %v2775_v63, %v2775_v63  ;;  %v2778_v7 = vcombine.high %v330_v0, %v330_v0 }
 0x317   : > { %v12310_v18 = vadd.f32 %v12309_v12, %v12240_v13  ;;  %15737 = vmatprep.mubr.f32.mxu0 %v2725_v8  ;;  %15807 = vmatprep.mubr.f32.mxu1 %v2726_v9  ;;  %v2776_v5 = vcombine.high %v2768_v62, %v2768_v62  ;;  %v701_v13 = vld [vmem:[%s17228_s29 + $0xb80] sm:$0xff]  ;;  %v703_v14 = vld [vmem:[%s17228_s29 + $0xb90] sm:$0xff] }
 0x319   : > { %15704 = vmatpush1.xpose.msra.mxu0 %v689_v16  ;;  %15774 = vmatpush1.xpose.msra.mxu1 %v691_v17  ;;  %v1090_v16 = vld [vmem:[%s17228_s29 + $0x17a8] sm:$0x3]  ;;  %v1092_v17 = vld [vmem:[%s17228_s29 + $0x17b8] sm:$0x3] }
 0x31a   : > { %15841 = vmatprep.subr.mxu0 %v1078_v20  ;;  %15911 = vmatprep.subr.mxu1 %v1080_v21  ;;  %v2792_v20 = vrot.slane %v2778_v7, %v17254_v19  ;;  %v331_v21 = vld [vmem:[%s17222_s3 + $0x2f0] sm:$0xff]  ;;  %v713_v7 = vld [vmem:[%s17228_s29 + $0xbe0] sm:$0xff] }
 0x31c   : > { %v12379_v32 = vpop.f32.mrf.mxu0  ;;  %15738 = vmatmul.mubr.f32.vlgmr.msra.gmra.mxu0 %v2717_v1  ;;  %v12449_v33 = vpop.f32.mrf.mxu1  ;;  %15808 = vmatmul.mubr.f32.vlgmr.msra.gmra.mxu1 %v2724_v2  ;;  %v1085_v1 = vld [vmem:[%s17228_s29 + $0x1780] sm:$0x3]  ;;  %v1087_v2 = vld [vmem:[%s17228_s29 + $0x1790] sm:$0x3] }
 0x31d   : > { %v12380_v34 = vadd.f32 %v12379_v32, %v12310_v18  ;;  %15842 = vmatpush1.xpose.msra.mxu0 %v1077_v25  ;;  %15912 = vmatpush1.xpose.msra.mxu1 %v1079_v26  ;;  %v2785_v18 = vrot.slane %v330_v0, %v17254_v19  ;;  %v708_v25 = vld [vmem:[%s17228_s29 + $0xbb8] sm:$0xff] }
 0x31e   : > { %v12381_v35 = vpop.f32.mrf.mxu0  ;;  %v12451_v36 = vpop.f32.mrf.mxu1  ;;  %15843 = vmatprep.subr.mxu0 %v694_v27  ;;  %15913 = vmatprep.subr.mxu1 %v696_v28  ;;  %v2794_v27 = vcombine.high %v2792_v20, %v2792_v20  ;;  %v2795_v28 = vcombine.high %v331_v21, %v331_v21  ;;  %v716_v0 = vld [vmem:[%s17228_s29 + $0xbf8] sm:$0xff] }
 0x31f   : > { %v12450_v39 = vadd.f32 %v12449_v33, %v12380_v34  ;;  %15877 = vmatprep.mubr.f32.mxu0 %v2742_v29  ;;  %15947 = vmatprep.mubr.f32.mxu1 %v2743_v30  ;;  %v2793_v26 = vcombine.high %v2785_v18, %v2785_v18  ;;  %v705_v34 = vld [vmem:[%s17228_s29 + $0xba0] sm:$0xff]  ;;  %v707_v35 = vld [vmem:[%s17228_s29 + $0xbb0] sm:$0xff] }
 0x321   : > { %15844 = vmatpush1.xpose.msra.mxu0 %v693_v37  ;;  %15914 = vmatpush1.xpose.msra.mxu1 %v695_v38  ;;  %v1094_v37 = vld [vmem:[%s17228_s29 + $0x17c8] sm:$0x3]  ;;  %v1096_v38 = vld [vmem:[%s17228_s29 + $0x17d8] sm:$0x3] }
 0x322   : > { %15981 = vmatprep.subr.mxu0 %v1082_v40  ;;  %16051 = vmatprep.subr.mxu1 %v1084_v41  ;;  %v2809_v40 = vrot.slane %v2795_v28, %v17254_v19  ;;  %v332_v41 = vld [vmem:[%s17222_s3 + $0x2f8] sm:$0xff] }
 0x324   : > { %v12519_v52 = vpop.f32.mrf.mxu0  ;;  %15878 = vmatmul.mubr.f32.vlgmr.msra.gmra.mxu0 %v2734_v22  ;;  %v12589_v53 = vpop.f32.mrf.mxu1  ;;  %15948 = vmatmul.mubr.f32.vlgmr.msra.gmra.mxu1 %v2741_v23  ;;  %v1089_v22 = vld [vmem:[%s17228_s29 + $0x17a0] sm:$0x3]  ;;  %v1091_v23 = vld [vmem:[%s17228_s29 + $0x17b0] sm:$0x3] }
 0x325   : > { %v12520_v54 = vadd.f32 %v12519_v52, %v12450_v39  ;;  %15982 = vmatpush1.xpose.msra.mxu0 %v1081_v45  ;;  %16052 = vmatpush1.xpose.msra.mxu1 %v1083_v46  ;;  %v2802_v39 = vrot.slane %v331_v21, %v17254_v19  ;;  %v712_v45 = vld [vmem:[%s17228_s29 + $0xbd8] sm:$0xff] }
 0x326   : > { %v12521_v55 = vpop.f32.mrf.mxu0  ;;  %v12591_v56 = vpop.f32.mrf.mxu1  ;;  %15983 = vmatprep.subr.mxu0 %v698_v47  ;;  %16053 = vmatprep.subr.mxu1 %v700_v48  ;;  %v2811_v47 = vcombine.high %v2809_v40, %v2809_v40  ;;  %v2812_v48 = vcombine.high %v332_v41, %v332_v41 }
 0x327   : > { %v12590_v59 = vadd.f32 %v12589_v53, %v12520_v54  ;;  %16017 = vmatprep.mubr.f32.mxu0 %v2759_v49  ;;  %16087 = vmatprep.mubr.f32.mxu1 %v2760_v50  ;;  %v2810_v46 = vcombine.high %v2802_v39, %v2802_v39  ;;  %v709_v54 = vld [vmem:[%s17228_s29 + $0xbc0] sm:$0xff]  ;;  %v711_v55 = vld [vmem:[%s17228_s29 + $0xbd0] sm:$0xff] }
 0x329   : > { %15984 = vmatpush1.xpose.msra.mxu0 %v697_v57  ;;  %16054 = vmatpush1.xpose.msra.mxu1 %v699_v58  ;;  %v1098_v57 = vld [vmem:[%s17228_s29 + $0x17e8] sm:$0x3]  ;;  %v1100_v58 = vld [vmem:[%s17228_s29 + $0x17f8] sm:$0x3] }
 0x32a   : > { %16121 = vmatprep.subr.mxu0 %v1086_v60  ;;  %16191 = vmatprep.subr.mxu1 %v1088_v61  ;;  %v2826_v60 = vrot.slane %v2812_v48, %v17254_v19  ;;  %v1097_v61 = vld [vmem:[%s17228_s29 + $0x17e0] sm:$0x3] }
 0x32c   : > { %v12659_v8 = vpop.f32.mrf.mxu0  ;;  %16018 = vmatmul.mubr.f32.vlgmr.msra.gmra.mxu0 %v2751_v42  ;;  %v12729_v9 = vpop.f32.mrf.mxu1  ;;  %16088 = vmatmul.mubr.f32.vlgmr.msra.gmra.mxu1 %v2758_v43  ;;  %v1093_v42 = vld [vmem:[%s17228_s29 + $0x17c0] sm:$0x3]  ;;  %v1095_v43 = vld [vmem:[%s17228_s29 + $0x17d0] sm:$0x3] }
 0x32d   : > { %v12660_v10 = vadd.f32 %v12659_v8, %v12590_v59  ;;  %16122 = vmatpush1.xpose.msra.mxu0 %v1085_v1  ;;  %16192 = vmatpush1.xpose.msra.mxu1 %v1087_v2  ;;  %v2819_v59 = vrot.slane %v332_v41, %v17254_v19  ;;  %v2828_v2 = vcombine.high %v2826_v60, %v2826_v60  ;;  %v715_v8 = vld [vmem:[%s17228_s29 + $0xbf0] sm:$0xff] }
 0x32e   : > { %v12661_v11 = vpop.f32.mrf.mxu0  ;;  %v12731_v12 = vpop.f32.mrf.mxu1  ;;  %16123 = vmatprep.subr.mxu0 %v702_v3  ;;  %16193 = vmatprep.subr.mxu1 %v704_v4 }
 0x32f   : > { %v12730_v15 = vadd.f32 %v12729_v9, %v12660_v10  ;;  %16157 = vmatprep.mubr.f32.mxu0 %v2776_v5  ;;  %16227 = vmatprep.mubr.f32.mxu1 %v2777_v6  ;;  %v2827_v1 = vcombine.high %v2819_v59, %v2819_v59 }
 0x331   : > { %16124 = vmatpush1.xpose.msra.mxu0 %v701_v13  ;;  %16194 = vmatpush1.xpose.msra.mxu1 %v703_v14 }
 0x332   : > { %16261 = vmatprep.subr.mxu0 %v1090_v16  ;;  %16331 = vmatprep.subr.mxu1 %v1092_v17 }
 0x334   : > { %v12799_v29 = vpop.f32.mrf.mxu0  ;;  %16158 = vmatmul.mubr.f32.vlgmr.msra.gmra.mxu0 %v2768_v62  ;;  %v12869_v30 = vpop.f32.mrf.mxu1  ;;  %16228 = vmatmul.mubr.f32.vlgmr.msra.gmra.mxu1 %v2775_v63  ;;  %v1099_v62 = vld [vmem:[%s17228_s29 + $0x17f0] sm:$0x3]  ;;  %v714_v63 = vld [vmem:[%s17228_s29 + $0xbe8] sm:$0xff] }
 0x335   : > { %v12800_v31 = vadd.f32 %v12799_v29, %v12730_v15  ;;  %16262 = vmatpush1.xpose.msra.mxu0 %v1089_v22  ;;  %16332 = vmatpush1.xpose.msra.mxu1 %v1091_v23 }
 0x336   : > { %v12801_v32 = vpop.f32.mrf.mxu0  ;;  %v12871_v33 = vpop.f32.mrf.mxu1  ;;  %16263 = vmatprep.subr.mxu0 %v706_v24  ;;  %16333 = vmatprep.subr.mxu1 %v708_v25 }
 0x337   : > { %v12870_v36 = vadd.f32 %v12869_v30, %v12800_v31  ;;  %16297 = vmatprep.mubr.f32.mxu0 %v2793_v26  ;;  %16367 = vmatprep.mubr.f32.mxu1 %v2794_v27 }
 0x339   : > { %16264 = vmatpush1.xpose.msra.mxu0 %v705_v34  ;;  %16334 = vmatpush1.xpose.msra.mxu1 %v707_v35 }
 0x33a   : > { %16401 = vmatprep.subr.mxu0 %v1094_v37  ;;  %16471 = vmatprep.subr.mxu1 %v1096_v38 }
 0x33c   : > { %v12939_v49 = vpop.f32.mrf.mxu0  ;;  %16298 = vmatmul.mubr.f32.vlgmr.msra.gmra.mxu0 %v2785_v18  ;;  %v13009_v50 = vpop.f32.mrf.mxu1  ;;  %16368 = vmatmul.mubr.f32.vlgmr.msra.gmra.mxu1 %v2792_v20 }
 0x33d   : > { %v12940_v51 = vadd.f32 %v12939_v49, %v12870_v36  ;;  %16402 = vmatpush1.xpose.msra.mxu0 %v1093_v42  ;;  %16472 = vmatpush1.xpose.msra.mxu1 %v1095_v43 }
 0x33e   : > { %v12941_v52 = vpop.f32.mrf.mxu0  ;;  %v13011_v53 = vpop.f32.mrf.mxu1  ;;  %16403 = vmatprep.subr.mxu0 %v710_v44  ;;  %16473 = vmatprep.subr.mxu1 %v712_v45 }
 0x33f   : > { %v13010_v56 = vadd.f32 %v13009_v50, %v12940_v51  ;;  %16437 = vmatprep.mubr.f32.mxu0 %v2810_v46  ;;  %16507 = vmatprep.mubr.f32.mxu1 %v2811_v47 }
 0x341   : > { %16404 = vmatpush1.xpose.msra.mxu0 %v709_v54  ;;  %16474 = vmatpush1.xpose.msra.mxu1 %v711_v55 }
 0x342   : > { %16541 = vmatprep.subr.mxu0 %v1098_v57  ;;  %16611 = vmatprep.subr.mxu1 %v1100_v58 }
 0x344   : > { %v13079_v3 = vpop.f32.mrf.mxu0  ;;  %16438 = vmatmul.mubr.f32.vlgmr.msra.gmra.mxu0 %v2802_v39  ;;  %v13149_v4 = vpop.f32.mrf.mxu1  ;;  %16508 = vmatmul.mubr.f32.vlgmr.msra.gmra.mxu1 %v2809_v40 }
 0x345   : > { %v13080_v5 = vadd.f32 %v13079_v3, %v13010_v56  ;;  %16542 = vmatpush1.xpose.msra.mxu0 %v1097_v61  ;;  %16612 = vmatpush1.xpose.msra.mxu1 %v1099_v62 }
 0x346   : > { %v13081_v19 = vpop.f32.mrf.mxu0  ;;  %v13151_v6 = vpop.f32.mrf.mxu1  ;;  %16543 = vmatprep.subr.mxu0 %v714_v63  ;;  %16613 = vmatprep.subr.mxu1 %v716_v0 }
 0x347   : > { %v13150_v9 = vadd.f32 %v13149_v4, %v13080_v5  ;;  %16577 = vmatprep.mubr.f32.mxu0 %v2827_v1  ;;  %16647 = vmatprep.mubr.f32.mxu1 %v2828_v2 }
 0x349   : > { %16544 = vmatpush1.xpose.msra.mxu0 %v713_v7  ;;  %16614 = vmatpush1.xpose.msra.mxu1 %v715_v8 }
 0x34c   : > { %v13219_v10 = vpop.f32.mrf.mxu0  ;;  %16578 = vmatmul.mubr.f32.vlgmr.msra.gmra.mxu0 %v2819_v59  ;;  %16648 = vmatmul.mubr.f32.vlgmr.msra.gmra.mxu1 %v2826_v60  ;;  %v13289_v11 = vpop.f32.mrf.mxu1 }
 0x34d   : > { %v13220_v12 = vadd.f32 %v13219_v10, %v13150_v9 }
 0x34e   : > { %v13221_v13 = vpop.f32.mrf.mxu0  ;;  %v13291_v14 = vpop.f32.mrf.mxu1 }
 0x34f   : > { %v13290_v15 = vadd.f32 %v13289_v11, %v13220_v12 }
 0x354   : > { %v13359_v16 = vpop.f32.mrf.mxu0  ;;  %v13429_v17 = vpop.f32.mrf.mxu1 }
 0x355   : > { %v13360_v18 = vadd.f32 %v13359_v16, %v13290_v15 }
 0x356   : > { %v13361_v20 = vpop.f32.mrf.mxu0  ;;  %v13431_v21 = vpop.f32.mrf.mxu1 }
 0x357   : > { %v13430_v22 = vadd.f32 %v13429_v17, %v13360_v18 }
 0x35c   : > { %v13499_v23 = vpop.f32.mrf.mxu0  ;;  %v13569_v24 = vpop.f32.mrf.mxu1 }
 0x35d   : > { %v13500_v25 = vadd.f32 %v13499_v23, %v13430_v22 }
 0x35e   : > { %v13501_v26 = vpop.f32.mrf.mxu0  ;;  %v13571_v27 = vpop.f32.mrf.mxu1 }
 0x35f   : > { %v13570_v28 = vadd.f32 %v13569_v24, %v13500_v25 }
 0x364   : > { %v13639_v29 = vpop.f32.mrf.mxu0  ;;  %v13709_v30 = vpop.f32.mrf.mxu1 }
 0x365   : > { %v13640_v31 = vadd.f32 %v13639_v29, %v13570_v28 }
 0x366   : > { %v13641_v32 = vpop.f32.mrf.mxu0  ;;  %v13711_v33 = vpop.f32.mrf.mxu1 }
 0x367   : > { %v13710_v34 = vadd.f32 %v13709_v30, %v13640_v31 }
 0x36c   : > { %v13779_v35 = vpop.f32.mrf.mxu0  ;;  %v13849_v36 = vpop.f32.mrf.mxu1 }
 0x36d   : > { %v13780_v37 = vadd.f32 %v13779_v35, %v13710_v34 }
 0x36e   : > { %v13781_v38 = vpop.f32.mrf.mxu0  ;;  %v13851_v39 = vpop.f32.mrf.mxu1 }
 0x36f   : > { %v13850_v40 = vadd.f32 %v13849_v36, %v13780_v37 }
 0x374   : > { %v13919_v41 = vpop.f32.mrf.mxu0  ;;  %v13989_v42 = vpop.f32.mrf.mxu1 }
 0x375   : > { %v13920_v43 = vadd.f32 %v13919_v41, %v13850_v40 }
 0x376   : > { %v13921_v44 = vpop.f32.mrf.mxu0  ;;  %v13991_v45 = vpop.f32.mrf.mxu1 }
 0x377   : > { %v13990_v46 = vadd.f32 %v13989_v42, %v13920_v43 }
 0x37c   : > { %v14059_v47 = vpop.f32.mrf.mxu0  ;;  %v14129_v48 = vpop.f32.mrf.mxu1 }
 0x37d   : > { %v14060_v49 = vadd.f32 %v14059_v47, %v13990_v46 }
 0x37e   : > { %v14061_v50 = vpop.f32.mrf.mxu0  ;;  %v14131_v51 = vpop.f32.mrf.mxu1 }
 0x37f   : > { %v14130_v52 = vadd.f32 %v14129_v48, %v14060_v49 }
 0x384   : > { %v14199_v53 = vpop.f32.mrf.mxu0  ;;  %v14269_v54 = vpop.f32.mrf.mxu1 }
 0x385   : > { %v14200_v55 = vadd.f32 %v14199_v53, %v14130_v52 }
 0x386   : > { %v14201_v56 = vpop.f32.mrf.mxu0  ;;  %v14271_v57 = vpop.f32.mrf.mxu1 }
 0x387   : > { %v14270_v58 = vadd.f32 %v14269_v54, %v14200_v55 }
 0x38c   : > { %v14339_v59 = vpop.f32.mrf.mxu0  ;;  %v14409_v60 = vpop.f32.mrf.mxu1 }
 0x38d   : > { %v14340_v61 = vadd.f32 %v14339_v59, %v14270_v58 }
 0x38e   : > { %v14341_v62 = vpop.f32.mrf.mxu0  ;;  %v14411_v63 = vpop.f32.mrf.mxu1 }
 0x38f   : > { %v14410_v0 = vadd.f32 %v14409_v60, %v14340_v61 }
 0x394   : > { %v14479_v1 = vpop.f32.mrf.mxu0  ;;  %v14549_v2 = vpop.f32.mrf.mxu1 }
 0x395   : > { %v14480_v16 = vadd.f32 %v14479_v1, %v14410_v0 }
 0x396   : > { %v14481_v3 = vpop.f32.mrf.mxu0  ;;  %v14551_v4 = vpop.f32.mrf.mxu1 }
 0x397   : > { %v14550_v22 = vadd.f32 %v14549_v2, %v14480_v16 }
 0x39c   : > { %v14619_v5 = vpop.f32.mrf.mxu0  ;;  %v14689_v19 = vpop.f32.mrf.mxu1 }
 0x39d   : > { %v14620_v23 = vadd.f32 %v14619_v5, %v14550_v22 }
 0x39e   : > { %v14621_v6 = vpop.f32.mrf.mxu0  ;;  %v14691_v7 = vpop.f32.mrf.mxu1 }
 0x39f   : > { %v14690_v26 = vadd.f32 %v14689_v19, %v14620_v23 }
 0x3a4   : > { %v14759_v8 = vpop.f32.mrf.mxu0  ;;  %v14829_v9 = vpop.f32.mrf.mxu1 }
 0x3a5   : > { %v14760_v29 = vadd.f32 %v14759_v8, %v14690_v26 }
 0x3a6   : > { %v14761_v10 = vpop.f32.mrf.mxu0  ;;  %v14831_v11 = vpop.f32.mrf.mxu1 }
 0x3a7   : > { %v14830_v30 = vadd.f32 %v14829_v9, %v14760_v29 }
 0x3ac   : > { %v14899_v12 = vpop.f32.mrf.mxu0  ;;  %v14969_v13 = vpop.f32.mrf.mxu1 }
 0x3ad   : > { %v14900_v33 = vadd.f32 %v14899_v12, %v14830_v30  ;;  %v236_v30 = vld [vmem:[#allocation2] sm:$0x3] }
 0x3ae   : > { %v14901_v14 = vpop.f32.mrf.mxu0  ;;  %v14971_v15 = vpop.f32.mrf.mxu1 }
 0x3af   : > { %v14970_v36 = vadd.f32 %v14969_v13, %v14900_v33 }
 0x3b4   : > { %v15039_v17 = vpop.f32.mrf.mxu0  ;;  %v15109_v18 = vpop.f32.mrf.mxu1 }
 0x3b5   : > { %v15040_v37 = vadd.f32 %v15039_v17, %v14970_v36 }
 0x3b6   : > { %v15041_v20 = vpop.f32.mrf.mxu0  ;;  %v15111_v21 = vpop.f32.mrf.mxu1 }
 0x3b7   : > { %v15110_v42 = vadd.f32 %v15109_v18, %v15040_v37 }
 0x3bc   : > { %v15179_v24 = vpop.f32.mrf.mxu0  ;;  %v15249_v25 = vpop.f32.mrf.mxu1 }
 0x3bd   : > { %v15180_v43 = vadd.f32 %v15179_v24, %v15110_v42 }
 0x3be   : > { %v15181_v27 = vpop.f32.mrf.mxu0  ;;  %v15251_v28 = vpop.f32.mrf.mxu1 }
 0x3bf   : > { %v15250_v46 = vadd.f32 %v15249_v25, %v15180_v43 }
 0x3c4   : > { %v15319_v31 = vpop.f32.mrf.mxu0  ;;  %v15389_v32 = vpop.f32.mrf.mxu1 }
 0x3c5   : > { %v15320_v49 = vadd.f32 %v15319_v31, %v15250_v46 }
 0x3c6   : > { %v15321_v34 = vpop.f32.mrf.mxu0  ;;  %v15391_v35 = vpop.f32.mrf.mxu1 }
 0x3c7   : > { %v15390_v50 = vadd.f32 %v15389_v32, %v15320_v49 }
 0x3cc   : > { %v15459_v38 = vpop.f32.mrf.mxu0  ;;  %v15529_v39 = vpop.f32.mrf.mxu1 }
 0x3cd   : > { %v15460_v53 = vadd.f32 %v15459_v38, %v15390_v50 }
 0x3ce   : > { %v15461_v40 = vpop.f32.mrf.mxu0  ;;  %v15531_v41 = vpop.f32.mrf.mxu1 }
 0x3cf   : > { %v15530_v56 = vadd.f32 %v15529_v39, %v15460_v53 }
 0x3d4   : > { %v15599_v44 = vpop.f32.mrf.mxu0  ;;  %v15669_v45 = vpop.f32.mrf.mxu1 }
 0x3d5   : > { %v15600_v57 = vadd.f32 %v15599_v44, %v15530_v56 }
 0x3d6   : > { %v15601_v47 = vpop.f32.mrf.mxu0  ;;  %v15671_v48 = vpop.f32.mrf.mxu1 }
 0x3d7   : > { %v15670_v62 = vadd.f32 %v15669_v45, %v15600_v57 }
 0x3dc   : > { %v15739_v51 = vpop.f32.mrf.mxu0  ;;  %v15809_v52 = vpop.f32.mrf.mxu1 }
 0x3dd   : > { %v15740_v63 = vadd.f32 %v15739_v51, %v15670_v62 }
 0x3de   : > { %v15741_v54 = vpop.f32.mrf.mxu0  ;;  %v15811_v55 = vpop.f32.mrf.mxu1 }
 0x3df   : > { %v15810_v2 = vadd.f32 %v15809_v52, %v15740_v63 }
 0x3e4   : > { %v15879_v58 = vpop.f32.mrf.mxu0  ;;  %v15949_v59 = vpop.f32.mrf.mxu1 }
 0x3e5   : > { %v15880_v5 = vadd.f32 %v15879_v58, %v15810_v2 }
 0x3e6   : > { %v15881_v60 = vpop.f32.mrf.mxu0  ;;  %v15951_v61 = vpop.f32.mrf.mxu1 }
 0x3e7   : > { %v15950_v19 = vadd.f32 %v15949_v59, %v15880_v5 }
 0x3ec   : > { %v16019_v0 = vpop.f32.mrf.mxu0  ;;  %v16089_v1 = vpop.f32.mrf.mxu1 }
 0x3ed   : > { %v16020_v8 = vadd.f32 %v16019_v0, %v15950_v19 }
 0x3ee   : > { %v16021_v3 = vpop.f32.mrf.mxu0  ;;  %v16091_v4 = vpop.f32.mrf.mxu1 }
 0x3ef   : > { %v16090_v11 = vadd.f32 %v16089_v1, %v16020_v8 }
 0x3f4   : > { %v16159_v6 = vpop.f32.mrf.mxu0  ;;  %v16229_v7 = vpop.f32.mrf.mxu1 }
 0x3f5   : > { %v16160_v12 = vadd.f32 %v16159_v6, %v16090_v11 }
 0x3f6   : > { %v16161_v9 = vpop.f32.mrf.mxu0  ;;  %v16231_v10 = vpop.f32.mrf.mxu1 }
 0x3f7   : > { %v16230_v17 = vadd.f32 %v16229_v7, %v16160_v12 }
 0x3fc   : > { %v16299_v13 = vpop.f32.mrf.mxu0  ;;  %v16369_v14 = vpop.f32.mrf.mxu1 }
 0x3fd   : > { %v16300_v18 = vadd.f32 %v16299_v13, %v16230_v17 }
 0x3fe   : > { %v16301_v15 = vpop.f32.mrf.mxu0  ;;  %v16371_v16 = vpop.f32.mrf.mxu1 }
 0x3ff   : > { %v16370_v22 = vadd.f32 %v16369_v14, %v16300_v18 }
 0x404   : > { %v16439_v20 = vpop.f32.mrf.mxu0  ;;  %v16509_v21 = vpop.f32.mrf.mxu1 }
 0x405   : > { %v16440_v25 = vadd.f32 %v16439_v20, %v16370_v22 }
 0x406   : > { %v16441_v23 = vpop.f32.mrf.mxu0  ;;  %v16511_v24 = vpop.f32.mrf.mxu1 }
 0x407   : > { %v16510_v26 = vadd.f32 %v16509_v21, %v16440_v25 }
 0x40c   : > { %v16579_v27 = vpop.f32.mrf.mxu0  ;;  %v16649_v28 = vpop.f32.mrf.mxu1 }
 0x40d   : > { %v16580_v29 = vadd.f32 %v16579_v27, %v16510_v26 }
 0x40e   : > { %v16581_v31 = vpop.f32.mrf.mxu0  ;;  %v16651_v32 = vpop.f32.mrf.mxu1 }
 0x40f   : > { %v16650_v33 = vadd.f32 %v16649_v28, %v16580_v29  ;;  %16659 = sbr.rel (%p16780_p7) target bundleno = 1052 (0x41c), region = 44 }
 0x411   : > { %v16653_v34 = vadd.f32 %v16650_v33, %v236_v30 }
 0x413   : > { %16655 = vst.msk [vmem:[#allocation2] sm:$0x3] %vm16654_vm1, %v16653_v34 }
 0x41a   : > { %v16660_v35 = vld [vmem:[#allocation2] sm:$0x3] }
 0x41b   : > { %16661 = vst.msk [vmem:[%s17239_s20] sm:$0x3] %vm16654_vm1, %v16660_v35 }
 0x41c PF: > { %s18_s16 = sadd.s32 1, %s17092_s16   ;;  %s18332_s9 = smov %s17068_s10 }
 0x41d   : > { %p15_p4 = scmp.ge.s32.totalorder %s18_s16, 6   ;;  %s18333_s10 = smov %s17072_s11 }
 0x41e   : > { %s18334_s11 = smov %s17188_s30  ;;  %s18335_s12 = smov %s17084_s14 }
 0x41f   : > { %s18336_s13 = smov %s17088_s15  ;;  %s18337_s14 = smov %s18340_s18 }
 0x420   : > { %s18338_s15 = smov %s18344_s19  ;;  %17 = sbr.rel (!%p15_p4) target bundleno = 7 (0x7), region = 89 }
 0x425   :  { %16681 = vsyncpa [#allocation4], 1 }
 0x426   :  { %16683 = vsyncpa [#allocation4 + $0x1], 1 }
 0x427   :  { %16684 = vsyncpa [#allocation6], 1 }
 0x428   :  { %16686 = vsyncpa [#allocation6 + $0x1], 1 }

</bundles_post_ra>
